<compile_context>
chip_gen: v6e
topology: v6e:2x2x1
jax: 0.10.0
libtpu: 0.0.40
codegen_flags: <defaults>
</compile_context>

<pallas_src>
import functools

import jax
import jax.numpy as jnp
from jax.experimental import pallas as pl
from jax.experimental.pallas import tpu as pltpu


_RRELU_SLOPE = (1.0 / 8.0 + 1.0 / 3.0) / 2.0  # torch.nn.RReLU eval-mode slope
_LANE = 128
_MAX_ROW_TILE = 256    # conv output-row tile (v7x-safe; raise to 512 on v5e/v6e)
_MAX_K_TILE = 1024     # conv contraction tile over source nodes
_GRU_UNROLL = 4        # GRU steps fused per grid iteration in the evolve kernel


def _round_up(x, m):
    return ((x + m - 1) // m) * m


def _pad2(x, rows, cols):
    r, c = x.shape[-2:]
    return jnp.pad(x, [(0, 0)] * (x.ndim - 2) + [(0, rows - r), (0, cols - c)])


# ---------------------------------------------------------------------------
# Kernel 1: evolve the GCN weight with the matrix GRU for all T steps.
#   grid = (ceil(T / U),)  ["arbitrary" -- sequential carry in VMEM scratch]
#   Each grid step runs U fully-unrolled GRU steps and emits U weight slabs.
# ---------------------------------------------------------------------------
def _evolve_w_kernel(w0_ref, wu_ref, uh_ref, bias_ref, w_out_ref, q_scr, *,
                     unroll):
    """U GRU steps on the (R, C) weight; writes U evolved weights.

    w0:   (R, C)    f32   initial weight (read only at grid step 0)
    wu:   (3R, R)   bf16  stacked [(Wz+Uz); (Wr+Ur); Wh]
    uh:   (R, R)    bf16
    bias: (3R, C)   f32   stacked [bz; br; bh]
    out:  (U, R, C) bf16  (block g of the (T_pad, R, C) weight stack)
    q_scr:(R, C)    f32   carry (persists across grid steps)
    """
    @pl.when(pl.program_id(0) == 0)
    def _init():
        q_scr[...] = w0_ref[...]

    r = q_scr.shape[0]
    wu = wu_ref[...]
    uh = uh_ref[...]
    bias = bias_ref[...]

    q = q_scr[...]
    for u in range(unroll):  # fully unrolled; LLO overlaps matmuls / elementwise
        q_bf = q.astype(jnp.bfloat16)
        # One tall MXU matmul for the three gates that multiply Q.
        gates = (jnp.dot(wu, q_bf, preferred_element_type=jnp.float32) + bias)
        update = jax.nn.sigmoid(gates[:r])
        reset = jax.nn.sigmoid(gates[r:2 * r])
        h_cap = reset * q
        h_tilde = jnp.tanh(
            gates[2 * r:]
            + jnp.dot(uh, h_cap.astype(jnp.bfloat16),
                      preferred_element_type=jnp.float32))
        q = (1.0 - update) * q + update * h_tilde
        w_out_ref[u] = q.astype(w_out_ref.dtype)

    q_scr[...] = q


def _evolve_weights(w0, wu_stack, uh, bias_stack, n_steps):
    r_pad, c_pad = w0.shape
    unroll = min(_GRU_UNROLL, n_steps)
    t_pad = _round_up(n_steps, unroll)  # extra trailing steps are harmless / unread
    grid_spec = pltpu.PrefetchScalarGridSpec(
        num_scalar_prefetch=0,
        grid=(t_pad // unroll,),
        in_specs=[
            pl.BlockSpec((r_pad, c_pad), lambda g: (0, 0)),       # stays resident
            pl.BlockSpec((3 * r_pad, r_pad), lambda g: (0, 0)),   # stays resident
            pl.BlockSpec((r_pad, r_pad), lambda g: (0, 0)),       # stays resident
            pl.BlockSpec((3 * r_pad, c_pad), lambda g: (0, 0)),   # stays resident
        ],
        out_specs=pl.BlockSpec((unroll, r_pad, c_pad), lambda g: (g, 0, 0)),
        scratch_shapes=[pltpu.VMEM((r_pad, c_pad), jnp.float32)],
    )
    return pl.pallas_call(
        functools.partial(_evolve_w_kernel, unroll=unroll),
        grid_spec=grid_spec,
        out_shape=jax.ShapeDtypeStruct((t_pad, r_pad, c_pad), jnp.bfloat16),
        compiler_params=pltpu.CompilerParams(
            dimension_semantics=("arbitrary",)),
    )(w0, wu_stack, uh, bias_stack)


# ---------------------------------------------------------------------------
# Kernel 2: batched graph conv over all T snapshots.
#   grid = (T, N_pad // tile_n, N_pad // tile_k)
#   (T, row) "parallel"; k (contraction over source nodes) innermost
#   "arbitrary" with an f32 VMEM accumulator -> VMEM bounded independent of N.
# ---------------------------------------------------------------------------
def _graph_conv_kernel(a_ref, x_ref, w_ref, y_ref, acc_ref):
    """acc += A_block @ X_block;  at k==last: y = RReLU(acc @ W).

    a: (tile_n, tile_k) bf16, x: (tile_k, F_in) bf16, w: (F_in, F_out) bf16,
    acc: (tile_n, F_in) f32, y: (tile_n, F_out) bf16.
    """
    k = pl.program_id(2)

    @pl.when(k == 0)
    def _zero():
        acc_ref[...] = jnp.zeros_like(acc_ref)

    acc_ref[...] += jnp.dot(a_ref[...], x_ref[...],
                            preferred_element_type=jnp.float32)

    @pl.when(k == pl.num_programs(2) - 1)
    def _finalize():
        h = jnp.dot(acc_ref[...].astype(jnp.bfloat16), w_ref[...],
                    preferred_element_type=jnp.float32)
        y_ref[...] = jnp.where(h >= 0.0, h, _RRELU_SLOPE * h).astype(y_ref.dtype)


def _graph_conv_all_steps(a_bf, x_bf, w_stack, n_steps, tile_n, tile_k):
    _, n_pad, _ = a_bf.shape
    f_in_pad = x_bf.shape[-1]
    f_out_pad = w_stack.shape[-1]

    # Double-buffered bf16 blocks + f32 accumulator scratch.
    vmem_bytes = (2 * 2 * (tile_n * tile_k + tile_k * f_in_pad
                           + f_in_pad * f_out_pad + tile_n * f_out_pad)
                  + 4 * tile_n * f_in_pad)
    vmem_limit = int(min(max(2 * vmem_bytes, 32 << 20), 48 << 20))

    flops = 2 * n_steps * (n_pad * n_pad * f_in_pad
                           + n_pad * f_in_pad * f_out_pad)
    bytes_accessed = 2 * n_steps * (n_pad * n_pad + n_pad * f_in_pad
                                    + f_in_pad * f_out_pad + n_pad * f_out_pad)

    grid_spec = pltpu.PrefetchScalarGridSpec(
        num_scalar_prefetch=0,
        grid=(n_steps, n_pad // tile_n, n_pad // tile_k),
        in_specs=[
            pl.BlockSpec((None, tile_n, tile_k), lambda t, r, k: (t, r, k)),
            pl.BlockSpec((None, tile_k, f_in_pad), lambda t, r, k: (t, k, 0)),
            pl.BlockSpec((None, f_in_pad, f_out_pad), lambda t, r, k: (t, 0, 0)),
        ],
        out_specs=pl.BlockSpec((None, tile_n, f_out_pad),
                               lambda t, r, k: (t, r, 0)),
        scratch_shapes=[pltpu.VMEM((tile_n, f_in_pad), jnp.float32)],
    )
    return pl.pallas_call(
        _graph_conv_kernel,
        grid_spec=grid_spec,
        out_shape=jax.ShapeDtypeStruct((n_steps, n_pad, f_out_pad),
                                       jnp.bfloat16),
        compiler_params=pltpu.CompilerParams(
            dimension_semantics=("parallel", "parallel", "arbitrary"),
            vmem_limit_bytes=vmem_limit),
        cost_estimate=pl.CostEstimate(flops=flops, transcendentals=0,
                                      bytes_accessed=bytes_accessed),
    )(a_bf, x_bf, w_stack)


# ---------------------------------------------------------------------------
# Parameter construction (matches PyTorch __init__ shapes / init)
# ---------------------------------------------------------------------------
def xavier_uniform(key, shape):
    fan_in, fan_out = shape[0], shape[1]
    bound = (6.0 / (fan_in + fan_out)) ** 0.5
    return jax.random.uniform(key, shape, jnp.float32, -bound, bound)


def init_mat_gru_cell_params(key, rows, cols):
    keys = jax.random.split(key, 6)
    params = {}
    for gate, (kw, ku) in zip(("update", "reset", "htilda"),
                              [(keys[0], keys[1]), (keys[2], keys[3]),
                               (keys[4], keys[5])]):
        params[gate] = {
            "W": xavier_uniform(kw, (rows, rows)),
            "U": xavier_uniform(ku, (rows, rows)),
            "bias": jnp.zeros((rows, cols), jnp.float32),
        }
    return params


def init_evolvegcno_params(key, in_feats, n_hidden, num_layers):
    recurrent, gcn_weights = [], []
    dims = [in_feats] + [n_hidden] * (num_layers - 1)
    for d in dims:
        key, k_cell, k_w = jax.random.split(key, 3)
        recurrent.append(init_mat_gru_cell_params(k_cell, d, n_hidden))
        gcn_weights.append(xavier_uniform(k_w, (d, n_hidden)))
    return {"recurrent": recurrent, "gcn_weights": gcn_weights}


def normalized_adjacency(adj):
    """DGL GraphConv norm='both': A_hat = D_in^{-1/2} A D_out^{-1/2}, degs clamped >= 1."""
    d_in = jnp.clip(adj.sum(axis=1), 1.0, None)
    d_out = jnp.clip(adj.sum(axis=0), 1.0, None)
    return adj * jax.lax.rsqrt(d_in)[:, None] * jax.lax.rsqrt(d_out)[None, :]


# ---------------------------------------------------------------------------
# EvolveGCNO forward
# ---------------------------------------------------------------------------
@jax.jit
def evolvegcno_forward(params, a_hat_stack, feat_stack):
    """a_hat_stack: (T, N, N) f32; feat_stack: (T, N, F_in) f32."""
    num_layers = len(params["gcn_weights"])
    n_hidden = params["gcn_weights"][-1].shape[1]
    t_steps, n_nodes, _ = a_hat_stack.shape
    f_in = feat_stack.shape[-1]

    # Node padding / tile selection.  n_pad is lane-dense (>=128) and a
    # multiple of both tile_n and tile_k; zero A rows/cols and zero feature
    # rows are inert so results on the real region are unchanged.
    n_pad = _round_up(n_nodes, _LANE)
    if n_pad > _MAX_ROW_TILE:
        n_pad = _round_up(n_nodes, _MAX_ROW_TILE)
        tile_n = _MAX_ROW_TILE
    else:
        tile_n = n_pad
    if n_pad > _MAX_K_TILE:
        n_pad = _round_up(n_nodes, _MAX_K_TILE)  # _MAX_K_TILE % _MAX_ROW_TILE == 0
        tile_k = _MAX_K_TILE
    else:
        tile_k = n_pad

    a_bf = _pad2(a_hat_stack, n_pad, n_pad).astype(jnp.bfloat16)
    f0_pad = _round_up(f_in, _LANE)
    x_bf = _pad2(feat_stack, n_pad, f0_pad).astype(jnp.bfloat16)

    # (1) Evolve all layers' weight chains up front (params-only dependency),
    #     so the serial GRU kernels run off the conv critical path.
    w_stacks = []
    for i in range(num_layers):
        w0 = params["gcn_weights"][i]
        cell = params["recurrent"][i]
        rows, cols = w0.shape
        r_pad = _round_up(rows, _LANE)
        c_pad = _round_up(cols, _LANE)

        w0_p = _pad2(w0, r_pad, c_pad)
        # z_topk == prev_Q in this module, so W@Q + U@Q == (W+U)@Q for the
        # update/reset gates; only Uh @ h_cap stays a separate matmul.
        wu_stack = jnp.concatenate([
            _pad2(cell["update"]["W"] + cell["update"]["U"], r_pad, r_pad),
            _pad2(cell["reset"]["W"] + cell["reset"]["U"], r_pad, r_pad),
            _pad2(cell["htilda"]["W"], r_pad, r_pad),
        ], axis=0).astype(jnp.bfloat16)
        uh = _pad2(cell["htilda"]["U"], r_pad, r_pad).astype(jnp.bfloat16)
        bias_stack = jnp.concatenate([
            _pad2(cell["update"]["bias"], r_pad, c_pad),
            _pad2(cell["reset"]["bias"], r_pad, c_pad),
            _pad2(cell["htilda"]["bias"], r_pad, c_pad),
        ], axis=0)

        w_stacks.append(_evolve_weights(w0_p, wu_stack, uh, bias_stack, t_steps))

    # (2) Graph conv for every snapshot, per layer.  (No input/output aliasing
    #     of the feature stack: each output row tile reads all input rows.)
    for i in range(num_layers):
        x_bf = _graph_conv_all_steps(a_bf, x_bf, w_stacks[i], t_steps,
                                     tile_n, tile_k)

    return x_bf[-1, :n_nodes, :n_hidden].astype(jnp.float32)


# ---------------------------------------------------------------------------
if __name__ == "__main__":
    # Small shapes consistent with the module (scaled down from 166/256).
    IN_FEATS = 32
    N_HIDDEN = 64
    NUM_LAYERS = 2
    N_NODES = 16
    T = 3  # number of graph snapshots

    key = jax.random.PRNGKey(0)
    key, k_params = jax.random.split(key)
    params = init_evolvegcno_params(k_params, IN_FEATS, N_HIDDEN, NUM_LAYERS)

    a_list, x_list = [], []
    for _ in range(T):
        key, k_adj, k_feat = jax.random.split(key, 3)
        # Random symmetric adjacency, no self loops (DGL GraphConv adds none).
        upper = (jax.random.uniform(k_adj, (N_NODES, N_NODES)) > 0.6).astype(jnp.float32)
        adj = jnp.triu(upper, k=1)
        adj = adj + adj.T
        a_list.append(normalized_adjacency(adj))
        x_list.append(jax.random.normal(k_feat, (N_NODES, IN_FEATS), jnp.float32))

    a_hat_stack = jnp.stack(a_list)   # (T, N, N)
    feat_stack = jnp.stack(x_list)    # (T, N, F_in)

    out = evolvegcno_forward(params, a_hat_stack, feat_stack)
    out = jax.block_until_ready(out)
    assert out.shape == (N_NODES, N_HIDDEN), out.shape
    assert bool(jnp.all(jnp.isfinite(out)))
    print("KERNEL_OK")
</pallas_src>

<mosaic_0001>
module attributes {stable_mosaic.version = 11 : i64} {
  func.func @_evolve_w_kernel(%arg0: i32, %arg1: memref<128x128xf32, #tpu.memory_space<vmem>>, %arg2: memref<384x128xbf16, #tpu.memory_space<vmem>>, %arg3: memref<128x128xbf16, #tpu.memory_space<vmem>>, %arg4: memref<384x128xf32, #tpu.memory_space<vmem>>, %arg5: memref<3x128x128xbf16, #tpu.memory_space<vmem>>, %arg6: memref<128x128xf32, #tpu.memory_space<vmem>>) attributes {dimension_semantics = [#tpu.dimension_semantics<arbitrary>], iteration_bounds = array<i64: 1>, scalar_prefetch = 0 : i64, scratch_operands = 1 : i64, tpu.core_type = #tpu.core_type<tc>, window_params = [{pipeline_mode = #tpu.pipeline_mode<synchronous>, transform_indices = @transform_0, window_bounds = array<i64: 128, 128>}, {pipeline_mode = #tpu.pipeline_mode<synchronous>, transform_indices = @transform_1, window_bounds = array<i64: 384, 128>}, {pipeline_mode = #tpu.pipeline_mode<synchronous>, transform_indices = @transform_2, window_bounds = array<i64: 128, 128>}, {pipeline_mode = #tpu.pipeline_mode<synchronous>, transform_indices = @transform_3, window_bounds = array<i64: 384, 128>}, {transform_indices = @transform_4, window_bounds = array<i64: 3, 128, 128>}]} {
    %c0_i32 = arith.constant 0 : i32
    %0 = arith.cmpi eq, %arg0, %c0_i32 : i32
    %1 = arith.extui %0 : i1 to i32
    %c0_i32_0 = arith.constant 0 : i32
    %2 = arith.cmpi ne, %1, %c0_i32_0 : i32
    scf.if %2 {
      %c0_31 = arith.constant 0 : index
      %c0_32 = arith.constant 0 : index
      %98 = vector.load %arg1[%c0_31, %c0_32] : memref<128x128xf32, #tpu.memory_space<vmem>>, vector<128x128xf32>
      %c0_33 = arith.constant 0 : index
      %c0_34 = arith.constant 0 : index
      %99 = vector.load %arg6[%c0_33, %c0_34] : memref<128x128xf32, #tpu.memory_space<vmem>>, vector<128x128xf32>
      tpu.vector_store %arg6[%c0_33, %c0_34], %98 {strides = array<i32>} : memref<128x128xf32, #tpu.memory_space<vmem>>, vector<128x128xf32>,
    } else {
    }
    %c0 = arith.constant 0 : index
    %c0_1 = arith.constant 0 : index
    %3 = vector.load %arg2[%c0, %c0_1] : memref<384x128xbf16, #tpu.memory_space<vmem>>, vector<384x128xbf16>
    %c0_2 = arith.constant 0 : index
    %c0_3 = arith.constant 0 : index
    %4 = vector.load %arg3[%c0_2, %c0_3] : memref<128x128xbf16, #tpu.memory_space<vmem>>, vector<128x128xbf16>
    %c0_4 = arith.constant 0 : index
    %c0_5 = arith.constant 0 : index
    %5 = vector.load %arg4[%c0_4, %c0_5] : memref<384x128xf32, #tpu.memory_space<vmem>>, vector<384x128xf32>
    %c0_6 = arith.constant 0 : index
    %c0_7 = arith.constant 0 : index
    %6 = vector.load %arg6[%c0_6, %c0_7] : memref<128x128xf32, #tpu.memory_space<vmem>>, vector<128x128xf32>
    %7 = arith.truncf %6 : vector<128x128xf32> to vector<128x128xbf16>
    %cst = arith.constant dense<0.000000e+00> : vector<384x128xf32>
    %8 = tpu.matmul %3, %7, %cst {dimension_numbers = #tpu.dot_dimension_numbers<[1], [0], [0], [1], [0, 0, 1, 1], [], []>} : vector<384x128xbf16>, vector<128x128xbf16>, vector<384x128xf32> -> vector<384x128xf32>
    %9 = arith.addf %8, %5 : vector<384x128xf32>
    %10 = vector.extract_strided_slice %9 {offsets = [0, 0], sizes = [128, 128], strides = [1, 1]} : vector<384x128xf32> to vector<128x128xf32>
    %11 = arith.negf %10 : vector<128x128xf32>
    %12 = math.exp %11 : vector<128x128xf32>
    %cst_8 = arith.constant 1.000000e+00 : f32
    %13 = vector.broadcast %cst_8 : f32 to vector<128x128xf32>
    %14 = arith.addf %13, %12 : vector<128x128xf32>
    %15 = arith.divf %13, %14 : vector<128x128xf32>
    %16 = vector.extract_strided_slice %9 {offsets = [128, 0], sizes = [128, 128], strides = [1, 1]} : vector<384x128xf32> to vector<128x128xf32>
    %17 = arith.negf %16 : vector<128x128xf32>
    %18 = math.exp %17 : vector<128x128xf32>
    %cst_9 = arith.constant 1.000000e+00 : f32
    %19 = vector.broadcast %cst_9 : f32 to vector<128x128xf32>
    %20 = arith.addf %19, %18 : vector<128x128xf32>
    %21 = arith.divf %19, %20 : vector<128x128xf32>
    %22 = arith.mulf %21, %6 : vector<128x128xf32>
    %23 = vector.extract_strided_slice %9 {offsets = [256, 0], sizes = [128, 128], strides = [1, 1]} : vector<384x128xf32> to vector<128x128xf32>
    %24 = arith.truncf %22 : vector<128x128xf32> to vector<128x128xbf16>
    %cst_10 = arith.constant dense<0.000000e+00> : vector<128x128xf32>
    %25 = tpu.matmul %4, %24, %cst_10 {dimension_numbers = #tpu.dot_dimension_numbers<[1], [0], [0], [1], [0, 0, 1, 1], [], []>} : vector<128x128xbf16>, vector<128x128xbf16>, vector<128x128xf32> -> vector<128x128xf32>
    %26 = arith.addf %23, %25 : vector<128x128xf32>
    %27 = math.tanh %26 : vector<128x128xf32>
    %cst_11 = arith.constant 1.000000e+00 : f32
    %28 = vector.broadcast %cst_11 : f32 to vector<128x128xf32>
    %29 = arith.subf %28, %15 : vector<128x128xf32>
    %30 = arith.mulf %29, %6 : vector<128x128xf32>
    %31 = arith.mulf %15, %27 : vector<128x128xf32>
    %32 = arith.addf %30, %31 : vector<128x128xf32>
    %33 = arith.truncf %32 : vector<128x128xf32> to vector<128x128xbf16>
    %c0_12 = arith.constant 0 : index
    %c0_13 = arith.constant 0 : index
    %c0_14 = arith.constant 0 : index
    %34 = vector.load %arg5[%c0_12, %c0_13, %c0_14] : memref<3x128x128xbf16, #tpu.memory_space<vmem>>, vector<1x128x128xbf16>
    %35 = vector.shape_cast %34 : vector<1x128x128xbf16> to vector<128x128xbf16>
    %36 = vector.shape_cast %33 : vector<128x128xbf16> to vector<1x128x128xbf16>
    tpu.vector_store %arg5[%c0_12, %c0_13, %c0_14], %36 {strides = array<i32>} : memref<3x128x128xbf16, #tpu.memory_space<vmem>>, vector<1x128x128xbf16>,
    %37 = arith.truncf %32 : vector<128x128xf32> to vector<128x128xbf16>
    %cst_15 = arith.constant dense<0.000000e+00> : vector<384x128xf32>
    %38 = tpu.matmul %3, %37, %cst_15 {dimension_numbers = #tpu.dot_dimension_numbers<[1], [0], [0], [1], [0, 0, 1, 1], [], []>} : vector<384x128xbf16>, vector<128x128xbf16>, vector<384x128xf32> -> vector<384x128xf32>
    %39 = arith.addf %38, %5 : vector<384x128xf32>
    %40 = vector.extract_strided_slice %39 {offsets = [0, 0], sizes = [128, 128], strides = [1, 1]} : vector<384x128xf32> to vector<128x128xf32>
    %41 = arith.negf %40 : vector<128x128xf32>
    %42 = math.exp %41 : vector<128x128xf32>
    %cst_16 = arith.constant 1.000000e+00 : f32
    %43 = vector.broadcast %cst_16 : f32 to vector<128x128xf32>
    %44 = arith.addf %43, %42 : vector<128x128xf32>
    %45 = arith.divf %43, %44 : vector<128x128xf32>
    %46 = vector.extract_strided_slice %39 {offsets = [128, 0], sizes = [128, 128], strides = [1, 1]} : vector<384x128xf32> to vector<128x128xf32>
    %47 = arith.negf %46 : vector<128x128xf32>
    %48 = math.exp %47 : vector<128x128xf32>
    %cst_17 = arith.constant 1.000000e+00 : f32
    %49 = vector.broadcast %cst_17 : f32 to vector<128x128xf32>
    %50 = arith.addf %49, %48 : vector<128x128xf32>
    %51 = arith.divf %49, %50 : vector<128x128xf32>
    %52 = arith.mulf %51, %32 : vector<128x128xf32>
    %53 = vector.extract_strided_slice %39 {offsets = [256, 0], sizes = [128, 128], strides = [1, 1]} : vector<384x128xf32> to vector<128x128xf32>
    %54 = arith.truncf %52 : vector<128x128xf32> to vector<128x128xbf16>
    %cst_18 = arith.constant dense<0.000000e+00> : vector<128x128xf32>
    %55 = tpu.matmul %4, %54, %cst_18 {dimension_numbers = #tpu.dot_dimension_numbers<[1], [0], [0], [1], [0, 0, 1, 1], [], []>} : vector<128x128xbf16>, vector<128x128xbf16>, vector<128x128xf32> -> vector<128x128xf32>
    %56 = arith.addf %53, %55 : vector<128x128xf32>
    %57 = math.tanh %56 : vector<128x128xf32>
    %cst_19 = arith.constant 1.000000e+00 : f32
    %58 = vector.broadcast %cst_19 : f32 to vector<128x128xf32>
    %59 = arith.subf %58, %45 : vector<128x128xf32>
    %60 = arith.mulf %59, %32 : vector<128x128xf32>
    %61 = arith.mulf %45, %57 : vector<128x128xf32>
    %62 = arith.addf %60, %61 : vector<128x128xf32>
    %63 = arith.truncf %62 : vector<128x128xf32> to vector<128x128xbf16>
    %c1 = arith.constant 1 : index
    %c0_20 = arith.constant 0 : index
    %c0_21 = arith.constant 0 : index
    %64 = vector.load %arg5[%c1, %c0_20, %c0_21] : memref<3x128x128xbf16, #tpu.memory_space<vmem>>, vector<1x128x128xbf16>
    %65 = vector.shape_cast %64 : vector<1x128x128xbf16> to vector<128x128xbf16>
    %66 = vector.shape_cast %63 : vector<128x128xbf16> to vector<1x128x128xbf16>
    tpu.vector_store %arg5[%c1, %c0_20, %c0_21], %66 {strides = array<i32>} : memref<3x128x128xbf16, #tpu.memory_space<vmem>>, vector<1x128x128xbf16>,
    %67 = arith.truncf %62 : vector<128x128xf32> to vector<128x128xbf16>
    %cst_22 = arith.constant dense<0.000000e+00> : vector<384x128xf32>
    %68 = tpu.matmul %3, %67, %cst_22 {dimension_numbers = #tpu.dot_dimension_numbers<[1], [0], [0], [1], [0, 0, 1, 1], [], []>} : vector<384x128xbf16>, vector<128x128xbf16>, vector<384x128xf32> -> vector<384x128xf32>
    %69 = arith.addf %68, %5 : vector<384x128xf32>
    %70 = vector.extract_strided_slice %69 {offsets = [0, 0], sizes = [128, 128], strides = [1, 1]} : vector<384x128xf32> to vector<128x128xf32>
    %71 = arith.negf %70 : vector<128x128xf32>
    %72 = math.exp %71 : vector<128x128xf32>
    %cst_23 = arith.constant 1.000000e+00 : f32
    %73 = vector.broadcast %cst_23 : f32 to vector<128x128xf32>
    %74 = arith.addf %73, %72 : vector<128x128xf32>
    %75 = arith.divf %73, %74 : vector<128x128xf32>
    %76 = vector.extract_strided_slice %69 {offsets = [128, 0], sizes = [128, 128], strides = [1, 1]} : vector<384x128xf32> to vector<128x128xf32>
    %77 = arith.negf %76 : vector<128x128xf32>
    %78 = math.exp %77 : vector<128x128xf32>
    %cst_24 = arith.constant 1.000000e+00 : f32
    %79 = vector.broadcast %cst_24 : f32 to vector<128x128xf32>
    %80 = arith.addf %79, %78 : vector<128x128xf32>
    %81 = arith.divf %79, %80 : vector<128x128xf32>
    %82 = arith.mulf %81, %62 : vector<128x128xf32>
    %83 = vector.extract_strided_slice %69 {offsets = [256, 0], sizes = [128, 128], strides = [1, 1]} : vector<384x128xf32> to vector<128x128xf32>
    %84 = arith.truncf %82 : vector<128x128xf32> to vector<128x128xbf16>
    %cst_25 = arith.constant dense<0.000000e+00> : vector<128x128xf32>
    %85 = tpu.matmul %4, %84, %cst_25 {dimension_numbers = #tpu.dot_dimension_numbers<[1], [0], [0], [1], [0, 0, 1, 1], [], []>} : vector<128x128xbf16>, vector<128x128xbf16>, vector<128x128xf32> -> vector<128x128xf32>
    %86 = arith.addf %83, %85 : vector<128x128xf32>
    %87 = math.tanh %86 : vector<128x128xf32>
    %cst_26 = arith.constant 1.000000e+00 : f32
    %88 = vector.broadcast %cst_26 : f32 to vector<128x128xf32>
    %89 = arith.subf %88, %75 : vector<128x128xf32>
    %90 = arith.mulf %89, %62 : vector<128x128xf32>
    %91 = arith.mulf %75, %87 : vector<128x128xf32>
    %92 = arith.addf %90, %91 : vector<128x128xf32>
    %93 = arith.truncf %92 : vector<128x128xf32> to vector<128x128xbf16>
    %c2 = arith.constant 2 : index
    %c0_27 = arith.constant 0 : index
    %c0_28 = arith.constant 0 : index
    %94 = vector.load %arg5[%c2, %c0_27, %c0_28] : memref<3x128x128xbf16, #tpu.memory_space<vmem>>, vector<1x128x128xbf16>
    %95 = vector.shape_cast %94 : vector<1x128x128xbf16> to vector<128x128xbf16>
    %96 = vector.shape_cast %93 : vector<128x128xbf16> to vector<1x128x128xbf16>
    tpu.vector_store %arg5[%c2, %c0_27, %c0_28], %96 {strides = array<i32>} : memref<3x128x128xbf16, #tpu.memory_space<vmem>>, vector<1x128x128xbf16>,
    %c0_29 = arith.constant 0 : index
    %c0_30 = arith.constant 0 : index
    %97 = vector.load %arg6[%c0_29, %c0_30] : memref<128x128xf32, #tpu.memory_space<vmem>>, vector<128x128xf32>
    tpu.vector_store %arg6[%c0_29, %c0_30], %92 {strides = array<i32>} : memref<128x128xf32, #tpu.memory_space<vmem>>, vector<128x128xf32>,
    return
  }
  func.func @transform_0(%arg0: i32) -> (i32, i32) {
    %c0_i32 = arith.constant 0 : i32
    %c0_i32_0 = arith.constant 0 : i32
    %c0_i32_1 = arith.constant 0 : i32
    return %c0_i32, %c0_i32_0 : i32, i32
  }
  func.func @transform_1(%arg0: i32) -> (i32, i32) {
    %c0_i32 = arith.constant 0 : i32
    %c0_i32_0 = arith.constant 0 : i32
    %c0_i32_1 = arith.constant 0 : i32
    return %c0_i32, %c0_i32_0 : i32, i32
  }
  func.func @transform_2(%arg0: i32) -> (i32, i32) {
    %c0_i32 = arith.constant 0 : i32
    %c0_i32_0 = arith.constant 0 : i32
    %c0_i32_1 = arith.constant 0 : i32
    return %c0_i32, %c0_i32_0 : i32, i32
  }
  func.func @transform_3(%arg0: i32) -> (i32, i32) {
    %c0_i32 = arith.constant 0 : i32
    %c0_i32_0 = arith.constant 0 : i32
    %c0_i32_1 = arith.constant 0 : i32
    return %c0_i32, %c0_i32_0 : i32, i32
  }
  func.func @transform_4(%arg0: i32) -> (i32, i32, i32) {
    %c0_i32 = arith.constant 0 : i32
    %c0_i32_0 = arith.constant 0 : i32
    %c0_i32_1 = arith.constant 0 : i32
    return %arg0, %c0_i32, %c0_i32_0 : i32, i32, i32
  }
}

module attributes {stable_mosaic.version = 11 : i64} {
  func.func @_graph_conv_kernel(%arg0: i32, %arg1: i32, %arg2: i32, %arg3: memref<1x128x128xbf16, #tpu.memory_space<vmem>>, %arg4: memref<1x128x128xbf16, #tpu.memory_space<vmem>>, %arg5: memref<1x128x128xbf16, #tpu.memory_space<vmem>>, %arg6: memref<1x128x128xbf16, #tpu.memory_space<vmem>>, %arg7: memref<128x128xf32, #tpu.memory_space<vmem>>) attributes {dimension_semantics = [#tpu.dimension_semantics<parallel>, #tpu.dimension_semantics<parallel>, #tpu.dimension_semantics<arbitrary>], iteration_bounds = array<i64: 3, 1, 1>, scalar_prefetch = 0 : i64, scratch_operands = 1 : i64, tpu.core_type = #tpu.core_type<tc>, window_params = [{transform_indices = @transform_0, window_bounds = array<i64: 1, 128, 128>}, {transform_indices = @transform_1, window_bounds = array<i64: 1, 128, 128>}, {transform_indices = @transform_2, window_bounds = array<i64: 1, 128, 128>}, {transform_indices = @transform_3, window_bounds = array<i64: 1, 128, 128>}]} {
    %c0_i32 = arith.constant 0 : i32
    %0 = arith.cmpi eq, %arg2, %c0_i32 : i32
    %1 = arith.extui %0 : i1 to i32
    %c0_i32_0 = arith.constant 0 : i32
    %2 = arith.cmpi ne, %1, %c0_i32_0 : i32
    scf.if %2 {
      %cst_12 = arith.constant 0.000000e+00 : f32
      %14 = vector.broadcast %cst_12 : f32 to vector<128x128xf32>
      %c0_13 = arith.constant 0 : index
      %c0_14 = arith.constant 0 : index
      %15 = vector.load %arg7[%c0_13, %c0_14] : memref<128x128xf32, #tpu.memory_space<vmem>>, vector<128x128xf32>
      tpu.vector_store %arg7[%c0_13, %c0_14], %14 {strides = array<i32>} : memref<128x128xf32, #tpu.memory_space<vmem>>, vector<128x128xf32>,
    } else {
    }
    %c0 = arith.constant 0 : index
    %c0_1 = arith.constant 0 : index
    %3 = vector.load %arg7[%c0, %c0_1] : memref<128x128xf32, #tpu.memory_space<vmem>>, vector<128x128xf32>
    %c0_2 = arith.constant 0 : index
    %c0_3 = arith.constant 0 : index
    %c0_4 = arith.constant 0 : index
    %4 = vector.load %arg3[%c0_2, %c0_3, %c0_4] : memref<1x128x128xbf16, #tpu.memory_space<vmem>>, vector<1x128x128xbf16>
    %5 = vector.shape_cast %4 : vector<1x128x128xbf16> to vector<128x128xbf16>
    %c0_5 = arith.constant 0 : index
    %c0_6 = arith.constant 0 : index
    %c0_7 = arith.constant 0 : index
    %6 = vector.load %arg4[%c0_5, %c0_6, %c0_7] : memref<1x128x128xbf16, #tpu.memory_space<vmem>>, vector<1x128x128xbf16>
    %7 = vector.shape_cast %6 : vector<1x128x128xbf16> to vector<128x128xbf16>
    %cst = arith.constant dense<0.000000e+00> : vector<128x128xf32>
    %8 = tpu.matmul %5, %7, %cst {dimension_numbers = #tpu.dot_dimension_numbers<[1], [0], [0], [1], [0, 0, 1, 1], [], []>} : vector<128x128xbf16>, vector<128x128xbf16>, vector<128x128xf32> -> vector<128x128xf32>
    %9 = arith.addf %3, %8 : vector<128x128xf32>
    %c0_8 = arith.constant 0 : index
    %c0_9 = arith.constant 0 : index
    %10 = vector.load %arg7[%c0_8, %c0_9] : memref<128x128xf32, #tpu.memory_space<vmem>>, vector<128x128xf32>
    tpu.vector_store %arg7[%c0_8, %c0_9], %9 {strides = array<i32>} : memref<128x128xf32, #tpu.memory_space<vmem>>, vector<128x128xf32>,
    %c0_i32_10 = arith.constant 0 : i32
    %11 = arith.cmpi eq, %arg2, %c0_i32_10 : i32
    %12 = arith.extui %11 : i1 to i32
    %c0_i32_11 = arith.constant 0 : i32
    %13 = arith.cmpi ne, %12, %c0_i32_11 : i32
    scf.if %13 {
      %c0_12 = arith.constant 0 : index
      %c0_13 = arith.constant 0 : index
      %14 = vector.load %arg7[%c0_12, %c0_13] : memref<128x128xf32, #tpu.memory_space<vmem>>, vector<128x128xf32>
      %15 = arith.truncf %14 : vector<128x128xf32> to vector<128x128xbf16>
      %c0_14 = arith.constant 0 : index
      %c0_15 = arith.constant 0 : index
      %c0_16 = arith.constant 0 : index
      %16 = vector.load %arg5[%c0_14, %c0_15, %c0_16] : memref<1x128x128xbf16, #tpu.memory_space<vmem>>, vector<1x128x128xbf16>
      %17 = vector.shape_cast %16 : vector<1x128x128xbf16> to vector<128x128xbf16>
      %cst_17 = arith.constant dense<0.000000e+00> : vector<128x128xf32>
      %18 = tpu.matmul %15, %17, %cst_17 {dimension_numbers = #tpu.dot_dimension_numbers<[1], [0], [0], [1], [0, 0, 1, 1], [], []>} : vector<128x128xbf16>, vector<128x128xbf16>, vector<128x128xf32> -> vector<128x128xf32>
      %cst_18 = arith.constant 0.000000e+00 : f32
      %19 = vector.broadcast %cst_18 : f32 to vector<128x128xf32>
      %20 = arith.cmpf oge, %18, %19 : vector<128x128xf32>
      %cst_19 = arith.constant 0.229166672 : f32
      %21 = vector.broadcast %cst_19 : f32 to vector<128x128xf32>
      %22 = arith.mulf %21, %18 : vector<128x128xf32>
      %23 = arith.select %20, %18, %22 : vector<128x128xi1>, vector<128x128xf32>
      %24 = arith.truncf %23 : vector<128x128xf32> to vector<128x128xbf16>
      %c0_20 = arith.constant 0 : index
      %c0_21 = arith.constant 0 : index
      %c0_22 = arith.constant 0 : index
      %25 = vector.load %arg6[%c0_20, %c0_21, %c0_22] : memref<1x128x128xbf16, #tpu.memory_space<vmem>>, vector<1x128x128xbf16>
      %26 = vector.shape_cast %25 : vector<1x128x128xbf16> to vector<128x128xbf16>
      %27 = vector.shape_cast %24 : vector<128x128xbf16> to vector<1x128x128xbf16>
      tpu.vector_store %arg6[%c0_20, %c0_21, %c0_22], %27 {strides = array<i32>} : memref<1x128x128xbf16, #tpu.memory_space<vmem>>, vector<1x128x128xbf16>,
    } else {
    }
    return
  }
  func.func @transform_0(%arg0: i32, %arg1: i32, %arg2: i32) -> (i32, i32, i32) {
    %c0_i32 = arith.constant 0 : i32
    return %arg0, %arg1, %arg2 : i32, i32, i32
  }
  func.func @transform_1(%arg0: i32, %arg1: i32, %arg2: i32) -> (i32, i32, i32) {
    %c0_i32 = arith.constant 0 : i32
    %c0_i32_0 = arith.constant 0 : i32
    return %arg0, %arg2, %c0_i32 : i32, i32, i32
  }
  func.func @transform_2(%arg0: i32, %arg1: i32, %arg2: i32) -> (i32, i32, i32) {
    %c0_i32 = arith.constant 0 : i32
    %c0_i32_0 = arith.constant 0 : i32
    %c0_i32_1 = arith.constant 0 : i32
    return %arg0, %c0_i32, %c0_i32_0 : i32, i32, i32
  }
  func.func @transform_3(%arg0: i32, %arg1: i32, %arg2: i32) -> (i32, i32, i32) {
    %c0_i32 = arith.constant 0 : i32
    %c0_i32_0 = arith.constant 0 : i32
    return %arg0, %arg1, %c0_i32 : i32, i32, i32
  }
}

</mosaic_0001>

<bundles_post_ra>
// kernel: evolvegcno_forward.6
= control target key start
LH: loop header
LB: loop body
LE: loop exit
PB: predicated region body
PF: predicated region fallthrough
CT: control target
= control target key end

     0   :  { %s1327_s12 = smov 0   ;;  %s1329_s13 = smov 0   ;;  %s1412_s0 = inlined_call_operand.vmem [shape: bf16[3,128,128], index: 0, kind: input, shape index: {}]   ;;  %s1413_s1 = inlined_call_operand.vmem [shape: bf16[3,128,128], index: 1, kind: input, shape index: {}]   ;;  %s1414_s2 = inlined_call_operand.vmem [shape: bf16[3,128,128], index: 2, kind: input, shape index: {}]   ;;  %s1415_s3 = inlined_call_operand.vmem [shape: bf16[3,128,128], index: 3, kind: output, shape index: {}]  }
   0x1   :  { %s1331_s14 = smov 0  }
   0x2 LB: > { %s32_s15 = sadd.s32 1, %s1301_s13  ;;  %p1021_p0 = scmp.ge.s32.totalorder %s1305_s14, 1  ;;  %s1305_s14 = sphi %s1331_s14, %s13_s14   ;;  %s1301_s13 = sphi %s1329_s13, %s1417_s13   ;;  %s1297_s12 = sphi %s1327_s12, %s1416_s12  }
   0x3   : > { %p34_p1 = scmp.ge.s32.totalorder %s32_s15, 3  ;;  %p197_p2 = scmp.lt.s32.totalorder %s1305_s14, 4 }
   0x5   : > { %s1419_s15 = smov (%p34_p1, %s32_s15), 0  ;;  %p198_p3 = pnand %p1021_p0, %p197_p2 }
   0x6   : > { %p247_p4 = scmp.lt.s32.totalorder (!%p198_p3), %s1297_s12, 2 }
   0x7   : > { %201 = sbr.rel (%p198_p3) target bundleno = 479 (0x1df), region = 32 }
   0xc   : > { %s1421_s12 = smov (!%p247_p4, %s1297_s12), 2 }
   0xd   : > { %s1345_s16 = sshll.u32 %s1421_s12, 6 }
   0xe   : > { %s1351_s19 = scalar_lea.vmem %s1413_s1, %s1345_s16  ;;  %s1360_s22 = scalar_lea.vmem %s1412_s0, %s1345_s16 }
   0xf   : > { %v1259_v0 = vld [vmem:[%s1351_s19 + $0x38] sm:$0xff]   ;;  %v1260_v1 = vld [vmem:[%s1351_s19 + $0x30] sm:$0xff]   ;;  %v1261_v2 = vld [vmem:[%s1351_s19 + $0x28] sm:$0xff]   ;;  %s1369_s25 = scalar_lea.vmem %s1414_s2, %s1345_s16  ;;  %s1393_s28 = scalar_lea.vmem %s1415_s3, %s1345_s16 }
  0x10   : > { %1171 = vmatprep.subr.bf16.mxu0 %v1259_v0  ;;  %v1262_v3 = vld [vmem:[%s1351_s19 + $0x20] sm:$0xff]   ;;  %v1263_v5 = vld [vmem:[%s1351_s19 + $0x18] sm:$0xff]   ;;  %v1264_v6 = vld [vmem:[%s1351_s19 + $0x10] sm:$0xff]  }
  0x11   : > { %1172 = vmatpush3.bf16.msra.mxu0 %v1259_v0  ;;  %v1267_v4 = vld [vmem:[%s1360_s22] sm:$0xff]   ;;  %v1275_v7 = vld [vmem:[%s1369_s25 + $0x38] sm:$0xff]   ;;  %v1276_v8 = vld [vmem:[%s1369_s25 + $0x30] sm:$0xff]  }
  0x12   : > { %1173 = vmatprep.subr.bf16.mxu0 %v1260_v1  ;;  %1187 = vmatprep.mubr.bf16.mxu0 %v1267_v4  ;;  %v1265_v9 = vld [vmem:[%s1351_s19 + $0x8] sm:$0xff]   ;;  %v1266_v11 = vld [vmem:[%s1351_s19] sm:$0xff]   ;;  %v1279_v13 = vld [vmem:[%s1369_s25 + $0x18] sm:$0xff]  }
  0x13   : > { %1203 = vmatprep.subr.bf16.mxu1 %v1275_v7  ;;  %v1277_v10 = vld [vmem:[%s1369_s25 + $0x28] sm:$0xff]   ;;  %v1278_v12 = vld [vmem:[%s1369_s25 + $0x20] sm:$0xff]   ;;  %v1269_v15 = vld [vmem:[%s1360_s22 + $0x10] sm:$0xff]  }
  0x14   : > { %1204 = vmatpush3.bf16.msra.mxu1 %v1275_v7  ;;  %v1268_v14 = vld [vmem:[%s1360_s22 + $0x8] sm:$0xff]   ;;  %v1280_v16 = vld [vmem:[%s1369_s25 + $0x10] sm:$0xff]   ;;  %v1270_v17 = vld [vmem:[%s1360_s22 + $0x18] sm:$0xff]  }
  0x15   : > { %1174 = vmatpush3.bf16.msra.mxu0 %v1260_v1  ;;  %1205 = vmatprep.subr.bf16.mxu1 %v1276_v8  ;;  %v1271_v18 = vld [vmem:[%s1360_s22 + $0x20] sm:$0xff]   ;;  %v1272_v19 = vld [vmem:[%s1360_s22 + $0x28] sm:$0xff]   ;;  %v1273_v20 = vld [vmem:[%s1360_s22 + $0x30] sm:$0xff]  }
  0x16   : > { %1175 = vmatprep.subr.bf16.mxu0 %v1261_v2  ;;  %v1274_v21 = vld [vmem:[%s1360_s22 + $0x38] sm:$0xff]   ;;  %v1281_v22 = vld [vmem:[%s1369_s25 + $0x8] sm:$0xff]   ;;  %v1282_v23 = vld [vmem:[%s1369_s25] sm:$0xff]  }
  0x18   : > { %1206 = vmatpush3.bf16.msra.mxu1 %v1276_v8 }
  0x19   : > { %1176 = vmatpush3.bf16.msra.mxu0 %v1261_v2  ;;  %1207 = vmatprep.subr.bf16.mxu1 %v1277_v10 }
  0x1a   : > { %1177 = vmatprep.subr.bf16.mxu0 %v1262_v3 }
  0x1c   : > { %1208 = vmatpush3.bf16.msra.mxu1 %v1277_v10 }
  0x1d   : > { %1178 = vmatpush3.bf16.msra.mxu0 %v1262_v3  ;;  %1209 = vmatprep.subr.bf16.mxu1 %v1278_v12 }
  0x1e   : > { %1179 = vmatprep.subr.bf16.mxu0 %v1263_v5 }
  0x20   : > { %1210 = vmatpush3.bf16.msra.mxu1 %v1278_v12 }
  0x21   : > { %1180 = vmatpush3.bf16.msra.mxu0 %v1263_v5  ;;  %1211 = vmatprep.subr.bf16.mxu1 %v1279_v13 }
  0x22   : > { %1181 = vmatprep.subr.bf16.mxu0 %v1264_v6 }
  0x24   : > { %1212 = vmatpush3.bf16.msra.mxu1 %v1279_v13 }
  0x25   : > { %1182 = vmatpush3.bf16.msra.mxu0 %v1264_v6  ;;  %1213 = vmatprep.subr.bf16.mxu1 %v1280_v16 }
  0x26   : > { %1183 = vmatprep.subr.bf16.mxu0 %v1265_v9 }
  0x28   : > { %1214 = vmatpush3.bf16.msra.mxu1 %v1280_v16 }
  0x29   : > { %1184 = vmatpush3.bf16.msra.mxu0 %v1265_v9  ;;  %1215 = vmatprep.subr.bf16.mxu1 %v1281_v22 }
  0x2a   : > { %1185 = vmatprep.subr.bf16.mxu0 %v1266_v11 }
  0x2c   : > { %1216 = vmatpush3.bf16.msra.mxu1 %v1281_v22 }
  0x2d   : > { %1186 = vmatpush3.bf16.msra.mxu0 %v1266_v11  ;;  %1217 = vmatprep.subr.bf16.mxu1 %v1282_v23 }
  0x30   : > { %1188 = vmatmul.mubr.bf16.vlgmr.msra.gmra.mxu0 %v1268_v14  ;;  %1218 = vmatpush3.bf16.msra.mxu1 %v1282_v23 }
  0x31   : > { %1191 = vmatprep.mubr.bf16.mxu0 %v1269_v15 }
  0x38   : > { %1192 = vmatmul.mubr.bf16.gmra.mxu0 %v1270_v17 }
  0x39   : > { %1195 = vmatprep.mubr.bf16.mxu0 %v1271_v18 }
  0x40   : > { %1196 = vmatmul.mubr.bf16.gmra.mxu0 %v1272_v19 }
  0x41   : > { %1199 = vmatprep.mubr.bf16.mxu0 %v1273_v20 }
  0x48   : > { %1200 = vmatmul.mubr.bf16.gmra.mxu0 %v1274_v21 }
  0xf0   : > { %v1189_v24 = vpop.f32.mrf.mxu0 }
  0xf2   : > { %v483_v25 = vpop.f32.mrf.mxu0 }
  0xf4   : > { %v1190_v26 = vpop.f32.mrf.mxu0 }
  0xf5   : > { %v598_v29 = vpack.c.bf16 %v1190_v26, %v1189_v24 }
  0xf6   : > { %v486_v27 = vpop.f32.mrf.mxu0 }
  0xf7   : > { %v597_v28 = vpack.c.bf16 %v486_v27, %v483_v25 }
  0xf8   : > { %v1193_v30 = vpop.f32.mrf.mxu0 }
  0xf9   : > { %1219 = vmatprep.mubr.bf16.mxu1 %v597_v28 }
  0xfa   : > { %v499_v31 = vpop.f32.mrf.mxu0  ;;  %1220 = vmatmul.mubr.bf16.vlgmr.msra.gmra.mxu1 %v598_v29 }
  0xfc   : > { %v1194_v32 = vpop.f32.mrf.mxu0 }
  0xfd   : > { %v600_v35 = vpack.c.bf16 %v1194_v32, %v1193_v30 }
  0xfe   : > { %v502_v33 = vpop.f32.mrf.mxu0 }
  0xff   : > { %v599_v34 = vpack.c.bf16 %v502_v33, %v499_v31 }
 0x100   : > { %v1197_v36 = vpop.f32.mrf.mxu0 }
 0x101   : > { %1223 = vmatprep.mubr.bf16.mxu1 %v599_v34 }
 0x102   : > { %v515_v37 = vpop.f32.mrf.mxu0  ;;  %1224 = vmatmul.mubr.bf16.gmra.mxu1 %v600_v35 }
 0x104   : > { %v1198_v38 = vpop.f32.mrf.mxu0 }
 0x105   : > { %v602_v41 = vpack.c.bf16 %v1198_v38, %v1197_v36 }
 0x106   : > { %v518_v39 = vpop.f32.mrf.mxu0 }
 0x107   : > { %v601_v40 = vpack.c.bf16 %v518_v39, %v515_v37 }
 0x108   : > { %v1201_v42 = vpop.f32.mrf.mxu0 }
 0x109   : > { %1227 = vmatprep.mubr.bf16.mxu1 %v601_v40 }
 0x10a   : > { %v531_v43 = vpop.f32.mrf.mxu0  ;;  %1228 = vmatmul.mubr.bf16.gmra.mxu1 %v602_v41 }
 0x10c   : > { %v1202_v44 = vpop.f32.mrf.mxu0 }
 0x10d   : > { %v604_v47 = vpack.c.bf16 %v1202_v44, %v1201_v42 }
 0x10e   : > { %v534_v45 = vpop.f32.mrf.mxu0 }
 0x10f   : > { %v603_v46 = vpack.c.bf16 %v534_v45, %v531_v43 }
 0x111   : > { %1231 = vmatprep.mubr.bf16.mxu1 %v603_v46 }
 0x112   : > { %1232 = vmatmul.mubr.bf16.gmra.mxu1 %v604_v47 }
 0x1ba   : > { %v1221_v48 = vpop.f32.mrf.mxu1 }
 0x1bb   : > { %v784_v50 = vmul.f32 0.22916667, %v1221_v48  ;;  %vm768_vm0 = vcmp.ge.f32.partialorder %v1221_v48, 0.0 }
 0x1bc   : > { %v703_v49 = vpop.f32.mrf.mxu1 }
 0x1bd   : > { %v782_v52 = vmul.f32 0.22916667, %v703_v49  ;;  %vm766_vm2 = vcmp.ge.f32.partialorder %v703_v49, 0.0  ;;  %v800_v55 = vsel %vm768_vm0, %v1221_v48, %v784_v50 }
 0x1be   : > { %v1222_v51 = vpop.f32.mrf.mxu1 }
 0x1bf   : > { %vm769_vm1 = vcmp.ge.f32.partialorder %v1222_v51, 0.0  ;;  %v785_v53 = vmul.f32 0.22916667, %v1222_v51  ;;  %v798_v60 = vsel %vm766_vm2, %v703_v49, %v782_v52 }
 0x1c0   : > { %v706_v54 = vpop.f32.mrf.mxu1 }
 0x1c1   : > { %v801_v56 = vsel %vm769_vm1, %v1222_v51, %v785_v53  ;;  %vm767_vm3 = vcmp.ge.f32.partialorder %v706_v54, 0.0  ;;  %v783_v57 = vmul.f32 0.22916667, %v706_v54 }
 0x1c2   : > { %v1100_v58 = vpack.c.bf16 %v801_v56, %v800_v55  ;;  %v1225_v59 = vpop.f32.mrf.mxu1 }
 0x1c3   : > { %v799_v61 = vsel %vm767_vm3, %v706_v54, %v783_v57  ;;  %v788_v0 = vmul.f32 0.22916667, %v1225_v59  ;;  %vm772_vm4 = vcmp.ge.f32.partialorder %v1225_v59, 0.0 }
 0x1c4   : > { %1132 = vst [vmem:[%s1393_s28 + $0x8] sm:$0xff] %v1100_v58   ;;  %v1095_v62 = vpack.c.bf16 %v799_v61, %v798_v60  ;;  %v719_v63 = vpop.f32.mrf.mxu1 }
 0x1c5   : > { %v786_v2 = vmul.f32 0.22916667, %v719_v63  ;;  %vm770_vm6 = vcmp.ge.f32.partialorder %v719_v63, 0.0  ;;  %v804_v5 = vsel %vm772_vm4, %v1225_v59, %v788_v0 }
 0x1c6   : > { %1096 = vst [vmem:[%s1393_s28] sm:$0xff] %v1095_v62   ;;  %v1226_v1 = vpop.f32.mrf.mxu1 }
 0x1c7   : > { %vm773_vm5 = vcmp.ge.f32.partialorder %v1226_v1, 0.0  ;;  %v789_v3 = vmul.f32 0.22916667, %v1226_v1  ;;  %v802_v10 = vsel %vm770_vm6, %v719_v63, %v786_v2 }
 0x1c8   : > { %v722_v4 = vpop.f32.mrf.mxu1 }
 0x1c9   : > { %v805_v6 = vsel %vm773_vm5, %v1226_v1, %v789_v3  ;;  %vm771_vm7 = vcmp.ge.f32.partialorder %v722_v4, 0.0  ;;  %v787_v7 = vmul.f32 0.22916667, %v722_v4 }
 0x1ca   : > { %v1110_v8 = vpack.c.bf16 %v805_v6, %v804_v5  ;;  %v1229_v9 = vpop.f32.mrf.mxu1 }
 0x1cb   : > { %v803_v11 = vsel %vm771_vm7, %v722_v4, %v787_v7  ;;  %v792_v14 = vmul.f32 0.22916667, %v1229_v9  ;;  %vm776_vm8 = vcmp.ge.f32.partialorder %v1229_v9, 0.0 }
 0x1cc   : > { %1134 = vst [vmem:[%s1393_s28 + $0x18] sm:$0xff] %v1110_v8   ;;  %v1105_v12 = vpack.c.bf16 %v803_v11, %v802_v10  ;;  %v735_v13 = vpop.f32.mrf.mxu1 }
 0x1cd   : > { %v790_v16 = vmul.f32 0.22916667, %v735_v13  ;;  %vm774_vm10 = vcmp.ge.f32.partialorder %v735_v13, 0.0  ;;  %v808_v19 = vsel %vm776_vm8, %v1229_v9, %v792_v14 }
 0x1ce   : > { %1133 = vst [vmem:[%s1393_s28 + $0x10] sm:$0xff] %v1105_v12   ;;  %v1230_v15 = vpop.f32.mrf.mxu1 }
 0x1cf   : > { %vm777_vm9 = vcmp.ge.f32.partialorder %v1230_v15, 0.0  ;;  %v793_v17 = vmul.f32 0.22916667, %v1230_v15  ;;  %v806_v24 = vsel %vm774_vm10, %v735_v13, %v790_v16 }
 0x1d0   : > { %v738_v18 = vpop.f32.mrf.mxu1 }
 0x1d1   : > { %v809_v20 = vsel %vm777_vm9, %v1230_v15, %v793_v17  ;;  %vm775_vm11 = vcmp.ge.f32.partialorder %v738_v18, 0.0  ;;  %v791_v21 = vmul.f32 0.22916667, %v738_v18 }
 0x1d2   : > { %v1120_v22 = vpack.c.bf16 %v809_v20, %v808_v19  ;;  %v1233_v23 = vpop.f32.mrf.mxu1 }
 0x1d3   : > { %v807_v25 = vsel %vm775_vm11, %v738_v18, %v791_v21  ;;  %v796_v28 = vmul.f32 0.22916667, %v1233_v23  ;;  %vm780_vm12 = vcmp.ge.f32.partialorder %v1233_v23, 0.0 }
 0x1d4   : > { %1136 = vst [vmem:[%s1393_s28 + $0x28] sm:$0xff] %v1120_v22   ;;  %v1115_v26 = vpack.c.bf16 %v807_v25, %v806_v24  ;;  %v751_v27 = vpop.f32.mrf.mxu1 }
 0x1d5   : > { %v794_v30 = vmul.f32 0.22916667, %v751_v27  ;;  %vm778_vm14 = vcmp.ge.f32.partialorder %v751_v27, 0.0  ;;  %v812_v33 = vsel %vm780_vm12, %v1233_v23, %v796_v28 }
 0x1d6   : > { %1135 = vst [vmem:[%s1393_s28 + $0x20] sm:$0xff] %v1115_v26   ;;  %v1234_v29 = vpop.f32.mrf.mxu1 }
 0x1d7   : > { %vm781_vm13 = vcmp.ge.f32.partialorder %v1234_v29, 0.0  ;;  %v797_v31 = vmul.f32 0.22916667, %v1234_v29  ;;  %v810_v37 = vsel %vm778_vm14, %v751_v27, %v794_v30 }
 0x1d8   : > { %v754_v32 = vpop.f32.mrf.mxu1 }
 0x1d9   : > { %v813_v34 = vsel %vm781_vm13, %v1234_v29, %v797_v31  ;;  %vm779_vm15 = vcmp.ge.f32.partialorder %v754_v32, 0.0  ;;  %v795_v35 = vmul.f32 0.22916667, %v754_v32 }
 0x1da   : > { %v1130_v36 = vpack.c.bf16 %v813_v34, %v812_v33 }
 0x1db   : > { %v811_v38 = vsel %vm779_vm15, %v754_v32, %v795_v35 }
 0x1dc   : > { %1138 = vst [vmem:[%s1393_s28 + $0x38] sm:$0xff] %v1130_v36   ;;  %v1125_v39 = vpack.c.bf16 %v811_v38, %v810_v37 }
 0x1de   : > { %1137 = vst [vmem:[%s1393_s28 + $0x30] sm:$0xff] %v1125_v39  }
 0x1df PF: > { %s13_s14 = sadd.s32 1, %s1305_s14   ;;  %s1416_s12 = smov %s1301_s13 }
 0x1e0   : > { %p10_p5 = scmp.ge.s32.totalorder %s13_s14, 5   ;;  %s1417_s13 = smov %s1419_s15 }
 0x1e2   :  { %12 = sbr.rel (!%p10_p5) target bundleno = 2 (0x2), region = 76 }

// kernel: evolvegcno_forward.4
= control target key start
LH: loop header
LB: loop body
LE: loop exit
PB: predicated region body
PF: predicated region fallthrough
CT: control target
= control target key end

     0   :  { %s5601_s0 = inlined_call_operand.vmem [shape: f32[128,128], index: 0, kind: input, shape index: {}]   ;;  %s5602_s1 = inlined_call_operand.vmem [shape: bf16[384,128], index: 1, kind: input, shape index: {}]   ;;  %s5603_s2 = inlined_call_operand.vmem [shape: bf16[128,128], index: 2, kind: input, shape index: {}]   ;;  %s5604_s3 = inlined_call_operand.vmem [shape: f32[384,128], index: 3, kind: input, shape index: {}]   ;;  %s5605_s4 = inlined_call_operand.vmem [shape: bf16[3,128,128], index: 4, kind: output, shape index: {}]  }
   0x1   :  { %v4105_v0 = vld [vmem:[%s5601_s0 + $0x70] sm:$0xff]  ;;  %v4110_v1 = vld [vmem:[%s5601_s0 + $0x78] sm:$0xff]  ;;  %v4115_v2 = vld [vmem:[%s5601_s0 + $0x60] sm:$0xff] }
   0x2   :  { %v189_v3 = vpack.c.bf16 %v4110_v1, %v4105_v0  ;;  %v4122_v4 = vld [vmem:[%s5601_s0 + $0x68] sm:$0xff]  ;;  %v4129_v6 = vld [vmem:[%s5601_s0 + $0x50] sm:$0xff]  ;;  %v4134_v7 = vld [vmem:[%s5601_s0 + $0x58] sm:$0xff] }
   0x3   :  { %v188_v5 = vpack.c.bf16 %v4122_v4, %v4115_v2  ;;  %v4139_v8 = vld [vmem:[%s5601_s0 + $0x40] sm:$0xff]  ;;  %v187_v9 = vpack.c.bf16 %v4134_v7, %v4129_v6  ;;  %v4146_v10 = vld [vmem:[%s5601_s0 + $0x48] sm:$0xff]  ;;  %v4159_v13 = vld [vmem:[%s5601_s0 + $0x30] sm:$0xff] }
   0x4   :  { %3089 = vmatprep.subr.bf16.mxu0 %v189_v3  ;;  %3377 = vmatprep.subr.bf16.mxu1 %v189_v3  ;;  %v4151_v11 = vld [vmem:[%s5602_s1] sm:$0xff]   ;;  %v186_v12 = vpack.c.bf16 %v4146_v10, %v4139_v8  ;;  %v4164_v14 = vld [vmem:[%s5601_s0 + $0x38] sm:$0xff]  ;;  %v4176_v17 = vld [vmem:[%s5601_s0 + $0x28] sm:$0xff] }
   0x5   :  { %3090 = vmatpush3.bf16.msra.mxu0 %v189_v3  ;;  %3385 = vmatpush3.bf16.msra.mxu1 %v189_v3  ;;  %v185_v15 = vpack.c.bf16 %v4164_v14, %v4159_v13  ;;  %v4171_v16 = vld [vmem:[%s5601_s0 + $0x20] sm:$0xff]  ;;  %v4183_v19 = vld [vmem:[%s5601_s0 + $0x10] sm:$0xff]  ;;  %v4188_v20 = vld [vmem:[%s5601_s0 + $0x18] sm:$0xff] }
   0x6   :  { %3091 = vmatprep.subr.bf16.mxu0 %v188_v5  ;;  %3378 = vmatprep.subr.bf16.mxu1 %v188_v5  ;;  %v184_v18 = vpack.c.bf16 %v4176_v17, %v4171_v16  ;;  %v183_v21 = vpack.c.bf16 %v4188_v20, %v4183_v19  ;;  %v4195_v22 = vld [vmem:[%s5601_s0] sm:$0xff]  ;;  %v4200_v23 = vld [vmem:[%s5601_s0 + $0x8] sm:$0xff]  ;;  %v3395_v26 = vld [vmem:[%s5602_s1 + $0x10] sm:$0xff]  }
   0x7   :  { %3105 = vmatprep.mubr.bf16.mxu0 %v4151_v11  ;;  %v182_v24 = vpack.c.bf16 %v4200_v23, %v4195_v22  ;;  %v3394_v25 = vld [vmem:[%s5602_s1 + $0x8] sm:$0xff]   ;;  %v3396_v27 = vld [vmem:[%s5602_s1 + $0x18] sm:$0xff]   ;;  %v3397_v28 = vld [vmem:[%s5602_s1 + $0x20] sm:$0xff]  }
   0x8   :  { %v3398_v29 = vld [vmem:[%s5602_s1 + $0x28] sm:$0xff]   ;;  %v3399_v30 = vld [vmem:[%s5602_s1 + $0x30] sm:$0xff]   ;;  %v3400_v31 = vld [vmem:[%s5602_s1 + $0x38] sm:$0xff]  }
   0x9   :  { %3092 = vmatpush3.bf16.msra.mxu0 %v188_v5  ;;  %3386 = vmatpush3.bf16.msra.mxu1 %v188_v5  ;;  %v3401_v32 = vld [vmem:[%s5602_s1 + $0x40] sm:$0xff]   ;;  %v3402_v33 = vld [vmem:[%s5602_s1 + $0x48] sm:$0xff]   ;;  %v3403_v34 = vld [vmem:[%s5602_s1 + $0x50] sm:$0xff]  }
   0xa   :  { %3093 = vmatprep.subr.bf16.mxu0 %v187_v9  ;;  %3379 = vmatprep.subr.bf16.mxu1 %v187_v9  ;;  %v3404_v35 = vld [vmem:[%s5602_s1 + $0x58] sm:$0xff]   ;;  %v3405_v36 = vld [vmem:[%s5602_s1 + $0x60] sm:$0xff]   ;;  %v3406_v37 = vld [vmem:[%s5602_s1 + $0x68] sm:$0xff]  }
   0xb   :  { %v3407_v38 = vld [vmem:[%s5602_s1 + $0x70] sm:$0xff]   ;;  %v3408_v39 = vld [vmem:[%s5602_s1 + $0x78] sm:$0xff]   ;;  %v3409_v40 = vld [vmem:[%s5602_s1 + $0x80] sm:$0xff]  }
   0xc   :  { %v3410_v41 = vld [vmem:[%s5602_s1 + $0x88] sm:$0xff]   ;;  %3137 = vmatprep.mubr.bf16.mxu1 %v3409_v40  ;;  %v3411_v42 = vld [vmem:[%s5602_s1 + $0x90] sm:$0xff]   ;;  %v3412_v43 = vld [vmem:[%s5602_s1 + $0x98] sm:$0xff]  }
   0xd   :  { %3094 = vmatpush3.bf16.msra.mxu0 %v187_v9  ;;  %3387 = vmatpush3.bf16.msra.mxu1 %v187_v9  ;;  %v3413_v44 = vld [vmem:[%s5602_s1 + $0xa0] sm:$0xff]   ;;  %v3414_v45 = vld [vmem:[%s5602_s1 + $0xa8] sm:$0xff]   ;;  %v3415_v46 = vld [vmem:[%s5602_s1 + $0xb0] sm:$0xff]  }
   0xe   :  { %3095 = vmatprep.subr.bf16.mxu0 %v186_v12  ;;  %3380 = vmatprep.subr.bf16.mxu1 %v186_v12  ;;  %v3416_v47 = vld [vmem:[%s5602_s1 + $0xb8] sm:$0xff]   ;;  %v3417_v49 = vld [vmem:[%s5603_s2] sm:$0xff]  }
   0xf   :  { %v149_v40 = vld [vmem:[%s5604_s3 + $0xf8] sm:$0xff] }
  0x11   :  { %3096 = vmatpush3.bf16.msra.mxu0 %v186_v12  ;;  %3388 = vmatpush3.bf16.msra.mxu1 %v186_v12 }
  0x12   :  { %3097 = vmatprep.subr.bf16.mxu0 %v185_v15  ;;  %3381 = vmatprep.subr.bf16.mxu1 %v185_v15 }
  0x15   :  { %3098 = vmatpush3.bf16.msra.mxu0 %v185_v15  ;;  %3389 = vmatpush3.bf16.msra.mxu1 %v185_v15 }
  0x16   :  { %3099 = vmatprep.subr.bf16.mxu0 %v184_v18  ;;  %3382 = vmatprep.subr.bf16.mxu1 %v184_v18 }
  0x19   :  { %3100 = vmatpush3.bf16.msra.mxu0 %v184_v18  ;;  %3390 = vmatpush3.bf16.msra.mxu1 %v184_v18 }
  0x1a   :  { %3101 = vmatprep.subr.bf16.mxu0 %v183_v21  ;;  %3383 = vmatprep.subr.bf16.mxu1 %v183_v21 }
  0x1d   :  { %3102 = vmatpush3.bf16.msra.mxu0 %v183_v21  ;;  %3391 = vmatpush3.bf16.msra.mxu1 %v183_v21 }
  0x1e   :  { %3103 = vmatprep.subr.bf16.mxu0 %v182_v24  ;;  %3384 = vmatprep.subr.bf16.mxu1 %v182_v24 }
  0x21   :  { %3104 = vmatpush3.bf16.msra.mxu0 %v182_v24  ;;  %3392 = vmatpush3.bf16.msra.mxu1 %v182_v24 }
  0x24   :  { %3106 = vmatmul.mubr.bf16.vlgmr.msra.gmra.mxu0 %v3394_v25  ;;  %3138 = vmatmul.mubr.bf16.vlgmr.msra.gmra.mxu1 %v3410_v41  ;;  %v142_v41 = vld [vmem:[%s5604_s3 + $0xc0] sm:$0xff] }
  0x25   :  { %3109 = vmatprep.mubr.bf16.mxu0 %v3395_v26  ;;  %3141 = vmatprep.mubr.bf16.mxu1 %v3411_v42 }
  0x2c   :  { %3110 = vmatmul.mubr.bf16.gmra.mxu0 %v3396_v27  ;;  %3142 = vmatmul.mubr.bf16.gmra.mxu1 %v3412_v43 }
  0x2d   :  { %3113 = vmatprep.mubr.bf16.mxu0 %v3397_v28  ;;  %3145 = vmatprep.mubr.bf16.mxu1 %v3413_v44  ;;  %v145_v28 = vld [vmem:[%s5604_s3 + $0xd8] sm:$0xff] }
  0x34   :  { %3114 = vmatmul.mubr.bf16.gmra.mxu0 %v3398_v29  ;;  %3146 = vmatmul.mubr.bf16.gmra.mxu1 %v3414_v45 }
  0x35   :  { %3117 = vmatprep.mubr.bf16.mxu0 %v3399_v30  ;;  %3149 = vmatprep.mubr.bf16.mxu1 %v3415_v46  ;;  %v144_v30 = vld [vmem:[%s5604_s3 + $0xd0] sm:$0xff] }
  0x3c   :  { %3118 = vmatmul.mubr.bf16.gmra.mxu0 %v3400_v31  ;;  %3150 = vmatmul.mubr.bf16.gmra.mxu1 %v3416_v47  ;;  %v147_v47 = vld [vmem:[%s5604_s3 + $0xe8] sm:$0xff] }
  0x3d   :  { %3121 = vmatprep.mubr.bf16.mxu0 %v3401_v32  ;;  %3169 = vmatprep.mubr.bf16.mxu1 %v3417_v49  ;;  %v148_v32 = vld [vmem:[%s5604_s3 + $0xf0] sm:$0xff] }
  0x44   :  { %3122 = vmatmul.mubr.bf16.gmra.mxu0 %v3402_v33 }
  0x45   :  { %3125 = vmatprep.mubr.bf16.mxu0 %v3403_v34  ;;  %v143_v34 = vld [vmem:[%s5604_s3 + $0xc8] sm:$0xff] }
  0x4c   :  { %3126 = vmatmul.mubr.bf16.gmra.mxu0 %v3404_v35 }
  0x4d   :  { %3129 = vmatprep.mubr.bf16.mxu0 %v3405_v36  ;;  %v146_v36 = vld [vmem:[%s5604_s3 + $0xe0] sm:$0xff] }
  0x54   :  { %3130 = vmatmul.mubr.bf16.gmra.mxu0 %v3406_v37 }
  0x55   :  { %3133 = vmatprep.mubr.bf16.mxu0 %v3407_v38 }
  0x5c   :  { %3134 = vmatmul.mubr.bf16.gmra.mxu0 %v3408_v39 }
  0x5d   :  { %3265 = vmatprep.mubr.bf16.mxu0 %v3417_v49  ;;  %v141_v49 = vld [vmem:[%s5604_s3 + $0xb8] sm:$0xff] }
  0xe4   :  { %v4273_v48 = vpop.f32.mrf.mxu0 }
  0xe6   :  { %v4278_v50 = vpop.f32.mrf.mxu0 }
  0xe8   :  { %v4280_v51 = vpop.f32.mrf.mxu0 }
  0xea   :  { %v4282_v52 = vpop.f32.mrf.mxu0 }
  0xec   :  { %v4284_v53 = vpop.f32.mrf.mxu0 }
  0xee   :  { %v4286_v54 = vpop.f32.mrf.mxu0 }
  0xf0   :  { %v4288_v55 = vpop.f32.mrf.mxu0 }
  0xf2   :  { %v4290_v56 = vpop.f32.mrf.mxu0 }
  0xf4   :  { %v4292_v57 = vpop.f32.mrf.mxu0 }
  0xf6   :  { %v4294_v58 = vpop.f32.mrf.mxu0 }
  0xf8   :  { %v4296_v59 = vpop.f32.mrf.mxu0 }
  0xfa   :  { %v4298_v60 = vpop.f32.mrf.mxu0 }
  0xfc   :  { %v4300_v61 = vpop.f32.mrf.mxu0 }
  0xfe   :  { %v4302_v62 = vpop.f32.mrf.mxu0 }
 0x100   :  { %v4304_v63 = vpop.f32.mrf.mxu0 }
 0x102   :  { %v4306_v3 = vpop.f32.mrf.mxu0 }
 0x104   :  { %v3123_v5 = vpop.f32.mrf.mxu0 }
 0x106   :  { %v4308_v9 = vpop.f32.mrf.mxu0 }
 0x108   :  { %v3124_v12 = vpop.f32.mrf.mxu0 }
 0x10a   :  { %v435_v15 = vpop.f32.mrf.mxu0 }
 0x10c   :  { %v3127_v18 = vpop.f32.mrf.mxu0 }
 0x10e   :  { %v448_v21 = vpop.f32.mrf.mxu0 }
 0x110   :  { %v3128_v24 = vpop.f32.mrf.mxu0 }
 0x112   :  { %v451_v25 = vpop.f32.mrf.mxu0 }
 0x114   :  { %v3131_v26 = vpop.f32.mrf.mxu0 }
 0x115   :  { %v473_v37 = vadd.f32 %v3131_v26, %v144_v30 }
 0x116   :  { %v464_v27 = vpop.f32.mrf.mxu0 }
 0x117   :  { %v2596_v26 = vmul.f32 -1.442695, %v473_v37  ;;  %v465_v30 = vadd.f32 %v464_v27, %v142_v41  ;;  %v139_v27 = vld [vmem:[%s5604_s3 + $0xa8] sm:$0xff] }
 0x118   :  { %v3132_v29 = vpop.f32.mrf.mxu0 }
 0x119   :  { %v476_v33 = vadd.f32 %v3132_v29, %v145_v28  ;;  %v2594_v41 = vmul.f32 -1.442695, %v465_v30 }
 0x11a   :  { %v467_v31 = vpop.f32.mrf.mxu0 }
 0x11b   :  { %v2597_v42 = vmul.f32 -1.442695, %v476_v33  ;;  %v468_v43 = vadd.f32 %v467_v31, %v143_v34  ;;  %v140_v31 = vld [vmem:[%s5604_s3 + $0xb0] sm:$0xff] }
 0x11c   :  { %v3135_v35 = vpop.f32.mrf.mxu0 }
 0x11d   :  { %v489_v38 = vadd.f32 %v3135_v35, %v148_v32  ;;  %v2595_v33 = vmul.f32 -1.442695, %v468_v43  ;;  %v138_v43 = vld [vmem:[%s5604_s3 + $0xa0] sm:$0xff] }
 0x11e   :  { %v480_v39 = vpop.f32.mrf.mxu0 }
 0x11f   :  { %v2600_v44 = vmul.f32 -1.442695, %v489_v38  ;;  %v481_v45 = vadd.f32 %v480_v39, %v146_v36  ;;  %v136_v36 = vld [vmem:[%s5604_s3 + $0x90] sm:$0xff]  ;;  %v460_v38 = vadd.f32 %v3128_v24, %v141_v49  ;;  %v137_v39 = vld [vmem:[%s5604_s3 + $0x98] sm:$0xff]  ;;  %v135_v24 = vld [vmem:[%s5604_s3 + $0x88] sm:$0xff]  ;;  %v449_v49 = vadd.f32 %v448_v21, %v138_v43 }
 0x120   :  { %v3136_v46 = vpop.f32.mrf.mxu0 }
 0x121   :  { %v2598_v28 = vmul.f32 -1.442695, %v481_v45  ;;  %v492_v29 = vadd.f32 %v3136_v46, %v149_v40  ;;  %3425 = vpow2.f32 %v2600_v44  ;;  %v457_v40 = vadd.f32 %v3127_v18, %v140_v31 }
 0x122   :  { %v483_v32 = vpop.f32.mrf.mxu0  ;;  %3427 = vpow2.f32 %v2597_v42  ;;  %v441_v42 = vadd.f32 %v3123_v5, %v136_v36  ;;  %v2593_v44 = vmul.f32 -1.442695, %v460_v38  ;;  %v452_v45 = vadd.f32 %v451_v25, %v139_v27 }
 0x123   :  { %v2601_v34 = vmul.f32 -1.442695, %v492_v29  ;;  %v484_v35 = vadd.f32 %v483_v32, %v147_v47  ;;  %3429 = vpow2.f32 %v2598_v28  ;;  %v444_v46 = vadd.f32 %v3124_v12, %v137_v39  ;;  %v134_v29 = vld [vmem:[%s5604_s3 + $0x80] sm:$0xff] }
 0x124   :  { %3431 = vpow2.f32 %v2596_v26  ;;  %v2592_v47 = vmul.f32 -1.442695, %v457_v40  ;;  %v2588_v18 = vmul.f32 -1.442695, %v441_v42  ;;  %v436_v26 = vadd.f32 %v435_v15, %v135_v24 }
 0x125   :  { %v2599_v37 = vmul.f32 -1.442695, %v484_v35  ;;  %3433 = vpow2.f32 %v2601_v34  ;;  %v2591_v5 = vmul.f32 -1.442695, %v452_v45  ;;  %v2589_v28 = vmul.f32 -1.442695, %v444_v46 }
 0x126   :  { %3435 = vpow2.f32 %v2595_v33  ;;  %v2590_v30 = vmul.f32 -1.442695, %v449_v49  ;;  %v2587_v31 = vmul.f32 -1.442695, %v436_v26  ;;  %v433_v21 = vadd.f32 %v4308_v9, %v134_v29 }
 0x127   :  { %3437 = vpow2.f32 %v2599_v37 }
 0x128   :  { %3439 = vpow2.f32 %v2594_v41  ;;  %v2586_v39 = vmul.f32 -1.442695, %v433_v21 }
 0x129   :  { %3441 = vpow2.f32 %v2593_v44 }
 0x12a   :  { %3443 = vpow2.f32 %v2592_v47 }
 0x12b   :  { %3445 = vpow2.f32 %v2588_v18 }
 0x12c   :  { %3447 = vpow2.f32 %v2591_v5 }
 0x12d   :  { %3449 = vpow2.f32 %v2589_v28 }
 0x12e   :  { %v3426_v32 = vpop.eup %3425  ;;  %3451 = vpow2.f32 %v2590_v30 }
 0x12f   :  { %v3428_v25 = vpop.eup %3427  ;;  %v717_v12 = vadd.f32 1.0, %v3426_v32  ;;  %3453 = vpow2.f32 %v2587_v31 }
 0x130   :  { %v3430_v33 = vpop.eup %3429  ;;  %v714_v36 = vadd.f32 1.0, %v3428_v25 }
 0x131   :  { %v3432_v15 = vpop.eup %3431  ;;  %v715_v34 = vadd.f32 1.0, %v3430_v33  ;;  %3455 = vrcp.f32 %v717_v12 }
 0x132   :  { %v3434_v35 = vpop.eup %3433  ;;  %v713_v40 = vadd.f32 1.0, %v3432_v15 }
 0x133   :  { %v3436_v38 = vpop.eup %3435  ;;  %v718_v27 = vadd.f32 1.0, %v3434_v35  ;;  %3457 = vrcp.f32 %v715_v34 }
 0x134   :  { %v3438_v37 = vpop.eup %3437  ;;  %v712_v43 = vadd.f32 1.0, %v3436_v38 }
 0x135   :  { %3459 = vrcp.f32 %v718_v27  ;;  %v716_v41 = vadd.f32 1.0, %v3438_v37  ;;  %v3440_v42 = vpop.eup %3439 }
 0x136   :  { %3461 = vrcp.f32 %v714_v36  ;;  %v3442_v9 = vpop.eup %3441  ;;  %v711_v24 = vadd.f32 1.0, %v3440_v42 }
 0x137   :  { %3463 = vrcp.f32 %v716_v41  ;;  %v3444_v44 = vpop.eup %3443  ;;  %v710_v46 = vadd.f32 1.0, %v3442_v9 }
 0x138   :  { %3465 = vpow2.f32 %v2586_v39  ;;  %v3446_v45 = vpop.eup %3445  ;;  %v709_v18 = vadd.f32 1.0, %v3444_v44 }
 0x139   :  { %3467 = vrcp.f32 %v713_v40  ;;  %v3448_v47 = vpop.eup %3447  ;;  %v705_v34 = vadd.f32 1.0, %v3446_v45 }
 0x13a   :  { %3469 = vrcp.f32 %v712_v43  ;;  %v3450_v49 = vpop.eup %3449  ;;  %v708_v28 = vadd.f32 1.0, %v3448_v47 }
 0x13b   :  { %3471 = vrcp.f32 %v711_v24  ;;  %v3452_v26 = vpop.eup %3451  ;;  %v706_v12 = vadd.f32 1.0, %v3450_v49 }
 0x13c   :  { %v3454_v5 = vpop.eup %3453  ;;  %3473 = vrcp.f32 %v710_v46  ;;  %v707_v32 = vadd.f32 1.0, %v3452_v26 }
 0x13d   :  { %3475 = vrcp.f32 %v709_v18  ;;  %v704_v39 = vadd.f32 1.0, %v3454_v5 }
 0x13e   :  { %v3456_v29 = vpop.eup %3455  ;;  %3477 = vrcp.f32 %v708_v28 }
 0x13f   :  { %v765_v33 = vmul.f32 %v3456_v29, %v4105_v0  ;;  %3479 = vrcp.f32 %v707_v32 }
 0x140   :  { %v3458_v30 = vpop.eup %3457  ;;  %3481 = vrcp.f32 %v706_v12  ;;  %v3422_v12 = vld [vmem:[%s5603_s2 + $0x28] sm:$0xff]  }
 0x141   :  { %v763_v38 = vmul.f32 %v3458_v30, %v4115_v2  ;;  %3483 = vrcp.f32 %v705_v34 }
 0x142   :  { %v3460_v31 = vpop.eup %3459  ;;  %3485 = vrcp.f32 %v704_v39 }
 0x143   :  { %v3462_v25 = vpop.eup %3461  ;;  %v766_v21 = vmul.f32 %v3460_v31, %v4110_v1 }
 0x144   :  { %v3464_v15 = vpop.eup %3463  ;;  %v762_v41 = vmul.f32 %v3462_v25, %v4134_v7  ;;  %v3421_v25 = vld [vmem:[%s5603_s2 + $0x20] sm:$0xff]  }
 0x145   :  { %v3466_v35 = vpop.eup %3465  ;;  %v774_v36 = vpack.c.bf16 %v766_v21, %v765_v33  ;;  %v764_v27 = vmul.f32 %v3464_v15, %v4122_v4  ;;  %v3423_v33 = vld [vmem:[%s5603_s2 + $0x30] sm:$0xff]   ;;  %v3424_v21 = vld [vmem:[%s5603_s2 + $0x38] sm:$0xff]   ;;  %v4397_v15 = vpop.f32.mrf.mxu1 }
 0x146   :  { %v3468_v37 = vpop.eup %3467  ;;  %v703_v0 = vadd.f32 1.0, %v3466_v35 }
 0x147   :  { %3153 = vmatprep.subr.bf16.mxu1 %v774_v36  ;;  %v773_v40 = vpack.c.bf16 %v764_v27, %v763_v38  ;;  %v3470_v42 = vpop.eup %3469  ;;  %v761_v1 = vmul.f32 %v3468_v37, %v4129_v6  ;;  %v4399_v34 = vpop.f32.mrf.mxu1  ;;  %v120_v37 = vld [vmem:[%s5604_s3 + $0x10] sm:$0xff] }
 0x148   :  { %3154 = vmatpush3.bf16.msra.mxu1 %v774_v36  ;;  %v3472_v43 = vpop.eup %3471  ;;  %v760_v2 = vmul.f32 %v3470_v42, %v4146_v10  ;;  %3487 = vrcp.f32 %v703_v0  ;;  %v119_v0 = vld [vmem:[%s5604_s3 + $0x8] sm:$0xff] }
 0x149   :  { %3155 = vmatprep.subr.bf16.mxu1 %v773_v40  ;;  %v772_v9 = vpack.c.bf16 %v762_v41, %v761_v1  ;;  %v3474_v4 = vpop.eup %3473  ;;  %v759_v24 = vmul.f32 %v3472_v43, %v4139_v8  ;;  %v4401_v35 = vpop.f32.mrf.mxu1  ;;  %v121_v41 = vld [vmem:[%s5604_s3 + $0x18] sm:$0xff] }
 0x14a   :  { %v3476_v44 = vpop.eup %3475  ;;  %v758_v45 = vmul.f32 %v3474_v4, %v4164_v14  ;;  %v372_v4 = vadd.f32 %v4282_v52, %v119_v0  ;;  %v133_v0 = vld [vmem:[%s5604_s3 + $0x78] sm:$0xff] }
 0x14b   :  { %v771_v7 = vpack.c.bf16 %v760_v2, %v759_v24  ;;  %v3478_v46 = vpop.eup %3477  ;;  %v757_v6 = vmul.f32 %v3476_v44, %v4159_v13  ;;  %v4403_v36 = vpop.f32.mrf.mxu1  ;;  %v124_v2 = vld [vmem:[%s5604_s3 + $0x30] sm:$0xff] }
 0x14c   :  { %3156 = vmatpush3.bf16.msra.mxu1 %v773_v40  ;;  %v3480_v47 = vpop.eup %3479  ;;  %v756_v18 = vmul.f32 %v3478_v46, %v4176_v17  ;;  %v377_v40 = vadd.f32 %v4273_v48, %v120_v37 }
 0x14d   :  { %3157 = vmatprep.subr.bf16.mxu1 %v772_v9  ;;  %v770_v49 = vpack.c.bf16 %v758_v45, %v757_v6  ;;  %v3482_v10 = vpop.eup %3481  ;;  %v755_v26 = vmul.f32 %v3480_v47, %v4171_v16  ;;  %v3418_v16 = vld [vmem:[%s5603_s2 + $0x8] sm:$0xff]   ;;  %v4405_v38 = vpop.f32.mrf.mxu1  ;;  %v2571_v45 = vmul.f32 -1.442695, %v372_v4 }
 0x14e   :  { %v3484_v5 = vpop.eup %3483  ;;  %v754_v28 = vmul.f32 %v3482_v10, %v4188_v20  ;;  %v3420_v20 = vld [vmem:[%s5603_s2 + $0x18] sm:$0xff]   ;;  %v2572_v43 = vmul.f32 -1.442695, %v377_v40 }
 0x14f   :  { %v769_v8 = vpack.c.bf16 %v756_v18, %v755_v26  ;;  %v3486_v29 = vpop.eup %3485  ;;  %v753_v14 = vmul.f32 %v3484_v5, %v4183_v19  ;;  %v3419_v19 = vld [vmem:[%s5603_s2 + $0x10] sm:$0xff]   ;;  %v4407_v27 = vpop.f32.mrf.mxu1  ;;  %v126_v26 = vld [vmem:[%s5604_s3 + $0x40] sm:$0xff] }
 0x150   :  { %3158 = vmatpush3.bf16.msra.mxu1 %v772_v9  ;;  %v752_v32 = vmul.f32 %v3486_v29, %v4200_v23  ;;  %v380_v9 = vadd.f32 %v4280_v51, %v121_v41  ;;  %3489 = vpow2.f32 %v2572_v43  ;;  %v125_v51 = vld [vmem:[%s5604_s3 + $0x38] sm:$0xff] }
 0x151   :  { %3159 = vmatprep.subr.bf16.mxu1 %v771_v7  ;;  %v768_v13 = vpack.c.bf16 %v754_v28, %v753_v14  ;;  %v4415_v39 = vpop.f32.mrf.mxu1  ;;  %v396_v52 = vadd.f32 %v4288_v55, %v125_v51  ;;  %v129_v28 = vld [vmem:[%s5604_s3 + $0x58] sm:$0xff] }
 0x152   :  { %v2573_v44 = vmul.f32 -1.442695, %v380_v9 }
 0x153   :  { %v4425_v1 = vpop.f32.mrf.mxu1  ;;  %v2577_v18 = vmul.f32 -1.442695, %v396_v52 }
 0x154   :  { %3160 = vmatpush3.bf16.msra.mxu1 %v771_v7  ;;  %v393_v7 = vadd.f32 %v4284_v53, %v124_v2  ;;  %v123_v53 = vld [vmem:[%s5604_s3 + $0x28] sm:$0xff] }
 0x155   :  { %3161 = vmatprep.subr.bf16.mxu1 %v770_v49  ;;  %v3488_v30 = vpop.eup %3487  ;;  %v4435_v24 = vpop.f32.mrf.mxu1  ;;  %v388_v55 = vadd.f32 %v4290_v56, %v123_v53  ;;  %v127_v56 = vld [vmem:[%s5604_s3 + $0x48] sm:$0xff] }
 0x156   :  { %v751_v17 = vmul.f32 %v3488_v30, %v4195_v22  ;;  %v2576_v47 = vmul.f32 -1.442695, %v393_v7  ;;  %v401_v30 = vadd.f32 %v4294_v58, %v126_v26  ;;  %v404_v58 = vadd.f32 %v4298_v60, %v127_v56  ;;  %v151_v26 = vld [vmem:[%s5604_s3 + $0x108] sm:$0xff] }
 0x157   :  { %v4443_v6 = vpop.f32.mrf.mxu1  ;;  %v2575_v14 = vmul.f32 -1.442695, %v388_v55 }
 0x158   :  { %3162 = vmatpush3.bf16.msra.mxu1 %v770_v49  ;;  %v767_v31 = vpack.c.bf16 %v752_v32, %v751_v17  ;;  %v412_v17 = vadd.f32 %v4296_v59, %v129_v28  ;;  %v2579_v41 = vmul.f32 -1.442695, %v404_v58 }
 0x159   :  { %3163 = vmatprep.subr.bf16.mxu1 %v769_v8  ;;  %v4448_v10 = vpop.f32.mrf.mxu1 }
 0x15a   :  { %v2581_v59 = vmul.f32 -1.442695, %v412_v17 }
 0x15c   :  { %3164 = vmatpush3.bf16.msra.mxu1 %v769_v8  ;;  %v4458_v8 = vpop.f32.mrf.mxu1 }
 0x15d   :  { %3165 = vmatprep.subr.bf16.mxu1 %v768_v13  ;;  %v3490_v29 = vpop.eup %3489 }
 0x160   :  { %3166 = vmatpush3.bf16.msra.mxu1 %v768_v13 }
 0x161   :  { %3167 = vmatprep.subr.bf16.mxu1 %v767_v31 }
 0x164   :  { %3168 = vmatpush3.bf16.msra.mxu1 %v767_v31  ;;  %v4468_v31 = vpop.f32.mrf.mxu1 }
 0x166   :  { %v4478_v37 = vpop.f32.mrf.mxu1 }
 0x167   :  { %3170 = vmatmul.mubr.bf16.vlgmr.msra.gmra.mxu1 %v3418_v16  ;;  %v132_v16 = vld [vmem:[%s5604_s3 + $0x70] sm:$0xff] }
 0x168   :  { %3173 = vmatprep.mubr.bf16.mxu1 %v3419_v19  ;;  %v4487_v2 = vpop.f32.mrf.mxu1 }
 0x16a   :  { %v4497_v52 = vpop.f32.mrf.mxu1 }
 0x16f   :  { %3174 = vmatmul.mubr.bf16.gmra.mxu1 %v3420_v20  ;;  %v2578_v20 = vmul.f32 -1.442695, %v401_v30 }
 0x170   :  { %3177 = vmatprep.mubr.bf16.mxu1 %v3421_v25 }
 0x177   :  { %3178 = vmatmul.mubr.bf16.gmra.mxu1 %v3422_v12  ;;  %v130_v12 = vld [vmem:[%s5604_s3 + $0x60] sm:$0xff] }
 0x178   :  { %3181 = vmatprep.mubr.bf16.mxu1 %v3423_v33 }
 0x17f   :  { %3182 = vmatmul.mubr.bf16.gmra.mxu1 %v3424_v21  ;;  %v425_v21 = vadd.f32 %v4300_v61, %v132_v16  ;;  %v131_v61 = vld [vmem:[%s5604_s3 + $0x68] sm:$0xff] }
 0x180   :  { %3201 = vmatprep.mubr.bf16.mxu1 %v4151_v11  ;;  %v118_v11 = vld [vmem:[%s5604_s3] sm:$0xff]  ;;  %v420_v51 = vadd.f32 %v4306_v3, %v131_v61 }
 0x181   :  { %v369_v42 = vadd.f32 %v4278_v50, %v118_v11  ;;  %v122_v50 = vld [vmem:[%s5604_s3 + $0x20] sm:$0xff]  ;;  %v2584_v9 = vmul.f32 -1.442695, %v425_v21 }
 0x182   :  { %v385_v46 = vadd.f32 %v4286_v54, %v122_v50  ;;  %v128_v54 = vld [vmem:[%s5604_s3 + $0x50] sm:$0xff]  ;;  %v428_v50 = vadd.f32 %v4304_v63, %v133_v0  ;;  %v2583_v3 = vmul.f32 -1.442695, %v420_v51  ;;  %v158_v51 = vld [vmem:[%s5604_s3 + $0x140] sm:$0xff] }
 0x183   :  { %v2570_v48 = vmul.f32 -1.442695, %v369_v42  ;;  %v409_v5 = vadd.f32 %v4292_v57, %v128_v54  ;;  %v609_v57 = vadd.f32 1.0, %v3490_v29  ;;  %v417_v42 = vadd.f32 %v4302_v62, %v130_v12 }
 0x184   :  { %v2574_v49 = vmul.f32 -1.442695, %v385_v46  ;;  %v150_v46 = vld [vmem:[%s5604_s3 + $0x100] sm:$0xff]  ;;  %v2585_v63 = vmul.f32 -1.442695, %v428_v50 }
 0x185   :  { %3491 = vpow2.f32 %v2570_v48  ;;  %v2580_v32 = vmul.f32 -1.442695, %v409_v5  ;;  %v2582_v62 = vmul.f32 -1.442695, %v417_v42  ;;  %v497_v54 = vadd.f32 %v4399_v34, %v150_v46  ;;  %v156_v34 = vld [vmem:[%s5604_s3 + $0x130] sm:$0xff]  ;;  %v155_v42 = vld [vmem:[%s5604_s3 + $0x128] sm:$0xff] }
 0x186   :  { %3493 = vpow2.f32 %v2573_v44  ;;  %v152_v44 = vld [vmem:[%s5604_s3 + $0x110] sm:$0xff]  ;;  %v521_v58 = vadd.f32 %v4405_v38, %v156_v34  ;;  %v516_v50 = vadd.f32 %v4425_v1, %v155_v42  ;;  %v162_v42 = vld [vmem:[%s5604_s3 + $0x160] sm:$0xff] }
 0x187   :  { %3495 = vpow2.f32 %v2571_v45  ;;  %v3905_v34 = vld [vmem:[%s5601_s0 + $0x10] sm:$0xff] }
 0x188   :  { %3497 = vpow2.f32 %v2576_v47  ;;  %v505_v47 = vadd.f32 %v4397_v15, %v152_v44 }
 0x189   :  { %3499 = vpow2.f32 %v2574_v49  ;;  %v153_v49 = vld [vmem:[%s5604_s3 + $0x118] sm:$0xff] }
 0x18a   :  { %3501 = vpow2.f32 %v2577_v18  ;;  %v508_v28 = vadd.f32 %v4401_v35, %v153_v49  ;;  %v154_v35 = vld [vmem:[%s5604_s3 + $0x120] sm:$0xff] }
 0x18b   :  { %3503 = vpow2.f32 %v2575_v14 }
 0x18c   :  { %3505 = vpow2.f32 %v2580_v32  ;;  %v500_v32 = vadd.f32 %v4403_v36, %v151_v26  ;;  %v157_v36 = vld [vmem:[%s5604_s3 + $0x138] sm:$0xff] }
 0x18d   :  { %3507 = vrcp.f32 %v609_v57 }
 0x18e   :  { %3509 = vpow2.f32 %v2578_v20 }
 0x192   :  { %v3492_v13 = vpop.eup %3491 }
 0x193   :  { %v3494_v19 = vpop.eup %3493  ;;  %v607_v25 = vadd.f32 1.0, %v3492_v13 }
 0x194   :  { %v3496_v33 = vpop.eup %3495  ;;  %v610_v11 = vadd.f32 1.0, %v3494_v19 }
 0x195   :  { %v3498_v40 = vpop.eup %3497  ;;  %3511 = vrcp.f32 %v607_v25  ;;  %v608_v60 = vadd.f32 1.0, %v3496_v33 }
 0x196   :  { %v3500_v43 = vpop.eup %3499  ;;  %3513 = vpow2.f32 %v2581_v59  ;;  %v613_v4 = vadd.f32 1.0, %v3498_v40 }
 0x197   :  { %v3502_v48 = vpop.eup %3501  ;;  %3515 = vrcp.f32 %v610_v11  ;;  %v611_v7 = vadd.f32 1.0, %v3500_v43  ;;  %v513_v11 = vadd.f32 %v4407_v27, %v154_v35  ;;  %v524_v43 = vadd.f32 %v4415_v39, %v157_v36 }
 0x198   :  { %3517 = vpow2.f32 %v2579_v41  ;;  %v614_v45 = vadd.f32 1.0, %v3502_v48  ;;  %v3504_v18 = vpop.eup %3503  ;;  %v160_v48 = vld [vmem:[%s5604_s3 + $0x150] sm:$0xff] }
 0x199   :  { %3519 = vrcp.f32 %v608_v60  ;;  %v3506_v15 = vpop.eup %3505  ;;  %v612_v30 = vadd.f32 1.0, %v3504_v18  ;;  %v537_v49 = vadd.f32 %v4435_v24, %v160_v48 }
 0x19a   :  { %3521 = vpow2.f32 %v2584_v9  ;;  %v4508_v14 = vpop.eup %3507  ;;  %v617_v16 = vadd.f32 1.0, %v3506_v15  ;;  %v529_v15 = vadd.f32 %v4443_v6, %v158_v51 }
 0x19b   :  { %3523 = vrcp.f32 %v613_v4  ;;  %v3510_v13 = vpop.eup %3509  ;;  %v954_v46 = vsub.f32 1.0, %v4508_v14 }
 0x19c   :  { %3525 = vpow2.f32 %v2582_v62  ;;  %v615_v33 = vadd.f32 1.0, %v3510_v13 }
 0x19d   :  { %3527 = vrcp.f32 %v611_v7 }
 0x19e   :  { %3529 = vrcp.f32 %v614_v45 }
 0x1a2   :  { %v4514_v57 = vpop.eup %3511 }
 0x1a3   :  { %v3514_v20 = vpop.eup %3513 }
 0x1a4   :  { %v4520_v12 = vpop.eup %3515  ;;  %v618_v38 = vadd.f32 1.0, %v3514_v20 }
 0x1a5   :  { %v3518_v21 = vpop.eup %3517 }
 0x1a6   :  { %v4526_v41 = vpop.eup %3519  ;;  %v616_v27 = vadd.f32 1.0, %v3518_v21 }
 0x1a7   :  { %v3522_v0 = vpop.eup %3521  ;;  %v953_v26 = vsub.f32 1.0, %v4526_v41 }
 0x1a8   :  { %v4532_v61 = vpop.eup %3523  ;;  %v621_v39 = vadd.f32 1.0, %v3522_v0 }
 0x1a9   :  { %v3526_v62 = vpop.eup %3525 }
 0x1aa   :  { %v4538_v7 = vpop.eup %3527 }
 0x227   :  { %v3171_v53 = vpop.f32.mrf.mxu1 }
 0x228   :  { %v922_v55 = vadd.f32 %v3171_v53, %v505_v47  ;;  %v952_v47 = vsub.f32 1.0, %v4514_v57  ;;  %v955_v53 = vsub.f32 1.0, %v4520_v12 }
 0x229   :  { %v857_v5 = vpop.f32.mrf.mxu1 }
 0x22a   :  { %3531 = vtanh.f32 %v922_v55  ;;  %v920_v29 = vadd.f32 %v857_v5, %v497_v54  ;;  %v161_v54 = vld [vmem:[%s5604_s3 + $0x158] sm:$0xff] }
 0x22b   :  { %3533 = vpow2.f32 %v2585_v63  ;;  %v3172_v56 = vpop.f32.mrf.mxu1  ;;  %v4545_v63 = vpop.eup %3529  ;;  %v540_v6 = vadd.f32 %v4448_v10, %v161_v54 }
 0x22c   :  { %3535 = vpow2.f32 %v2583_v3  ;;  %v923_v17 = vadd.f32 %v3172_v56, %v508_v28  ;;  %v619_v3 = vadd.f32 1.0, %v3526_v62  ;;  %v970_v56 = vmul.f32 %v3905_v34, %v954_v46 }
 0x22d   :  { %3537 = vtanh.f32 %v920_v29  ;;  %v860_v19 = vpop.f32.mrf.mxu1  ;;  %v159_v29 = vld [vmem:[%s5604_s3 + $0x148] sm:$0xff]  ;;  %v956_v62 = vsub.f32 1.0, %v4538_v7 }
 0x22e   :  { %3539 = vtanh.f32 %v923_v17  ;;  %v921_v25 = vadd.f32 %v860_v19, %v500_v32  ;;  %v968_v32 = vmul.f32 %v952_v47, %v4195_v22  ;;  %v3906_v19 = vld [vmem:[%s5601_s0 + $0x18] sm:$0xff]  ;;  %v958_v22 = vsub.f32 1.0, %v4532_v61 }
 0x22f   :  { %3541 = vrcp.f32 %v612_v30  ;;  %v3175_v59 = vpop.f32.mrf.mxu1  ;;  %v971_v20 = vmul.f32 %v3906_v19, %v955_v53  ;;  %v532_v36 = vadd.f32 %v4458_v8, %v159_v29 }
 0x230   :  { %3543 = vtanh.f32 %v921_v25  ;;  %v926_v40 = vadd.f32 %v3175_v59, %v521_v58 }
 0x231   :  { %3545 = vrcp.f32 %v617_v16  ;;  %v873_v60 = vpop.f32.mrf.mxu1  ;;  %v164_v16 = vld [vmem:[%s5604_s3 + $0x170] sm:$0xff] }
 0x232   :  { %3547 = vtanh.f32 %v926_v40  ;;  %v924_v9 = vadd.f32 %v873_v60, %v513_v11 }
 0x233   :  { %3549 = vrcp.f32 %v615_v33  ;;  %v3176_v4 = vpop.f32.mrf.mxu1  ;;  %v969_v33 = vmul.f32 %v953_v26, %v4200_v23 }
 0x234   :  { %3551 = vtanh.f32 %v924_v9  ;;  %v927_v44 = vadd.f32 %v3176_v4, %v524_v43  ;;  %v959_v4 = vsub.f32 1.0, %v4545_v63 }
 0x235   :  { %3553 = vrcp.f32 %v618_v38  ;;  %v876_v45 = vpop.f32.mrf.mxu1  ;;  %v553_v38 = vadd.f32 %v4468_v31, %v164_v16  ;;  %v165_v31 = vld [vmem:[%s5604_s3 + $0x178] sm:$0xff] }
 0x236   :  { %3555 = vtanh.f32 %v927_v44  ;;  %v925_v1 = vadd.f32 %v876_v45, %v516_v50  ;;  %v545_v44 = vadd.f32 %v4478_v37, %v162_v42  ;;  %v556_v53 = vadd.f32 %v4487_v2, %v165_v31  ;;  %v3908_v2 = vld [vmem:[%s5601_s0 + $0x38] sm:$0xff]  ;;  %v3911_v42 = vld [vmem:[%s5601_s0 + $0x50] sm:$0xff]  ;;  %v3913_v31 = vld [vmem:[%s5601_s0 + $0x40] sm:$0xff] }
 0x237   :  { %v3532_v18 = vpop.eup %3531  ;;  %3557 = vrcp.f32 %v616_v27  ;;  %v3179_v55 = vpop.f32.mrf.mxu1 }
 0x238   :  { %v3534_v5 = vpop.eup %3533  ;;  %3559 = vtanh.f32 %v925_v1  ;;  %v930_v28 = vadd.f32 %v3179_v55, %v537_v49  ;;  %v986_v13 = vmul.f32 %v3532_v18, %v4508_v14 }
 0x239   :  { %v3536_v24 = vpop.eup %3535  ;;  %3561 = vrcp.f32 %v621_v39  ;;  %v889_v30 = vpop.f32.mrf.mxu1  ;;  %v622_v25 = vadd.f32 1.0, %v3534_v5  ;;  %v975_v5 = vmul.f32 %v3908_v2, %v959_v4  ;;  %v3915_v2 = vld [vmem:[%s5601_s0 + $0x70] sm:$0xff] }
 0x23a   :  { %v3538_v17 = vpop.eup %3537  ;;  %3563 = vtanh.f32 %v930_v28  ;;  %v928_v35 = vadd.f32 %v889_v30, %v529_v15  ;;  %v620_v40 = vadd.f32 1.0, %v3536_v24  ;;  %v4579_v0 = vadd.f32 %v986_v13, %v970_v56  ;;  %v3909_v13 = vld [vmem:[%s5601_s0 + $0x20] sm:$0xff] }
 0x23b   :  { %v3540_v58 = vpop.eup %3539  ;;  %3565 = vrcp.f32 %v619_v3  ;;  %v3180_v14 = vpop.f32.mrf.mxu1  ;;  %v984_v23 = vmul.f32 %v3538_v17, %v4514_v57  ;;  %v3910_v17 = vld [vmem:[%s5601_s0 + $0x28] sm:$0xff] }
 0x23c   :  { %v4571_v10 = vpop.eup %3541  ;;  %3567 = vtanh.f32 %v928_v35  ;;  %v931_v59 = vadd.f32 %v3180_v14, %v540_v6  ;;  %v987_v21 = vmul.f32 %v3540_v58, %v4520_v12 }
 0x23d   :  { %v3544_v11 = vpop.eup %3543  ;;  %v892_v60 = vpop.f32.mrf.mxu1  ;;  %v957_v57 = vsub.f32 1.0, %v4571_v10  ;;  %v4604_v49 = vadd.f32 %v984_v23, %v968_v32  ;;  %v972_v32 = vmul.f32 %v3909_v13, %v956_v62  ;;  %v3912_v23 = vld [vmem:[%s5601_s0 + $0x58] sm:$0xff] }
 0x23e   :  { %v4582_v43 = vpop.eup %3545  ;;  %3569 = vtanh.f32 %v931_v59  ;;  %v929_v8 = vadd.f32 %v892_v60, %v532_v36  ;;  %v4584_v9 = vadd.f32 %v987_v21, %v971_v20  ;;  %v985_v12 = vmul.f32 %v3544_v11, %v4526_v41  ;;  %v163_v41 = vld [vmem:[%s5604_s3 + $0x168] sm:$0xff] }
 0x23f   :  { %v3548_v27 = vpop.eup %3547  ;;  %3571 = vrcp.f32 %v622_v25  ;;  %v3183_v48 = vpop.f32.mrf.mxu1  ;;  %v548_v54 = vadd.f32 %v4497_v52, %v163_v41  ;;  %v973_v6 = vmul.f32 %v3910_v17, %v957_v57  ;;  %v962_v20 = vsub.f32 1.0, %v4582_v43 }
 0x240   :  { %v4593_v50 = vpop.eup %3549  ;;  %3573 = vtanh.f32 %v929_v8  ;;  %v934_v39 = vadd.f32 %v3183_v48, %v553_v38  ;;  %v4601_v51 = vpack.c.bf16 %v4584_v9, %v4579_v0  ;;  %v990_v47 = vmul.f32 %v3548_v27, %v4532_v61  ;;  %v3907_v61 = vld [vmem:[%s5601_s0 + $0x30] sm:$0xff] }
 0x241   :  { %v3552_v45 = vpop.eup %3551  ;;  %3575 = vrcp.f32 %v620_v40  ;;  %v905_v46 = vpop.f32.mrf.mxu1  ;;  %v4606_v1 = vadd.f32 %v985_v12, %v969_v33  ;;  %v974_v26 = vmul.f32 %v3907_v61, %v958_v22  ;;  %v960_v59 = vsub.f32 1.0, %v4593_v50 }
 0x242   :  { %v3554_v37 = vpop.eup %3553  ;;  %3577 = vtanh.f32 %v934_v39  ;;  %v932_v18 = vadd.f32 %v905_v46, %v545_v44  ;;  %2922 = vst [vmem:[%s5605_s4 + $0x8] sm:$0xff] %v4601_v51   ;;  %v988_v29 = vmul.f32 %v3552_v45, %v4538_v7  ;;  %v978_v60 = vmul.f32 %v3911_v42, %v962_v20  ;;  %v3930_v42 = vld [vmem:[%s5602_s1 + $0x60] sm:$0xff]  }
 0x243   :  { %v3556_v3 = vpop.eup %3555  ;;  %v3184_v55 = vpop.f32.mrf.mxu1  ;;  %v4622_v15 = vpack.c.bf16 %v4606_v1, %v4604_v49  ;;  %v4626_v56 = vadd.f32 %v990_v47, %v974_v26  ;;  %v963_v58 = vsub.f32 1.0, %v3554_v37  ;;  %v976_v48 = vmul.f32 %v3913_v31, %v960_v59  ;;  %v3924_v59 = vld [vmem:[%s5602_s1 + $0x30] sm:$0xff]   ;;  %v3937_v31 = vld [vmem:[%s5602_s1 + $0x98] sm:$0xff]  }
 0x244   :  { %v3558_v28 = vpop.eup %3557  ;;  %3579 = vtanh.f32 %v932_v18  ;;  %v935_v24 = vadd.f32 %v3184_v55, %v556_v53  ;;  %v991_v52 = vmul.f32 %v3556_v3, %v4545_v63  ;;  %v4646_v22 = vadd.f32 %v988_v29, %v972_v32 }
 0x245   :  { %v3560_v30 = vpop.eup %3559  ;;  %v908_v34 = vpop.f32.mrf.mxu1  ;;  %2806 = vst [vmem:[%s5605_s4] sm:$0xff] %v4622_v15  }
 0x246   :  { %v3562_v7 = vpop.eup %3561  ;;  %3581 = vtanh.f32 %v935_v24  ;;  %v933_v63 = vadd.f32 %v908_v34, %v548_v54  ;;  %v4638_v16 = vadd.f32 %v991_v52, %v975_v5  ;;  %v989_v35 = vmul.f32 %v3560_v30, %v4571_v10  ;;  %v3917_v34 = vld [vmem:[%s5601_s0 + $0x60] sm:$0xff] }
 0x247   :  { %v3564_v19 = vpop.eup %3563  ;;  %v961_v10 = vsub.f32 1.0, %v3558_v28  ;;  %v966_v45 = vsub.f32 1.0, %v3562_v7 }
 0x248   :  { %v3566_v25 = vpop.eup %3565  ;;  %3583 = vtanh.f32 %v933_v63  ;;  %v4644_v14 = vpack.c.bf16 %v4638_v16, %v4626_v56  ;;  %v4648_v33 = vadd.f32 %v989_v35, %v973_v6  ;;  %v994_v21 = vmul.f32 %v3564_v19, %v4582_v43  ;;  %v3918_v6 = vld [vmem:[%s5601_s0 + $0x68] sm:$0xff] }
 0x249   :  { %v3568_v36 = vpop.eup %3567  ;;  %v979_v43 = vmul.f32 %v3912_v23, %v963_v58  ;;  %v964_v3 = vsub.f32 1.0, %v3566_v25  ;;  %v982_v5 = vmul.f32 %v3915_v2, %v966_v45  ;;  %v3932_v23 = vld [vmem:[%s5602_s1 + $0x70] sm:$0xff]  }
 0x24a   :  { %2924 = vst [vmem:[%s5605_s4 + $0x18] sm:$0xff] %v4644_v14   ;;  %v4658_v11 = vpack.c.bf16 %v4648_v33, %v4646_v22  ;;  %v992_v12 = vmul.f32 %v3568_v36, %v4593_v50  ;;  %v4674_v62 = vadd.f32 %v994_v21, %v978_v60  ;;  %v3914_v50 = vld [vmem:[%s5601_s0 + $0x48] sm:$0xff]  ;;  %v3921_v36 = vld [vmem:[%s5602_s1 + $0x18] sm:$0xff]  }
 0x24b   :  { %v3570_v40 = vpop.eup %3569  ;;  %v977_v44 = vmul.f32 %v3914_v50, %v961_v10  ;;  %v980_v13 = vmul.f32 %v3917_v34, %v964_v3  ;;  %v3925_v21 = vld [vmem:[%s5602_s1 + $0x38] sm:$0xff]   ;;  %v3926_v10 = vld [vmem:[%s5602_s1 + $0x40] sm:$0xff]   ;;  %v3931_v60 = vld [vmem:[%s5602_s1 + $0x68] sm:$0xff]  }
 0x24c   :  { %v3572_v38 = vpop.eup %3571  ;;  %v995_v8 = vmul.f32 %v3570_v40, %v3554_v37  ;;  %2923 = vst [vmem:[%s5605_s4 + $0x10] sm:$0xff] %v4658_v11   ;;  %v4683_v37 = vadd.f32 %v992_v12, %v976_v48  ;;  %v3928_v40 = vld [vmem:[%s5602_s1 + $0x50] sm:$0xff]   ;;  %v3935_v12 = vld [vmem:[%s5602_s1 + $0x88] sm:$0xff]   ;;  %v3938_v48 = vld [vmem:[%s5602_s1 + $0xa0] sm:$0xff]  }
 0x24d   :  { %v3574_v27 = vpop.eup %3573  ;;  %v967_v46 = vsub.f32 1.0, %v3572_v38  ;;  %v3940_v50 = vld [vmem:[%s5602_s1 + $0xb0] sm:$0xff]  }
 0x24e   :  { %v3576_v4 = vpop.eup %3575  ;;  %v4676_v57 = vadd.f32 %v995_v8, %v979_v43  ;;  %v993_v41 = vmul.f32 %v3574_v27, %v3558_v28  ;;  %v3916_v28 = vld [vmem:[%s5601_s0 + $0x78] sm:$0xff]  ;;  %v3934_v8 = vld [vmem:[%s5602_s1 + $0x80] sm:$0xff]   ;;  %v3936_v27 = vld [vmem:[%s5602_s1 + $0x90] sm:$0xff]  }
 0x24f   :  { %v3578_v39 = vpop.eup %3577  ;;  %v965_v55 = vsub.f32 1.0, %v3576_v4  ;;  %v983_v24 = vmul.f32 %v3916_v28, %v967_v46  ;;  %v3933_v43 = vld [vmem:[%s5602_s1 + $0x78] sm:$0xff]  }
 0x250   :  { %v1021_v47 = vpack.c.bf16 %v4676_v57, %v4674_v62  ;;  %v4685_v53 = vadd.f32 %v993_v41, %v977_v44  ;;  %v998_v54 = vmul.f32 %v3578_v39, %v3562_v7  ;;  %v3941_v44 = vld [vmem:[%s5602_s1 + $0xb8] sm:$0xff]   ;;  %v3942_v41 = vld [vmem:[%s5603_s2] sm:$0xff]  }
 0x251   :  { %v3580_v18 = vpop.eup %3579  ;;  %v981_v7 = vmul.f32 %v3918_v6, %v965_v55 }
 0x252   :  { %2926 = vst [vmem:[%s5605_s4 + $0x28] sm:$0xff] %v1021_v47   ;;  %v1020_v61 = vpack.c.bf16 %v4685_v53, %v4683_v37  ;;  %v996_v29 = vmul.f32 %v3580_v18, %v3566_v25  ;;  %v4704_v32 = vadd.f32 %v998_v54, %v982_v5  ;;  %v3919_v25 = vld [vmem:[%s5602_s1 + $0x8] sm:$0xff]  }
 0x253   :  { %v3582_v26 = vpop.eup %3581 }
 0x254   :  { %v999_v52 = vmul.f32 %v3582_v26, %v3572_v38  ;;  %2925 = vst [vmem:[%s5605_s4 + $0x20] sm:$0xff] %v1020_v61   ;;  %v4713_v19 = vadd.f32 %v996_v29, %v980_v13  ;;  %v3929_v38 = vld [vmem:[%s5602_s1 + $0x58] sm:$0xff]  }
 0x255   :  { %v3584_v30 = vpop.eup %3583 }
 0x256   :  { %v4706_v17 = vadd.f32 %v999_v52, %v983_v24  ;;  %v997_v63 = vmul.f32 %v3584_v30, %v3576_v4  ;;  %v3939_v4 = vld [vmem:[%s5602_s1 + $0xa8] sm:$0xff]  }
 0x258   :  { %v1023_v35 = vpack.c.bf16 %v4706_v17, %v4704_v32  ;;  %v4715_v20 = vadd.f32 %v997_v63, %v981_v7 }
 0x25a   :  { %2928 = vst [vmem:[%s5605_s4 + $0x38] sm:$0xff] %v1023_v35   ;;  %3185 = vmatprep.subr.bf16.mxu1 %v1023_v35  ;;  %v1022_v58 = vpack.c.bf16 %v4715_v20, %v4713_v19 }
 0x25b   :  { %3186 = vmatpush3.bf16.msra.mxu1 %v1023_v35 }
 0x25c   :  { %2927 = vst [vmem:[%s5605_s4 + $0x30] sm:$0xff] %v1022_v58   ;;  %3187 = vmatprep.subr.bf16.mxu1 %v1022_v58 }
 0x25f   :  { %3188 = vmatpush3.bf16.msra.mxu1 %v1022_v58 }
 0x260   :  { %3189 = vmatprep.subr.bf16.mxu1 %v1021_v47 }
 0x263   :  { %3190 = vmatpush3.bf16.msra.mxu1 %v1021_v47 }
 0x264   :  { %3191 = vmatprep.subr.bf16.mxu1 %v1020_v61 }
 0x267   :  { %3192 = vmatpush3.bf16.msra.mxu1 %v1020_v61 }
 0x268   :  { %3193 = vmatprep.subr.bf16.mxu1 %v4644_v14 }
 0x26b   :  { %3194 = vmatpush3.bf16.msra.mxu1 %v4644_v14  ;;  %v3920_v14 = vld [vmem:[%s5602_s1 + $0x10] sm:$0xff]  }
 0x26c   :  { %3195 = vmatprep.subr.bf16.mxu1 %v4658_v11 }
 0x26f   :  { %3196 = vmatpush3.bf16.msra.mxu1 %v4658_v11  ;;  %v3927_v11 = vld [vmem:[%s5602_s1 + $0x48] sm:$0xff]  }
 0x270   :  { %3197 = vmatprep.subr.bf16.mxu1 %v4601_v51 }
 0x273   :  { %3198 = vmatpush3.bf16.msra.mxu1 %v4601_v51  ;;  %v3922_v51 = vld [vmem:[%s5602_s1 + $0x20] sm:$0xff]  }
 0x274   :  { %3199 = vmatprep.subr.bf16.mxu1 %v4622_v15 }
 0x277   :  { %3200 = vmatpush3.bf16.msra.mxu1 %v4622_v15  ;;  %v3923_v15 = vld [vmem:[%s5602_s1 + $0x28] sm:$0xff]  }
 0x27a   :  { %3202 = vmatmul.mubr.bf16.vlgmr.msra.gmra.mxu1 %v3919_v25 }
 0x27b   :  { %3205 = vmatprep.mubr.bf16.mxu1 %v3920_v14 }
 0x282   :  { %3206 = vmatmul.mubr.bf16.gmra.mxu1 %v3921_v36 }
 0x283   :  { %3209 = vmatprep.mubr.bf16.mxu1 %v3922_v51 }
 0x28a   :  { %3210 = vmatmul.mubr.bf16.gmra.mxu1 %v3923_v15  ;;  %v3943_v15 = vld [vmem:[%s5604_s3 + $0xd8] sm:$0xff] }
 0x28b   :  { %3213 = vmatprep.mubr.bf16.mxu1 %v3924_v59 }
 0x292   :  { %3214 = vmatmul.mubr.bf16.gmra.mxu1 %v3925_v21 }
 0x293   :  { %3217 = vmatprep.mubr.bf16.mxu1 %v3926_v10  ;;  %v3944_v10 = vld [vmem:[%s5604_s3 + $0xd0] sm:$0xff] }
 0x29a   :  { %3218 = vmatmul.mubr.bf16.gmra.mxu1 %v3927_v11 }
 0x29b   :  { %3221 = vmatprep.mubr.bf16.mxu1 %v3928_v40  ;;  %v3945_v40 = vld [vmem:[%s5604_s3 + $0xf0] sm:$0xff] }
 0x2a2   :  { %3222 = vmatmul.mubr.bf16.gmra.mxu1 %v3929_v38 }
 0x2a3   :  { %3225 = vmatprep.mubr.bf16.mxu1 %v3930_v42 }
 0x2aa   :  { %3226 = vmatmul.mubr.bf16.gmra.mxu1 %v3931_v60 }
 0x2ab   :  { %3229 = vmatprep.mubr.bf16.mxu1 %v3932_v23  ;;  %v3946_v23 = vld [vmem:[%s5604_s3 + $0xc8] sm:$0xff] }
 0x2b2   :  { %3230 = vmatmul.mubr.bf16.gmra.mxu1 %v3933_v43 }
 0x2b3   :  { %3233 = vmatprep.mubr.bf16.mxu1 %v3934_v8 }
 0x2ba   :  { %3234 = vmatmul.mubr.bf16.gmra.mxu1 %v3935_v12  ;;  %v3947_v12 = vld [vmem:[%s5604_s3 + $0xe0] sm:$0xff] }
 0x2bb   :  { %3237 = vmatprep.mubr.bf16.mxu1 %v3936_v27 }
 0x2c2   :  { %3238 = vmatmul.mubr.bf16.gmra.mxu1 %v3937_v31 }
 0x2c3   :  { %3241 = vmatprep.mubr.bf16.mxu1 %v3938_v48 }
 0x2ca   :  { %3242 = vmatmul.mubr.bf16.gmra.mxu1 %v3939_v4 }
 0x2cb   :  { %3245 = vmatprep.mubr.bf16.mxu1 %v3940_v50  ;;  %v3948_v50 = vld [vmem:[%s5604_s3 + $0xf8] sm:$0xff] }
 0x2d2   :  { %3246 = vmatmul.mubr.bf16.gmra.mxu1 %v3941_v44 }
 0x2d3   :  { %3361 = vmatprep.mubr.bf16.mxu1 %v3942_v41  ;;  %v3949_v41 = vld [vmem:[%s5604_s3 + $0xc0] sm:$0xff] }
 0x33a   :  { %v4805_v39 = vpop.f32.mrf.mxu1 }
 0x33c   :  { %v4807_v45 = vpop.f32.mrf.mxu1 }
 0x33e   :  { %v4809_v46 = vpop.f32.mrf.mxu1 }
 0x340   :  { %v4811_v47 = vpop.f32.mrf.mxu1 }
 0x342   :  { %v4813_v18 = vpop.f32.mrf.mxu1 }
 0x344   :  { %v4815_v3 = vpop.f32.mrf.mxu1 }
 0x346   :  { %v4817_v54 = vpop.f32.mrf.mxu1 }
 0x348   :  { %v4819_v55 = vpop.f32.mrf.mxu1 }
 0x34a   :  { %v4821_v61 = vpop.f32.mrf.mxu1 }
 0x34c   :  { %v4823_v26 = vpop.f32.mrf.mxu1 }
 0x34e   :  { %v4825_v2 = vpop.f32.mrf.mxu1 }
 0x350   :  { %v4827_v5 = vpop.f32.mrf.mxu1 }
 0x352   :  { %v4829_v28 = vpop.f32.mrf.mxu1 }
 0x354   :  { %v4831_v24 = vpop.f32.mrf.mxu1 }
 0x356   :  { %v4833_v52 = vpop.f32.mrf.mxu1 }
 0x358   :  { %v4835_v29 = vpop.f32.mrf.mxu1 }
 0x35a   :  { %v3219_v30 = vpop.f32.mrf.mxu1 }
 0x35c   :  { %v4837_v34 = vpop.f32.mrf.mxu1 }
 0x35e   :  { %v3220_v13 = vpop.f32.mrf.mxu1 }
 0x360   :  { %v1197_v6 = vpop.f32.mrf.mxu1 }
 0x362   :  { %v3223_v7 = vpop.f32.mrf.mxu1 }
 0x364   :  { %v1210_v63 = vpop.f32.mrf.mxu1 }
 0x366   :  { %v3224_v35 = vpop.f32.mrf.mxu1 }
 0x368   :  { %v1213_v58 = vpop.f32.mrf.mxu1 }
 0x36a   :  { %v3227_v25 = vpop.f32.mrf.mxu1 }
 0x36b   :  { %v1235_v11 = vadd.f32 %v3944_v10, %v3227_v25  ;;  %v3951_v10 = vld [vmem:[%s5604_s3 + $0xb8] sm:$0xff] }
 0x36c   :  { %v1226_v14 = vpop.f32.mrf.mxu1 }
 0x36d   :  { %v2652_v48 = vmul.f32 -1.442695, %v1235_v11  ;;  %v1227_v25 = vadd.f32 %v3949_v41, %v1226_v14  ;;  %v1222_v11 = vadd.f32 %v3951_v10, %v3224_v35  ;;  %v3952_v14 = vld [vmem:[%s5604_s3 + $0xb0] sm:$0xff]  ;;  %v3954_v35 = vld [vmem:[%s5604_s3 + $0xa8] sm:$0xff] }
 0x36e   :  { %v3228_v36 = vpop.f32.mrf.mxu1 }
 0x36f   :  { %v1238_v59 = vadd.f32 %v3943_v15, %v3228_v36 }
 0x370   :  { %v1229_v51 = vpop.f32.mrf.mxu1 }
 0x371   :  { %v2653_v60 = vmul.f32 -1.442695, %v1238_v59  ;;  %v1230_v43 = vadd.f32 %v3946_v23, %v1229_v51  ;;  %v3950_v59 = vld [vmem:[%s5604_s3 + $0xe8] sm:$0xff] }
 0x372   :  { %v3231_v21 = vpop.f32.mrf.mxu1 }
 0x373   :  { %v1251_v38 = vadd.f32 %v3945_v40, %v3231_v21  ;;  %v2651_v51 = vmul.f32 -1.442695, %v1230_v43  ;;  %v2649_v43 = vmul.f32 -1.442695, %v1222_v11 }
 0x374   :  { %v1242_v42 = vpop.f32.mrf.mxu1 }
 0x375   :  { %v2656_v8 = vmul.f32 -1.442695, %v1251_v38  ;;  %v1243_v27 = vadd.f32 %v3947_v12, %v1242_v42  ;;  %v1219_v38 = vadd.f32 %v3952_v14, %v3223_v7  ;;  %v2650_v42 = vmul.f32 -1.442695, %v1227_v25  ;;  %v3955_v12 = vld [vmem:[%s5604_s3 + $0x98] sm:$0xff] }
 0x376   :  { %v3232_v31 = vpop.f32.mrf.mxu1  ;;  %v1206_v7 = vadd.f32 %v3955_v12, %v3220_v13 }
 0x377   :  { %v2654_v4 = vmul.f32 -1.442695, %v1243_v27  ;;  %v1254_v44 = vadd.f32 %v3948_v50, %v3232_v31  ;;  %3585 = vpow2.f32 %v2656_v8  ;;  %v1214_v8 = vadd.f32 %v3954_v35, %v1213_v58  ;;  %v3956_v31 = vld [vmem:[%s5604_s3 + $0xa0] sm:$0xff] }
 0x378   :  { %v1245_v36 = vpop.f32.mrf.mxu1  ;;  %3587 = vpow2.f32 %v2653_v60  ;;  %v3953_v60 = vld [vmem:[%s5604_s3 + $0x90] sm:$0xff]  ;;  %v2648_v27 = vmul.f32 -1.442695, %v1219_v38 }
 0x379   :  { %v2657_v15 = vmul.f32 -1.442695, %v1254_v44  ;;  %v1246_v21 = vadd.f32 %v3950_v59, %v1245_v36  ;;  %3589 = vpow2.f32 %v2654_v4  ;;  %v1203_v23 = vadd.f32 %v3953_v60, %v3219_v30  ;;  %v3957_v4 = vld [vmem:[%s5604_s3 + $0x88] sm:$0xff] }
 0x37a   :  { %3591 = vpow2.f32 %v2652_v48  ;;  %v1211_v48 = vadd.f32 %v3956_v31, %v1210_v63  ;;  %v1198_v50 = vadd.f32 %v3957_v4, %v1197_v6  ;;  %v2647_v58 = vmul.f32 -1.442695, %v1214_v8  ;;  %v3958_v63 = vld [vmem:[%s5604_s3 + $0x80] sm:$0xff] }
 0x37b   :  { %v2655_v40 = vmul.f32 -1.442695, %v1246_v21  ;;  %3593 = vpow2.f32 %v2657_v15  ;;  %v2644_v30 = vmul.f32 -1.442695, %v1203_v23  ;;  %v2645_v44 = vmul.f32 -1.442695, %v1206_v7 }
 0x37c   :  { %3595 = vpow2.f32 %v2651_v51  ;;  %v2646_v41 = vmul.f32 -1.442695, %v1211_v48  ;;  %v2643_v13 = vmul.f32 -1.442695, %v1198_v50  ;;  %v1195_v59 = vadd.f32 %v3958_v63, %v4837_v34 }
 0x37d   :  { %3597 = vpow2.f32 %v2655_v40 }
 0x37e   :  { %3599 = vpow2.f32 %v2650_v42  ;;  %v2642_v42 = vmul.f32 -1.442695, %v1195_v59 }
 0x37f   :  { %3601 = vpow2.f32 %v2649_v43 }
 0x380   :  { %3603 = vpow2.f32 %v2648_v27 }
 0x381   :  { %3605 = vpow2.f32 %v2644_v30 }
 0x382   :  { %3607 = vpow2.f32 %v2647_v58 }
 0x383   :  { %3609 = vpow2.f32 %v2645_v44 }
 0x384   :  { %v3586_v25 = vpop.eup %3585  ;;  %3611 = vpow2.f32 %v2646_v41 }
 0x385   :  { %v3588_v36 = vpop.eup %3587  ;;  %v1479_v51 = vadd.f32 1.0, %v3586_v25  ;;  %3613 = vpow2.f32 %v2643_v13 }
 0x386   :  { %v3590_v15 = vpop.eup %3589  ;;  %v1476_v11 = vadd.f32 1.0, %v3588_v36 }
 0x387   :  { %v3592_v6 = vpop.eup %3591  ;;  %v1477_v21 = vadd.f32 1.0, %v3590_v15  ;;  %3615 = vrcp.f32 %v1479_v51 }
 0x388   :  { %v3594_v10 = vpop.eup %3593  ;;  %v1475_v60 = vadd.f32 1.0, %v3592_v6 }
 0x389   :  { %v3596_v40 = vpop.eup %3595  ;;  %v1480_v14 = vadd.f32 1.0, %v3594_v10  ;;  %3617 = vrcp.f32 %v1477_v21 }
 0x38a   :  { %v3598_v38 = vpop.eup %3597  ;;  %v1474_v35 = vadd.f32 1.0, %v3596_v40 }
 0x38b   :  { %3619 = vrcp.f32 %v1480_v14  ;;  %v1478_v23 = vadd.f32 1.0, %v3598_v38  ;;  %v3600_v43 = vpop.eup %3599 }
 0x38c   :  { %3621 = vrcp.f32 %v1476_v11  ;;  %v3602_v34 = vpop.eup %3601  ;;  %v1473_v8 = vadd.f32 1.0, %v3600_v43 }
 0x38d   :  { %3623 = vrcp.f32 %v1478_v23  ;;  %v3604_v12 = vpop.eup %3603  ;;  %v1472_v27 = vadd.f32 1.0, %v3602_v34 }
 0x38e   :  { %3625 = vpow2.f32 %v2642_v42  ;;  %v3606_v7 = vpop.eup %3605  ;;  %v1471_v30 = vadd.f32 1.0, %v3604_v12 }
 0x38f   :  { %3627 = vrcp.f32 %v1475_v60  ;;  %v3608_v31 = vpop.eup %3607  ;;  %v1467_v6 = vadd.f32 1.0, %v3606_v7 }
 0x390   :  { %3629 = vrcp.f32 %v1474_v35  ;;  %v3610_v48 = vpop.eup %3609  ;;  %v1470_v58 = vadd.f32 1.0, %v3608_v31 }
 0x391   :  { %3631 = vrcp.f32 %v1473_v8  ;;  %v3612_v4 = vpop.eup %3611  ;;  %v1468_v51 = vadd.f32 1.0, %v3610_v48 }
 0x392   :  { %v3614_v50 = vpop.eup %3613  ;;  %3633 = vrcp.f32 %v1472_v27  ;;  %v1469_v25 = vadd.f32 1.0, %v3612_v4 }
 0x393   :  { %3635 = vrcp.f32 %v1471_v30  ;;  %v1466_v38 = vadd.f32 1.0, %v3614_v50 }
 0x394   :  { %v3616_v44 = vpop.eup %3615  ;;  %3637 = vrcp.f32 %v1470_v58 }
 0x395   :  { %v1527_v15 = vmul.f32 %v3616_v44, %v4704_v32  ;;  %3639 = vrcp.f32 %v1469_v25 }
 0x396   :  { %v3618_v41 = vpop.eup %3617  ;;  %3641 = vrcp.f32 %v1468_v51 }
 0x397   :  { %v1525_v11 = vmul.f32 %v3618_v41, %v4713_v19  ;;  %3643 = vrcp.f32 %v1467_v6 }
 0x398   :  { %v3620_v13 = vpop.eup %3619  ;;  %3645 = vrcp.f32 %v1466_v38  ;;  %v3960_v38 = vld [vmem:[%s5603_s2 + $0x10] sm:$0xff]  }
 0x399   :  { %v3622_v36 = vpop.eup %3621  ;;  %v1528_v63 = vmul.f32 %v3620_v13, %v4706_v17 }
 0x39a   :  { %v3624_v59 = vpop.eup %3623  ;;  %v1524_v60 = vmul.f32 %v3622_v36, %v4676_v57 }
 0x39b   :  { %v3626_v21 = vpop.eup %3625  ;;  %v1536_v10 = vpack.c.bf16 %v1528_v63, %v1527_v15  ;;  %v1526_v40 = vmul.f32 %v3624_v59, %v4715_v20 }
 0x39c   :  { %v3628_v14 = vpop.eup %3627  ;;  %v1465_v43 = vadd.f32 1.0, %v3626_v21 }
 0x39d   :  { %3249 = vmatprep.subr.bf16.mxu0 %v1536_v10  ;;  %v1535_v42 = vpack.c.bf16 %v1526_v40, %v1525_v11  ;;  %v3630_v23 = vpop.eup %3629  ;;  %v1523_v35 = vmul.f32 %v3628_v14, %v4674_v62  ;;  %v3959_v14 = vld [vmem:[%s5603_s2 + $0x8] sm:$0xff]  }
 0x39e   :  { %3250 = vmatpush3.bf16.msra.mxu0 %v1536_v10  ;;  %v3632_v34 = vpop.eup %3631  ;;  %v1522_v12 = vmul.f32 %v3630_v23, %v4685_v53  ;;  %3647 = vrcp.f32 %v1465_v43  ;;  %v3963_v23 = vld [vmem:[%s5603_s2 + $0x28] sm:$0xff]   ;;  %v3964_v43 = vld [vmem:[%s5603_s2 + $0x30] sm:$0xff]  }
 0x39f   :  { %3251 = vmatprep.subr.bf16.mxu0 %v1535_v42  ;;  %v1534_v8 = vpack.c.bf16 %v1524_v60, %v1523_v35  ;;  %v3634_v7 = vpop.eup %3633  ;;  %v1521_v27 = vmul.f32 %v3632_v34, %v4683_v37  ;;  %v3962_v60 = vld [vmem:[%s5603_s2 + $0x20] sm:$0xff]   ;;  %v3965_v35 = vld [vmem:[%s5603_s2 + $0x38] sm:$0xff]  }
 0x3a0   :  { %v3636_v31 = vpop.eup %3635  ;;  %v1520_v30 = vmul.f32 %v3634_v7, %v4638_v16  ;;  %v3966_v34 = vld [vmem:[%s5602_s1] sm:$0xff]  }
 0x3a1   :  { %v1533_v48 = vpack.c.bf16 %v1522_v12, %v1521_v27  ;;  %v3638_v4 = vpop.eup %3637  ;;  %v1519_v50 = vmul.f32 %v3636_v31, %v4626_v56  ;;  %v3968_v7 = vld [vmem:[%s5604_s3] sm:$0xff]  ;;  %v4936_v31 = vpop.f32.mrf.mxu1 }
 0x3a2   :  { %3252 = vmatpush3.bf16.msra.mxu0 %v1535_v42  ;;  %v3640_v58 = vpop.eup %3639  ;;  %v1518_v41 = vmul.f32 %v3638_v4, %v4648_v33  ;;  %v3961_v42 = vld [vmem:[%s5603_s2 + $0x18] sm:$0xff]   ;;  %v1131_v27 = vadd.f32 %v3968_v7, %v4807_v45 }
 0x3a3   :  { %3253 = vmatprep.subr.bf16.mxu0 %v1534_v8  ;;  %v1532_v44 = vpack.c.bf16 %v1520_v30, %v1519_v50  ;;  %v3642_v25 = vpop.eup %3641  ;;  %v1517_v13 = vmul.f32 %v3640_v58, %v4646_v22  ;;  %v3969_v30 = vld [vmem:[%s5604_s3 + $0x18] sm:$0xff] }
 0x3a4   :  { %v3644_v36 = vpop.eup %3643  ;;  %v1516_v15 = vmul.f32 %v3642_v25, %v4584_v9  ;;  %v1142_v4 = vadd.f32 %v3969_v30, %v4809_v46  ;;  %v2626_v50 = vmul.f32 -1.442695, %v1131_v27  ;;  %v3972_v46 = vld [vmem:[%s5604_s3 + $0x20] sm:$0xff]  ;;  %v3978_v27 = vld [vmem:[%s5604_s3 + $0x48] sm:$0xff] }
 0x3a5   :  { %v1531_v51 = vpack.c.bf16 %v1518_v41, %v1517_v13  ;;  %v3646_v63 = vpop.eup %3645  ;;  %v1515_v59 = vmul.f32 %v3644_v36, %v4579_v0  ;;  %v3971_v41 = vld [vmem:[%s5604_s3 + $0x30] sm:$0xff]  ;;  %v1147_v36 = vadd.f32 %v3972_v46, %v4815_v3  ;;  %v3974_v3 = vld [vmem:[%s5604_s3 + $0x28] sm:$0xff] }
 0x3a6   :  { %3254 = vmatpush3.bf16.msra.mxu0 %v1534_v8  ;;  %v1514_v10 = vmul.f32 %v3646_v63, %v4606_v1  ;;  %v3967_v8 = vld [vmem:[%s5604_s3 + $0x10] sm:$0xff]  ;;  %v2629_v45 = vmul.f32 -1.442695, %v1142_v4  ;;  %v1155_v25 = vadd.f32 %v3971_v41, %v4813_v18 }
 0x3a7   :  { %3255 = vmatprep.subr.bf16.mxu0 %v1533_v48  ;;  %v1530_v21 = vpack.c.bf16 %v1516_v15, %v1515_v59  ;;  %v1139_v12 = vadd.f32 %v3967_v8, %v4805_v39  ;;  %v3970_v39 = vld [vmem:[%s5604_s3 + $0x8] sm:$0xff]  ;;  %v3973_v15 = vld [vmem:[%s5604_s3 + $0x38] sm:$0xff]  ;;  %v2630_v18 = vmul.f32 -1.442695, %v1147_v36 }
 0x3a8   :  { %v1134_v58 = vadd.f32 %v3970_v39, %v4811_v47  ;;  %v2632_v47 = vmul.f32 -1.442695, %v1155_v25  ;;  %v1158_v63 = vadd.f32 %v3973_v15, %v4817_v54  ;;  %v3975_v54 = vld [vmem:[%s5604_s3 + $0x50] sm:$0xff]  ;;  %v3981_v15 = vld [vmem:[%s5604_s3 + $0x78] sm:$0xff] }
 0x3aa   :  { %3256 = vmatpush3.bf16.msra.mxu0 %v1533_v48  ;;  %v2628_v48 = vmul.f32 -1.442695, %v1139_v12  ;;  %v2627_v13 = vmul.f32 -1.442695, %v1134_v58 }
 0x3ab   :  { %3257 = vmatprep.subr.bf16.mxu0 %v1532_v44  ;;  %v3648_v6 = vpop.eup %3647 }
 0x3ac   :  { %v1513_v11 = vmul.f32 %v3648_v6, %v4604_v49  ;;  %3649 = vpow2.f32 %v2628_v48  ;;  %v2633_v6 = vmul.f32 -1.442695, %v1158_v63  ;;  %v1190_v63 = vadd.f32 %v3981_v15, %v4833_v52 }
 0x3ad   :  { %3651 = vpow2.f32 %v2626_v50 }
 0x3ae   :  { %3258 = vmatpush3.bf16.msra.mxu0 %v1532_v44  ;;  %v1529_v40 = vpack.c.bf16 %v1514_v10, %v1513_v11  ;;  %v4946_v44 = vpop.f32.mrf.mxu1  ;;  %3653 = vpow2.f32 %v2629_v45  ;;  %v2641_v52 = vmul.f32 -1.442695, %v1190_v63 }
 0x3af   :  { %3259 = vmatprep.subr.bf16.mxu0 %v1531_v51  ;;  %3655 = vpow2.f32 %v2627_v13 }
 0x3b0   :  { %3657 = vpow2.f32 %v2632_v47 }
 0x3b1   :  { %3659 = vpow2.f32 %v2630_v18 }
 0x3b2   :  { %3260 = vmatpush3.bf16.msra.mxu0 %v1531_v51  ;;  %v4956_v51 = vpop.f32.mrf.mxu1  ;;  %3661 = vpow2.f32 %v2633_v6 }
 0x3b3   :  { %3261 = vmatprep.subr.bf16.mxu0 %v1530_v21 }
 0x3b4   :  { %v4962_v59 = vpop.f32.mrf.mxu1 }
 0x3b6   :  { %3262 = vmatpush3.bf16.msra.mxu0 %v1530_v21  ;;  %v1150_v21 = vadd.f32 %v3974_v3, %v4819_v55  ;;  %v4968_v10 = vpop.f32.mrf.mxu1  ;;  %v3983_v3 = vld [vmem:[%s5604_s3 + $0x110] sm:$0xff] }
 0x3b7   :  { %3263 = vmatprep.subr.bf16.mxu0 %v1529_v40 }
 0x3b9   :  { %v3650_v11 = vpop.eup %3649 }
 0x3ba   :  { %3264 = vmatpush3.bf16.msra.mxu0 %v1529_v40  ;;  %v1171_v40 = vadd.f32 %v3975_v54, %v4821_v61  ;;  %v1371_v55 = vadd.f32 1.0, %v3650_v11 }
 0x3bd   :  { %3266 = vmatmul.mubr.bf16.vlgmr.msra.gmra.mxu0 %v3959_v14  ;;  %v2631_v14 = vmul.f32 -1.442695, %v1150_v21  ;;  %v1267_v21 = vadd.f32 %v3983_v3, %v4936_v31 }
 0x3be   :  { %3269 = vmatprep.mubr.bf16.mxu0 %v3960_v38  ;;  %v3652_v38 = vpop.eup %3651 }
 0x3bf   :  { %v1369_v61 = vadd.f32 1.0, %v3652_v38  ;;  %3663 = vpow2.f32 %v2631_v14 }
 0x3c0   :  { %3665 = vrcp.f32 %v1371_v55 }
 0x3c5   :  { %3270 = vmatmul.mubr.bf16.gmra.mxu0 %v3961_v42  ;;  %v3976_v42 = vld [vmem:[%s5604_s3 + $0x40] sm:$0xff] }
 0x3c6   :  { %3273 = vmatprep.mubr.bf16.mxu0 %v3962_v60  ;;  %v1163_v60 = vadd.f32 %v3976_v42, %v4823_v26  ;;  %v1166_v26 = vadd.f32 %v3978_v27, %v4827_v5  ;;  %v3980_v5 = vld [vmem:[%s5604_s3 + $0x60] sm:$0xff]  ;;  %v3986_v27 = vld [vmem:[%s5604_s3 + $0x108] sm:$0xff] }
 0x3c7   :  { %v1179_v25 = vadd.f32 %v3980_v5, %v4831_v24  ;;  %v3982_v24 = vld [vmem:[%s5604_s3 + $0x68] sm:$0xff] }
 0x3c8   :  { %v2634_v7 = vmul.f32 -1.442695, %v1163_v60  ;;  %v2635_v41 = vmul.f32 -1.442695, %v1166_v26  ;;  %v1182_v6 = vadd.f32 %v3982_v24, %v4835_v29  ;;  %v3984_v29 = vld [vmem:[%s5604_s3 + $0x100] sm:$0xff]  ;;  %v1262_v26 = vadd.f32 %v3986_v27, %v4962_v59  ;;  %v3989_v24 = vld [vmem:[%s5604_s3 + $0x138] sm:$0xff] }
 0x3c9   :  { %v2638_v18 = vmul.f32 -1.442695, %v1179_v25  ;;  %v1259_v42 = vadd.f32 %v3984_v29, %v4946_v44 }
 0x3ca   :  { %v2639_v38 = vmul.f32 -1.442695, %v1182_v6 }
 0x3cd   :  { %3274 = vmatmul.mubr.bf16.gmra.mxu0 %v3963_v23  ;;  %v4978_v23 = vpop.f32.mrf.mxu1 }
 0x3ce   :  { %3277 = vmatprep.mubr.bf16.mxu0 %v3964_v43  ;;  %v3654_v43 = vpop.eup %3653 }
 0x3cf   :  { %v3656_v12 = vpop.eup %3655  ;;  %v4988_v48 = vpop.f32.mrf.mxu1  ;;  %v1372_v30 = vadd.f32 1.0, %v3654_v43 }
 0x3d0   :  { %v3658_v4 = vpop.eup %3657  ;;  %v1370_v58 = vadd.f32 1.0, %v3656_v12  ;;  %v1286_v6 = vadd.f32 %v3989_v24, %v4988_v48  ;;  %v3991_v48 = vld [vmem:[%s5604_s3 + $0x150] sm:$0xff] }
 0x3d1   :  { %v3660_v45 = vpop.eup %3659  ;;  %v4998_v13 = vpop.f32.mrf.mxu1  ;;  %v1375_v46 = vadd.f32 1.0, %v3658_v4 }
 0x3d2   :  { %v3662_v36 = vpop.eup %3661 }
 0x3d3   :  { %v5012_v11 = vpop.f32.mrf.mxu1  ;;  %v1376_v54 = vadd.f32 1.0, %v3662_v36  ;;  %v3664_v14 = vpop.eup %3663 }
 0x3d4   :  { %v5020_v43 = vpop.eup %3665  ;;  %v1374_v12 = vadd.f32 1.0, %v3664_v14 }
 0x3d5   :  { %3278 = vmatmul.mubr.bf16.gmra.mxu0 %v3965_v35  ;;  %v2636_v35 = vmul.f32 -1.442695, %v1171_v40  ;;  %v5018_v55 = vpop.f32.mrf.mxu1 }
 0x3d6   :  { %3297 = vmatprep.mubr.bf16.mxu0 %v3966_v34  ;;  %v3977_v34 = vld [vmem:[%s5604_s3 + $0x58] sm:$0xff] }
 0x3d7   :  { %v1174_v8 = vadd.f32 %v3977_v34, %v4825_v2  ;;  %3667 = vpow2.f32 %v2636_v35  ;;  %v3979_v2 = vld [vmem:[%s5604_s3 + $0x70] sm:$0xff]  ;;  %v3985_v35 = vld [vmem:[%s5604_s3 + $0x118] sm:$0xff] }
 0x3d8   :  { %v1187_v39 = vadd.f32 %v3979_v2, %v4829_v28  ;;  %3669 = vrcp.f32 %v1369_v61  ;;  %v1373_v28 = vadd.f32 1.0, %v3660_v45  ;;  %v1270_v34 = vadd.f32 %v3985_v35, %v4956_v51 }
 0x3d9   :  { %v2637_v50 = vmul.f32 -1.442695, %v1174_v8  ;;  %3671 = vpow2.f32 %v2634_v7 }
 0x3da   :  { %3673 = vrcp.f32 %v1372_v30  ;;  %v2640_v47 = vmul.f32 -1.442695, %v1187_v39  ;;  %v3987_v30 = vld [vmem:[%s5604_s3 + $0x130] sm:$0xff] }
 0x3db   :  { %3675 = vpow2.f32 %v2637_v50  ;;  %v1283_v51 = vadd.f32 %v3987_v30, %v4968_v10  ;;  %v5036_v50 = vpop.f32.mrf.mxu1  ;;  %v3988_v10 = vld [vmem:[%s5604_s3 + $0x120] sm:$0xff] }
 0x3dc   :  { %3677 = vrcp.f32 %v1370_v58 }
 0x3dd   :  { %3679 = vpow2.f32 %v2635_v41 }
 0x3de   :  { %3681 = vrcp.f32 %v1375_v46  ;;  %v1275_v46 = vadd.f32 %v3988_v10, %v4978_v23 }
 0x3df   :  { %3683 = vpow2.f32 %v2640_v47  ;;  %v1293_v47 = vpop.f32.mrf.mxu1 }
 0x3e0   :  { %3685 = vrcp.f32 %v1373_v28 }
 0x3e1   :  { %3687 = vpow2.f32 %v2638_v18 }
 0x3e2   :  { %3689 = vrcp.f32 %v1376_v54 }
 0x3e4   :  { %v3668_v61 = vpop.eup %3667 }
 0x3e5   :  { %v5026_v44 = vpop.eup %3669  ;;  %v1379_v5 = vadd.f32 1.0, %v3668_v61 }
 0x3e6   :  { %v3672_v2 = vpop.eup %3671 }
 0x3e7   :  { %v5038_v58 = vpop.eup %3673  ;;  %v1377_v15 = vadd.f32 1.0, %v3672_v2 }
 0x3e8   :  { %v3676_v41 = vpop.eup %3675  ;;  %v1669_v61 = vsub.f32 1.0, %v5038_v58 }
 0x3e9   :  { %v5040_v25 = vpop.eup %3677  ;;  %v1380_v54 = vadd.f32 1.0, %v3676_v41 }
 0x3ea   :  { %v3680_v28 = vpop.eup %3679 }
 0x3eb   :  { %v5046_v18 = vpop.eup %3681 }
 0x47d   :  { %v3267_v40 = vpop.f32.mrf.mxu0 }
 0x47e   :  { %v1636_v60 = vadd.f32 %v3267_v40, %v1267_v21  ;;  %v3684_v21 = vpop.eup %3683  ;;  %v1666_v40 = vsub.f32 1.0, %v5026_v44 }
 0x47f   :  { %v1571_v31 = vpop.f32.mrf.mxu0  ;;  %v5054_v14 = vpop.eup %3685  ;;  %v1383_v27 = vadd.f32 1.0, %v3684_v21 }
 0x480   :  { %3691 = vtanh.f32 %v1636_v60  ;;  %v1634_v8 = vadd.f32 %v1571_v31, %v1259_v42  ;;  %v1299_v42 = vadd.f32 %v3991_v48, %v5012_v11  ;;  %v3247_v31 = vpop.f32.mrf.mxu1  ;;  %v3688_v35 = vpop.eup %3687  ;;  %v1667_v11 = vsub.f32 1.0, %v5040_v25 }
 0x481   :  { %3693 = vpow2.f32 %v2641_v52  ;;  %v3268_v7 = vpop.f32.mrf.mxu0  ;;  %v1668_v52 = vsub.f32 1.0, %v5020_v43  ;;  %v1682_v41 = vmul.f32 %v1666_v40, %v4604_v49 }
 0x482   :  { %3695 = vpow2.f32 %v2639_v38  ;;  %v1637_v4 = vadd.f32 %v3268_v7, %v1270_v34  ;;  %v3990_v38 = vld [vmem:[%s5604_s3 + $0x128] sm:$0xff]  ;;  %v1378_v34 = vadd.f32 1.0, %v3680_v28  ;;  %v3993_v28 = vld [vmem:[%s5604_s3 + $0x158] sm:$0xff] }
 0x483   :  { %3697 = vtanh.f32 %v1634_v8  ;;  %v1574_v39 = vpop.f32.mrf.mxu0  ;;  %v1278_v29 = vadd.f32 %v3990_v38, %v4998_v13  ;;  %v1684_v30 = vmul.f32 %v1668_v52, %v4579_v0  ;;  %v1685_v0 = vmul.f32 %v1669_v61, %v4584_v9  ;;  %v3994_v9 = vld [vmem:[%s5604_s3 + $0x148] sm:$0xff] }
 0x484   :  { %3699 = vtanh.f32 %v1637_v4  ;;  %v1635_v45 = vadd.f32 %v1574_v39, %v1262_v26  ;;  %v3992_v4 = vld [vmem:[%s5604_s3 + $0x140] sm:$0xff] }
 0x485   :  { %3701 = vrcp.f32 %v1374_v12  ;;  %v3271_v59 = vpop.f32.mrf.mxu0  ;;  %v5065_v12 = vpop.eup %3689  ;;  %v1291_v2 = vadd.f32 %v3992_v4, %v5018_v55  ;;  %v1302_v55 = vadd.f32 %v3993_v28, %v5036_v50  ;;  %v3995_v50 = vld [vmem:[%s5604_s3 + $0x170] sm:$0xff] }
 0x486   :  { %3703 = vtanh.f32 %v1635_v45  ;;  %v1640_v36 = vadd.f32 %v3271_v59, %v1283_v51  ;;  %v1306_v45 = vpop.f32.mrf.mxu1  ;;  %v1381_v59 = vadd.f32 1.0, %v3688_v35 }
 0x487   :  { %v1587_v63 = vpop.f32.mrf.mxu0 }
 0x488   :  { %3705 = vtanh.f32 %v1640_v36  ;;  %v1638_v3 = vadd.f32 %v1587_v63, %v1275_v46  ;;  %v1672_v63 = vsub.f32 1.0, %v5046_v18 }
 0x489   :  { %3707 = vrcp.f32 %v1379_v5  ;;  %v3272_v23 = vpop.f32.mrf.mxu0 }
 0x48a   :  { %3709 = vtanh.f32 %v1638_v3  ;;  %v1641_v60 = vadd.f32 %v3272_v23, %v1286_v6  ;;  %v1294_v6 = vadd.f32 %v3994_v9, %v1293_v47  ;;  %v1683_v3 = vmul.f32 %v1667_v11, %v4606_v1  ;;  %v3248_v23 = vpop.f32.mrf.mxu1 }
 0x48b   :  { %3711 = vrcp.f32 %v1377_v15  ;;  %v1590_v8 = vpop.f32.mrf.mxu0 }
 0x48c   :  { %3713 = vtanh.f32 %v1641_v60  ;;  %v1639_v7 = vadd.f32 %v1590_v8, %v1278_v29  ;;  %v1673_v8 = vsub.f32 1.0, %v5065_v12 }
 0x48d   :  { %v3692_v13 = vpop.eup %3691  ;;  %3715 = vrcp.f32 %v1380_v54  ;;  %v3275_v26 = vpop.f32.mrf.mxu0  ;;  %v1315_v54 = vadd.f32 %v3995_v50, %v3247_v31 }
 0x48e   :  { %v3694_v51 = vpop.eup %3693  ;;  %3717 = vtanh.f32 %v1639_v7  ;;  %v1644_v39 = vadd.f32 %v3275_v26, %v1299_v42  ;;  %v1700_v46 = vmul.f32 %v3692_v13, %v5020_v43 }
 0x48f   :  { %v3696_v5 = vpop.eup %3695  ;;  %3719 = vrcp.f32 %v1378_v34  ;;  %v1603_v10 = vpop.f32.mrf.mxu0  ;;  %v1384_v24 = vadd.f32 1.0, %v3694_v51 }
 0x490   :  { %v3698_v36 = vpop.eup %3697  ;;  %3721 = vtanh.f32 %v1644_v39  ;;  %v1642_v15 = vadd.f32 %v1603_v10, %v1291_v2  ;;  %v1382_v29 = vadd.f32 1.0, %v3696_v5  ;;  %v5091_v47 = vadd.f32 %v1700_v46, %v1684_v30 }
 0x491   :  { %v3700_v49 = vpop.eup %3699  ;;  %3723 = vrcp.f32 %v1383_v27  ;;  %v3276_v43 = vpop.f32.mrf.mxu0  ;;  %v1698_v1 = vmul.f32 %v3698_v36, %v5026_v44  ;;  %v3996_v44 = vld [vmem:[%s5604_s3 + $0x160] sm:$0xff]  ;;  %v1688_v46 = vmul.f32 %v1672_v63, %v4626_v56  ;;  %v1689_v36 = vmul.f32 %v1673_v8, %v4638_v16 }
 0x492   :  { %v5085_v21 = vpop.eup %3701  ;;  %3725 = vtanh.f32 %v1642_v15  ;;  %v1645_v52 = vadd.f32 %v3276_v43, %v1302_v55  ;;  %v1701_v40 = vmul.f32 %v3700_v49, %v5038_v58  ;;  %v1670_v58 = vsub.f32 1.0, %v5054_v14  ;;  %v1309_v27 = vpop.f32.mrf.mxu1 }
 0x493   :  { %v3704_v38 = vpop.eup %3703  ;;  %3727 = vrcp.f32 %v1381_v59  ;;  %v1606_v48 = vpop.f32.mrf.mxu0  ;;  %v1671_v61 = vsub.f32 1.0, %v5085_v21  ;;  %v1307_v13 = vadd.f32 %v3996_v44, %v1306_v45  ;;  %v5108_v4 = vadd.f32 %v1698_v1, %v1682_v41  ;;  %v3997_v45 = vld [vmem:[%s5604_s3 + $0x178] sm:$0xff] }
 0x494   :  { %3729 = vtanh.f32 %v1645_v52  ;;  %v1643_v42 = vadd.f32 %v1606_v48, %v1294_v6  ;;  %v5094_v60 = vadd.f32 %v1701_v40, %v1685_v0  ;;  %v1699_v35 = vmul.f32 %v3704_v38, %v5040_v25 }
 0x495   :  { %v3706_v31 = vpop.eup %3705  ;;  %3731 = vrcp.f32 %v1384_v24  ;;  %v3279_v34 = vpop.f32.mrf.mxu0  ;;  %v1318_v5 = vadd.f32 %v3997_v45, %v3248_v23  ;;  %v1687_v56 = vmul.f32 %v1671_v61, %v4648_v33 }
 0x496   :  { %v3708_v7 = vpop.eup %3707  ;;  %3733 = vtanh.f32 %v1643_v42  ;;  %v1648_v26 = vadd.f32 %v3279_v34, %v1315_v54  ;;  %v5105_v25 = vpack.c.bf16 %v5094_v60, %v5091_v47  ;;  %v1704_v51 = vmul.f32 %v3706_v31, %v5046_v18  ;;  %v3998_v18 = vld [vmem:[%s5604_s3 + $0x168] sm:$0xff] }
 0x497   :  { %v3710_v30 = vpop.eup %3709  ;;  %3735 = vrcp.f32 %v1382_v29  ;;  %v1619_v11 = vpop.f32.mrf.mxu0  ;;  %v5110_v2 = vadd.f32 %v1699_v35, %v1683_v3  ;;  %v1310_v41 = vadd.f32 %v3998_v18, %v1309_v27  ;;  %v1686_v3 = vmul.f32 %v1670_v58, %v4646_v22 }
 0x498   :  { %v3712_v39 = vpop.eup %3711  ;;  %3737 = vtanh.f32 %v1648_v26  ;;  %v1646_v59 = vadd.f32 %v1619_v11, %v1307_v13  ;;  %2930 = vst [vmem:[%s5605_s4 + $0x48] sm:$0xff] %v5105_v25   ;;  %v1702_v24 = vmul.f32 %v3710_v30, %v5054_v14  ;;  %v5130_v43 = vadd.f32 %v1704_v51, %v1688_v46 }
 0x499   :  { %v3714_v10 = vpop.eup %3713  ;;  %v3280_v0 = vpop.f32.mrf.mxu0  ;;  %v5126_v28 = vpack.c.bf16 %v5110_v2, %v5108_v4  ;;  %v1676_v54 = vsub.f32 1.0, %v3708_v7  ;;  %v1674_v29 = vsub.f32 1.0, %v3712_v39 }
 0x49a   :  { %v3716_v55 = vpop.eup %3715  ;;  %3739 = vtanh.f32 %v1646_v59  ;;  %v1649_v15 = vadd.f32 %v3280_v0, %v1318_v5  ;;  %v1705_v49 = vmul.f32 %v3714_v10, %v5065_v12  ;;  %v5143_v33 = vadd.f32 %v1702_v24, %v1686_v3 }
 0x49b   :  { %v3718_v9 = vpop.eup %3717  ;;  %v1622_v6 = vpop.f32.mrf.mxu0  ;;  %2929 = vst [vmem:[%s5605_s4 + $0x40] sm:$0xff] %v5126_v28   ;;  %v1677_v23 = vsub.f32 1.0, %v3716_v55  ;;  %v1692_v34 = vmul.f32 %v1676_v54, %v4674_v62  ;;  %v1690_v44 = vmul.f32 %v1674_v29, %v4683_v37  ;;  %v4006_v54 = vld [vmem:[%s5602_s1 + $0x40] sm:$0xff]   ;;  %v4011_v29 = vld [vmem:[%s5602_s1 + $0x68] sm:$0xff]  }
 0x49c   :  { %v3720_v16 = vpop.eup %3719  ;;  %3741 = vtanh.f32 %v1649_v15  ;;  %v1647_v63 = vadd.f32 %v1622_v6, %v1310_v41  ;;  %v5138_v50 = vadd.f32 %v1705_v49, %v1689_v36  ;;  %v1703_v14 = vmul.f32 %v3718_v9, %v5085_v21 }
 0x49d   :  { %v3722_v12 = vpop.eup %3721  ;;  %v1675_v42 = vsub.f32 1.0, %v3720_v16  ;;  %v1693_v8 = vmul.f32 %v1677_v23, %v4676_v57  ;;  %v4007_v23 = vld [vmem:[%s5602_s1 + $0x48] sm:$0xff]  }
 0x49e   :  { %v3724_v52 = vpop.eup %3723  ;;  %3743 = vtanh.f32 %v1647_v63  ;;  %v1733_v22 = vpack.c.bf16 %v5138_v50, %v5130_v43  ;;  %v5145_v40 = vadd.f32 %v1703_v14, %v1687_v56  ;;  %v1708_v1 = vmul.f32 %v3722_v12, %v3708_v7  ;;  %v4001_v63 = vld [vmem:[%s5602_s1 + $0x18] sm:$0xff]   ;;  %v4004_v14 = vld [vmem:[%s5602_s1 + $0x30] sm:$0xff]  }
 0x49f   :  { %v3726_v38 = vpop.eup %3725  ;;  %v1691_v30 = vmul.f32 %v1675_v42, %v4685_v53  ;;  %v1680_v51 = vsub.f32 1.0, %v3724_v52  ;;  %v4005_v12 = vld [vmem:[%s5602_s1 + $0x38] sm:$0xff]   ;;  %v4014_v42 = vld [vmem:[%s5602_s1 + $0x80] sm:$0xff]  }
 0x4a0   :  { %v3728_v48 = vpop.eup %3727  ;;  %2932 = vst [vmem:[%s5605_s4 + $0x58] sm:$0xff] %v1733_v22   ;;  %v1732_v21 = vpack.c.bf16 %v5145_v40, %v5143_v33  ;;  %v1706_v61 = vmul.f32 %v3726_v38, %v3712_v39  ;;  %v5158_v27 = vadd.f32 %v1708_v1, %v1692_v34  ;;  %v4010_v38 = vld [vmem:[%s5602_s1 + $0x60] sm:$0xff]   ;;  %v4013_v1 = vld [vmem:[%s5602_s1 + $0x78] sm:$0xff]  }
 0x4a1   :  { %v3730_v35 = vpop.eup %3729  ;;  %v1678_v37 = vsub.f32 1.0, %v3728_v48  ;;  %v1696_v0 = vmul.f32 %v1680_v51, %v4704_v32  ;;  %v4018_v34 = vld [vmem:[%s5602_s1 + $0xa0] sm:$0xff]  }
 0x4a2   :  { %v3732_v31 = vpop.eup %3731  ;;  %v1709_v58 = vmul.f32 %v3730_v35, %v3716_v55  ;;  %2931 = vst [vmem:[%s5605_s4 + $0x50] sm:$0xff] %v1732_v21   ;;  %v5165_v45 = vadd.f32 %v1706_v61, %v1690_v44  ;;  %v4016_v35 = vld [vmem:[%s5602_s1 + $0x90] sm:$0xff]   ;;  %v4021_v61 = vld [vmem:[%s5602_s1 + $0xb8] sm:$0xff]  }
 0x4a3   :  { %v3734_v7 = vpop.eup %3733  ;;  %v1681_v57 = vsub.f32 1.0, %v3732_v31  ;;  %v1694_v49 = vmul.f32 %v1678_v37, %v4713_v19 }
 0x4a4   :  { %v3736_v13 = vpop.eup %3735  ;;  %v5160_v26 = vadd.f32 %v1709_v58, %v1693_v8  ;;  %v1707_v11 = vmul.f32 %v3734_v7, %v3720_v16  ;;  %v4000_v16 = vld [vmem:[%s5602_s1 + $0x10] sm:$0xff]   ;;  %v4019_v8 = vld [vmem:[%s5602_s1 + $0xa8] sm:$0xff]  }
 0x4a5   :  { %v3738_v62 = vpop.eup %3737  ;;  %v1679_v18 = vsub.f32 1.0, %v3736_v13  ;;  %v1697_v46 = vmul.f32 %v1681_v57, %v4706_v17  ;;  %v4020_v58 = vld [vmem:[%s5602_s1 + $0xb0] sm:$0xff]  }
 0x4a6   :  { %v1735_v39 = vpack.c.bf16 %v5160_v26, %v5158_v27  ;;  %v5167_v5 = vadd.f32 %v1707_v11, %v1691_v30  ;;  %v1712_v10 = vmul.f32 %v3738_v62, %v3724_v52  ;;  %v4008_v52 = vld [vmem:[%s5602_s1 + $0x50] sm:$0xff]  }
 0x4a7   :  { %v3740_v59 = vpop.eup %3739  ;;  %v1695_v6 = vmul.f32 %v1679_v18, %v4715_v20  ;;  %v3999_v20 = vld [vmem:[%s5602_s1 + $0x8] sm:$0xff]  }
 0x4a8   :  { %2934 = vst [vmem:[%s5605_s4 + $0x68] sm:$0xff] %v1735_v39   ;;  %v1734_v53 = vpack.c.bf16 %v5167_v5, %v5165_v45  ;;  %v1710_v55 = vmul.f32 %v3740_v59, %v3728_v48  ;;  %v5180_v24 = vadd.f32 %v1712_v10, %v1696_v0  ;;  %v4012_v48 = vld [vmem:[%s5602_s1 + $0x70] sm:$0xff]  }
 0x4a9   :  { %v3742_v41 = vpop.eup %3741 }
 0x4aa   :  { %v1713_v36 = vmul.f32 %v3742_v41, %v3732_v31  ;;  %2933 = vst [vmem:[%s5605_s4 + $0x60] sm:$0xff] %v1734_v53   ;;  %v5187_v17 = vadd.f32 %v1710_v55, %v1694_v49  ;;  %v4017_v31 = vld [vmem:[%s5602_s1 + $0x98] sm:$0xff]  }
 0x4ab   :  { %v3744_v15 = vpop.eup %3743 }
 0x4ac   :  { %v5182_v9 = vadd.f32 %v1713_v36, %v1697_v46  ;;  %v1711_v3 = vmul.f32 %v3744_v15, %v3736_v13 }
 0x4ae   :  { %v1737_v32 = vpack.c.bf16 %v5182_v9, %v5180_v24  ;;  %v5189_v56 = vadd.f32 %v1711_v3, %v1695_v6 }
 0x4b0   :  { %2936 = vst [vmem:[%s5605_s4 + $0x78] sm:$0xff] %v1737_v32   ;;  %3281 = vmatprep.subr.bf16.mxu0 %v1737_v32  ;;  %v1736_v19 = vpack.c.bf16 %v5189_v56, %v5187_v17 }
 0x4b1   :  { %3282 = vmatpush3.bf16.msra.mxu0 %v1737_v32 }
 0x4b2   :  { %2935 = vst [vmem:[%s5605_s4 + $0x70] sm:$0xff] %v1736_v19   ;;  %3283 = vmatprep.subr.bf16.mxu0 %v1736_v19 }
 0x4b5   :  { %3284 = vmatpush3.bf16.msra.mxu0 %v1736_v19 }
 0x4b6   :  { %3285 = vmatprep.subr.bf16.mxu0 %v1735_v39 }
 0x4b9   :  { %3286 = vmatpush3.bf16.msra.mxu0 %v1735_v39 }
 0x4ba   :  { %3287 = vmatprep.subr.bf16.mxu0 %v1734_v53 }
 0x4bd   :  { %3288 = vmatpush3.bf16.msra.mxu0 %v1734_v53 }
 0x4be   :  { %3289 = vmatprep.subr.bf16.mxu0 %v1733_v22 }
 0x4c1   :  { %3290 = vmatpush3.bf16.msra.mxu0 %v1733_v22  ;;  %v4009_v22 = vld [vmem:[%s5602_s1 + $0x58] sm:$0xff]  }
 0x4c2   :  { %3291 = vmatprep.subr.bf16.mxu0 %v1732_v21 }
 0x4c5   :  { %3292 = vmatpush3.bf16.msra.mxu0 %v1732_v21  ;;  %v4015_v21 = vld [vmem:[%s5602_s1 + $0x88] sm:$0xff]  }
 0x4c6   :  { %3293 = vmatprep.subr.bf16.mxu0 %v5105_v25 }
 0x4c9   :  { %3294 = vmatpush3.bf16.msra.mxu0 %v5105_v25  ;;  %v4002_v25 = vld [vmem:[%s5602_s1 + $0x20] sm:$0xff]  }
 0x4ca   :  { %3295 = vmatprep.subr.bf16.mxu0 %v5126_v28 }
 0x4cd   :  { %3296 = vmatpush3.bf16.msra.mxu0 %v5126_v28  ;;  %v4003_v28 = vld [vmem:[%s5602_s1 + $0x28] sm:$0xff]  }
 0x4d0   :  { %3298 = vmatmul.mubr.bf16.vlgmr.msra.gmra.mxu0 %v3999_v20 }
 0x4d1   :  { %3301 = vmatprep.mubr.bf16.mxu0 %v4000_v16 }
 0x4d8   :  { %3302 = vmatmul.mubr.bf16.gmra.mxu0 %v4001_v63 }
 0x4d9   :  { %3305 = vmatprep.mubr.bf16.mxu0 %v4002_v25  ;;  %v4022_v25 = vld [vmem:[%s5604_s3 + $0xd8] sm:$0xff] }
 0x4e0   :  { %3306 = vmatmul.mubr.bf16.gmra.mxu0 %v4003_v28 }
 0x4e1   :  { %3309 = vmatprep.mubr.bf16.mxu0 %v4004_v14 }
 0x4e8   :  { %3310 = vmatmul.mubr.bf16.gmra.mxu0 %v4005_v12  ;;  %v4023_v12 = vld [vmem:[%s5604_s3 + $0xd0] sm:$0xff] }
 0x4e9   :  { %3313 = vmatprep.mubr.bf16.mxu0 %v4006_v54 }
 0x4f0   :  { %3314 = vmatmul.mubr.bf16.gmra.mxu0 %v4007_v23  ;;  %v4024_v23 = vld [vmem:[%s5604_s3 + $0xf0] sm:$0xff] }
 0x4f1   :  { %3317 = vmatprep.mubr.bf16.mxu0 %v4008_v52 }
 0x4f8   :  { %3318 = vmatmul.mubr.bf16.gmra.mxu0 %v4009_v22 }
 0x4f9   :  { %3321 = vmatprep.mubr.bf16.mxu0 %v4010_v38 }
 0x500   :  { %3322 = vmatmul.mubr.bf16.gmra.mxu0 %v4011_v29  ;;  %v4025_v29 = vld [vmem:[%s5604_s3 + $0xc8] sm:$0xff] }
 0x501   :  { %3325 = vmatprep.mubr.bf16.mxu0 %v4012_v48 }
 0x508   :  { %3326 = vmatmul.mubr.bf16.gmra.mxu0 %v4013_v1 }
 0x509   :  { %3329 = vmatprep.mubr.bf16.mxu0 %v4014_v42  ;;  %v4026_v42 = vld [vmem:[%s5604_s3 + $0xe0] sm:$0xff] }
 0x510   :  { %3330 = vmatmul.mubr.bf16.gmra.mxu0 %v4015_v21 }
 0x511   :  { %3333 = vmatprep.mubr.bf16.mxu0 %v4016_v35 }
 0x518   :  { %3334 = vmatmul.mubr.bf16.gmra.mxu0 %v4017_v31 }
 0x519   :  { %3337 = vmatprep.mubr.bf16.mxu0 %v4018_v34 }
 0x520   :  { %3338 = vmatmul.mubr.bf16.gmra.mxu0 %v4019_v8  ;;  %v4027_v8 = vld [vmem:[%s5604_s3 + $0xf8] sm:$0xff] }
 0x521   :  { %3341 = vmatprep.mubr.bf16.mxu0 %v4020_v58 }
 0x528   :  { %3342 = vmatmul.mubr.bf16.gmra.mxu0 %v4021_v61  ;;  %v4028_v61 = vld [vmem:[%s5604_s3 + $0xc0] sm:$0xff] }
 0x590   :  { %v5272_v7 = vpop.f32.mrf.mxu0 }
 0x592   :  { %v5274_v44 = vpop.f32.mrf.mxu0 }
 0x594   :  { %v5276_v13 = vpop.f32.mrf.mxu0 }
 0x596   :  { %v5278_v30 = vpop.f32.mrf.mxu0 }
 0x598   :  { %v5280_v11 = vpop.f32.mrf.mxu0 }
 0x59a   :  { %v5282_v62 = vpop.f32.mrf.mxu0 }
 0x59c   :  { %v5284_v51 = vpop.f32.mrf.mxu0 }
 0x59e   :  { %v5286_v57 = vpop.f32.mrf.mxu0 }
 0x5a0   :  { %v5288_v39 = vpop.f32.mrf.mxu0 }
 0x5a2   :  { %v5290_v59 = vpop.f32.mrf.mxu0 }
 0x5a4   :  { %v5292_v37 = vpop.f32.mrf.mxu0 }
 0x5a6   :  { %v5294_v10 = vpop.f32.mrf.mxu0 }
 0x5a8   :  { %v5296_v18 = vpop.f32.mrf.mxu0 }
 0x5aa   :  { %v5298_v53 = vpop.f32.mrf.mxu0 }
 0x5ac   :  { %v5300_v41 = vpop.f32.mrf.mxu0 }
 0x5ae   :  { %v5302_v0 = vpop.f32.mrf.mxu0 }
 0x5b0   :  { %v3315_v46 = vpop.f32.mrf.mxu0 }
 0x5b2   :  { %v5304_v36 = vpop.f32.mrf.mxu0 }
 0x5b4   :  { %v3316_v55 = vpop.f32.mrf.mxu0 }
 0x5b6   :  { %v1912_v15 = vpop.f32.mrf.mxu0 }
 0x5b8   :  { %v3319_v49 = vpop.f32.mrf.mxu0 }
 0x5ba   :  { %v1925_v6 = vpop.f32.mrf.mxu0 }
 0x5bc   :  { %v3320_v3 = vpop.f32.mrf.mxu0 }
 0x5be   :  { %v1928_v32 = vpop.f32.mrf.mxu0 }
 0x5c0   :  { %v3323_v19 = vpop.f32.mrf.mxu0 }
 0x5c1   :  { %v1950_v54 = vadd.f32 %v4023_v12, %v3323_v19  ;;  %v4030_v12 = vld [vmem:[%s5604_s3 + $0xb8] sm:$0xff] }
 0x5c2   :  { %v1941_v20 = vpop.f32.mrf.mxu0 }
 0x5c3   :  { %v2716_v31 = vmul.f32 -1.442695, %v1950_v54  ;;  %v1942_v19 = vadd.f32 %v4028_v61, %v1941_v20  ;;  %v1937_v54 = vadd.f32 %v4030_v12, %v3320_v3  ;;  %v4031_v20 = vld [vmem:[%s5604_s3 + $0xb0] sm:$0xff]  ;;  %v4033_v3 = vld [vmem:[%s5604_s3 + $0xa8] sm:$0xff] }
 0x5c4   :  { %v3324_v16 = vpop.f32.mrf.mxu0 }
 0x5c5   :  { %v1953_v28 = vadd.f32 %v4022_v25, %v3324_v16 }
 0x5c6   :  { %v1944_v63 = vpop.f32.mrf.mxu0 }
 0x5c7   :  { %v2717_v38 = vmul.f32 -1.442695, %v1953_v28  ;;  %v1945_v48 = vadd.f32 %v4025_v29, %v1944_v63  ;;  %v4029_v28 = vld [vmem:[%s5604_s3 + $0xe8] sm:$0xff] }
 0x5c8   :  { %v3327_v14 = vpop.f32.mrf.mxu0 }
 0x5c9   :  { %v1966_v52 = vadd.f32 %v4024_v23, %v3327_v14  ;;  %v2715_v63 = vmul.f32 -1.442695, %v1945_v48  ;;  %v2713_v48 = vmul.f32 -1.442695, %v1937_v54 }
 0x5ca   :  { %v1957_v22 = vpop.f32.mrf.mxu0 }
 0x5cb   :  { %v2720_v1 = vmul.f32 -1.442695, %v1966_v52  ;;  %v1958_v21 = vadd.f32 %v4026_v42, %v1957_v22  ;;  %v1934_v52 = vadd.f32 %v4031_v20, %v3319_v49  ;;  %v2714_v22 = vmul.f32 -1.442695, %v1942_v19  ;;  %v4034_v42 = vld [vmem:[%s5604_s3 + $0x98] sm:$0xff] }
 0x5cc   :  { %v3328_v35 = vpop.f32.mrf.mxu0  ;;  %v1921_v49 = vadd.f32 %v4034_v42, %v3316_v55 }
 0x5cd   :  { %v2718_v34 = vmul.f32 -1.442695, %v1958_v21  ;;  %v1969_v58 = vadd.f32 %v4027_v8, %v3328_v35  ;;  %3745 = vpow2.f32 %v2720_v1  ;;  %v1929_v1 = vadd.f32 %v4033_v3, %v1928_v32  ;;  %v4035_v35 = vld [vmem:[%s5604_s3 + $0xa0] sm:$0xff] }
 0x5ce   :  { %v1960_v16 = vpop.f32.mrf.mxu0  ;;  %3747 = vpow2.f32 %v2717_v38  ;;  %v4032_v38 = vld [vmem:[%s5604_s3 + $0x90] sm:$0xff]  ;;  %v2712_v21 = vmul.f32 -1.442695, %v1934_v52 }
 0x5cf   :  { %v2721_v25 = vmul.f32 -1.442695, %v1969_v58  ;;  %v1961_v14 = vadd.f32 %v4029_v28, %v1960_v16  ;;  %3749 = vpow2.f32 %v2718_v34  ;;  %v1918_v29 = vadd.f32 %v4032_v38, %v3315_v46  ;;  %v4036_v34 = vld [vmem:[%s5604_s3 + $0x88] sm:$0xff] }
 0x5d0   :  { %3751 = vpow2.f32 %v2716_v31  ;;  %v1926_v31 = vadd.f32 %v4035_v35, %v1925_v6  ;;  %v1913_v8 = vadd.f32 %v4036_v34, %v1912_v15  ;;  %v2711_v32 = vmul.f32 -1.442695, %v1929_v1  ;;  %v4037_v6 = vld [vmem:[%s5604_s3 + $0x80] sm:$0xff] }
 0x5d1   :  { %v2719_v23 = vmul.f32 -1.442695, %v1961_v14  ;;  %3753 = vpow2.f32 %v2721_v25  ;;  %v2708_v46 = vmul.f32 -1.442695, %v1918_v29  ;;  %v2709_v58 = vmul.f32 -1.442695, %v1921_v49 }
 0x5d2   :  { %3755 = vpow2.f32 %v2715_v63  ;;  %v2710_v61 = vmul.f32 -1.442695, %v1926_v31  ;;  %v2707_v55 = vmul.f32 -1.442695, %v1913_v8  ;;  %v1910_v28 = vadd.f32 %v4037_v6, %v5304_v36 }
 0x5d3   :  { %3757 = vpow2.f32 %v2719_v23 }
 0x5d4   :  { %3759 = vpow2.f32 %v2714_v22  ;;  %v2706_v22 = vmul.f32 -1.442695, %v1910_v28 }
 0x5d5   :  { %3761 = vpow2.f32 %v2713_v48 }
 0x5d6   :  { %3763 = vpow2.f32 %v2712_v21 }
 0x5d7   :  { %3765 = vpow2.f32 %v2708_v46 }
 0x5d8   :  { %3767 = vpow2.f32 %v2711_v32 }
 0x5d9   :  { %3769 = vpow2.f32 %v2709_v58 }
 0x5da   :  { %v3746_v19 = vpop.eup %3745  ;;  %3771 = vpow2.f32 %v2710_v61 }
 0x5db   :  { %v3748_v16 = vpop.eup %3747  ;;  %v2194_v63 = vadd.f32 1.0, %v3746_v19  ;;  %3773 = vpow2.f32 %v2707_v55 }
 0x5dc   :  { %v3750_v25 = vpop.eup %3749  ;;  %v2191_v54 = vadd.f32 1.0, %v3748_v16 }
 0x5dd   :  { %v3752_v15 = vpop.eup %3751  ;;  %v2192_v14 = vadd.f32 1.0, %v3750_v25  ;;  %3775 = vrcp.f32 %v2194_v63 }
 0x5de   :  { %v3754_v12 = vpop.eup %3753  ;;  %v2190_v38 = vadd.f32 1.0, %v3752_v15 }
 0x5df   :  { %v3756_v23 = vpop.eup %3755  ;;  %v2195_v20 = vadd.f32 1.0, %v3754_v12  ;;  %3777 = vrcp.f32 %v2192_v14 }
 0x5e0   :  { %v3758_v52 = vpop.eup %3757  ;;  %v2189_v3 = vadd.f32 1.0, %v3756_v23 }
 0x5e1   :  { %3779 = vrcp.f32 %v2195_v20  ;;  %v2193_v29 = vadd.f32 1.0, %v3758_v52  ;;  %v3760_v48 = vpop.eup %3759 }
 0x5e2   :  { %3781 = vrcp.f32 %v2191_v54  ;;  %v3762_v36 = vpop.eup %3761  ;;  %v2188_v1 = vadd.f32 1.0, %v3760_v48 }
 0x5e3   :  { %3783 = vrcp.f32 %v2193_v29  ;;  %v3764_v42 = vpop.eup %3763  ;;  %v2187_v21 = vadd.f32 1.0, %v3762_v36 }
 0x5e4   :  { %3785 = vpow2.f32 %v2706_v22  ;;  %v3766_v49 = vpop.eup %3765  ;;  %v2186_v46 = vadd.f32 1.0, %v3764_v42 }
 0x5e5   :  { %3787 = vrcp.f32 %v2190_v38  ;;  %v3768_v35 = vpop.eup %3767  ;;  %v2182_v15 = vadd.f32 1.0, %v3766_v49 }
 0x5e6   :  { %3789 = vrcp.f32 %v2189_v3  ;;  %v3770_v31 = vpop.eup %3769  ;;  %v2185_v32 = vadd.f32 1.0, %v3768_v35 }
 0x5e7   :  { %3791 = vrcp.f32 %v2188_v1  ;;  %v3772_v34 = vpop.eup %3771  ;;  %v2183_v63 = vadd.f32 1.0, %v3770_v31 }
 0x5e8   :  { %v3774_v8 = vpop.eup %3773  ;;  %3793 = vrcp.f32 %v2187_v21  ;;  %v2184_v19 = vadd.f32 1.0, %v3772_v34 }
 0x5e9   :  { %3795 = vrcp.f32 %v2186_v46  ;;  %v2181_v52 = vadd.f32 1.0, %v3774_v8 }
 0x5ea   :  { %v3776_v58 = vpop.eup %3775  ;;  %3797 = vrcp.f32 %v2185_v32 }
 0x5eb   :  { %v2242_v25 = vmul.f32 %v3776_v58, %v5180_v24  ;;  %3799 = vrcp.f32 %v2184_v19 }
 0x5ec   :  { %v3778_v61 = vpop.eup %3777  ;;  %3801 = vrcp.f32 %v2183_v63 }
 0x5ed   :  { %v2240_v54 = vmul.f32 %v3778_v61, %v5187_v17  ;;  %3803 = vrcp.f32 %v2182_v15 }
 0x5ee   :  { %v3780_v55 = vpop.eup %3779  ;;  %3805 = vrcp.f32 %v2181_v52  ;;  %v4039_v52 = vld [vmem:[%s5603_s2 + $0x10] sm:$0xff]  }
 0x5ef   :  { %v3782_v16 = vpop.eup %3781  ;;  %v2243_v6 = vmul.f32 %v3780_v55, %v5182_v9 }
 0x5f0   :  { %v3784_v28 = vpop.eup %3783  ;;  %v2239_v38 = vmul.f32 %v3782_v16, %v5160_v26 }
 0x5f1   :  { %v3786_v14 = vpop.eup %3785  ;;  %v2251_v12 = vpack.c.bf16 %v2243_v6, %v2242_v25  ;;  %v2241_v23 = vmul.f32 %v3784_v28, %v5189_v56 }
 0x5f2   :  { %v3788_v20 = vpop.eup %3787  ;;  %v2180_v48 = vadd.f32 1.0, %v3786_v14 }
 0x5f3   :  { %3345 = vmatprep.subr.bf16.mxu1 %v2251_v12  ;;  %v2250_v22 = vpack.c.bf16 %v2241_v23, %v2240_v54  ;;  %v3790_v29 = vpop.eup %3789  ;;  %v2238_v3 = vmul.f32 %v3788_v20, %v5158_v27  ;;  %v4038_v20 = vld [vmem:[%s5603_s2 + $0x8] sm:$0xff]  }
 0x5f4   :  { %3346 = vmatpush3.bf16.msra.mxu1 %v2251_v12  ;;  %v3792_v36 = vpop.eup %3791  ;;  %v2237_v42 = vmul.f32 %v3790_v29, %v5167_v5  ;;  %3807 = vrcp.f32 %v2180_v48  ;;  %v4042_v29 = vld [vmem:[%s5603_s2 + $0x28] sm:$0xff]   ;;  %v4043_v48 = vld [vmem:[%s5603_s2 + $0x30] sm:$0xff]  }
 0x5f5   :  { %3347 = vmatprep.subr.bf16.mxu1 %v2250_v22  ;;  %v2249_v1 = vpack.c.bf16 %v2239_v38, %v2238_v3  ;;  %v3794_v49 = vpop.eup %3793  ;;  %v2236_v21 = vmul.f32 %v3792_v36, %v5165_v45  ;;  %v4041_v38 = vld [vmem:[%s5603_s2 + $0x20] sm:$0xff]   ;;  %v4044_v3 = vld [vmem:[%s5603_s2 + $0x38] sm:$0xff]   ;;  %v4045_v36 = vld [vmem:[%s5604_s3 + $0x10] sm:$0xff] }
 0x5f6   :  { %v3796_v35 = vpop.eup %3795  ;;  %v2235_v46 = vmul.f32 %v3794_v49, %v5138_v50 }
 0x5f7   :  { %v2248_v31 = vpack.c.bf16 %v2237_v42, %v2236_v21  ;;  %v3798_v34 = vpop.eup %3797  ;;  %v2234_v8 = vmul.f32 %v3796_v35, %v5130_v43  ;;  %v4046_v42 = vld [vmem:[%s5604_s3] sm:$0xff]  ;;  %v5400_v21 = vpop.f32.mrf.mxu0 }
 0x5f8   :  { %3348 = vmatpush3.bf16.msra.mxu1 %v2250_v22  ;;  %v3800_v32 = vpop.eup %3799  ;;  %v2233_v61 = vmul.f32 %v3798_v34, %v5145_v40  ;;  %v4040_v22 = vld [vmem:[%s5603_s2 + $0x18] sm:$0xff]   ;;  %v1846_v49 = vadd.f32 %v4046_v42, %v5274_v44 }
 0x5f9   :  { %3349 = vmatprep.subr.bf16.mxu1 %v2249_v1  ;;  %v2247_v58 = vpack.c.bf16 %v2235_v46, %v2234_v8  ;;  %v3802_v19 = vpop.eup %3801  ;;  %v2232_v55 = vmul.f32 %v3800_v32, %v5143_v33  ;;  %v5410_v32 = vpop.f32.mrf.mxu0 }
 0x5fa   :  { %v3804_v16 = vpop.eup %3803  ;;  %v2231_v25 = vmul.f32 %v3802_v19, %v5094_v60  ;;  %v2690_v34 = vmul.f32 -1.442695, %v1846_v49 }
 0x5fb   :  { %v2246_v63 = vpack.c.bf16 %v2233_v61, %v2232_v55  ;;  %v3806_v6 = vpop.eup %3805  ;;  %v2230_v28 = vmul.f32 %v3804_v16, %v5091_v47  ;;  %v5420_v16 = vpop.f32.mrf.mxu0 }
 0x5fc   :  { %3350 = vmatpush3.bf16.msra.mxu1 %v2249_v1  ;;  %v2229_v12 = vmul.f32 %v3806_v6, %v5110_v2  ;;  %v1854_v1 = vadd.f32 %v4045_v36, %v5272_v7  ;;  %v4048_v7 = vld [vmem:[%s5604_s3 + $0x8] sm:$0xff] }
 0x5fd   :  { %3351 = vmatprep.subr.bf16.mxu1 %v2248_v31  ;;  %v2245_v14 = vpack.c.bf16 %v2231_v25, %v2230_v28  ;;  %v1849_v8 = vadd.f32 %v4048_v7, %v5278_v30  ;;  %v5422_v25 = vpop.f32.mrf.mxu0 }
 0x5fe   :  { %v2692_v35 = vmul.f32 -1.442695, %v1854_v1 }
 0x5ff   :  { %v2691_v19 = vmul.f32 -1.442695, %v1849_v8  ;;  %v5428_v28 = vpop.f32.mrf.mxu0 }
 0x600   :  { %3352 = vmatpush3.bf16.msra.mxu1 %v2248_v31  ;;  %v4047_v31 = vld [vmem:[%s5604_s3 + $0x18] sm:$0xff]  ;;  %3809 = vpow2.f32 %v2692_v35 }
 0x601   :  { %3353 = vmatprep.subr.bf16.mxu1 %v2247_v58  ;;  %v3808_v15 = vpop.eup %3807  ;;  %v1857_v46 = vadd.f32 %v4047_v31, %v5276_v13  ;;  %3811 = vpow2.f32 %v2690_v34  ;;  %v4050_v13 = vld [vmem:[%s5604_s3 + $0x20] sm:$0xff] }
 0x602   :  { %v2228_v54 = vmul.f32 %v3808_v15, %v5108_v4  ;;  %v1862_v55 = vadd.f32 %v4050_v13, %v5282_v62  ;;  %v4052_v62 = vld [vmem:[%s5604_s3 + $0x28] sm:$0xff] }
 0x603   :  { %v2693_v44 = vmul.f32 -1.442695, %v1857_v46  ;;  %v1865_v15 = vadd.f32 %v4052_v62, %v5286_v57 }
 0x604   :  { %3354 = vmatpush3.bf16.msra.mxu1 %v2247_v58  ;;  %v2244_v23 = vpack.c.bf16 %v2229_v12, %v2228_v54  ;;  %v4049_v58 = vld [vmem:[%s5604_s3 + $0x30] sm:$0xff] }
 0x605   :  { %3355 = vmatprep.subr.bf16.mxu1 %v2246_v63  ;;  %v1870_v61 = vadd.f32 %v4049_v58, %v5280_v11  ;;  %3813 = vpow2.f32 %v2693_v44  ;;  %v4051_v11 = vld [vmem:[%s5604_s3 + $0x38] sm:$0xff]  ;;  %v4053_v54 = vld [vmem:[%s5604_s3 + $0x50] sm:$0xff] }
 0x606   :  { %3815 = vpow2.f32 %v2691_v19  ;;  %v1873_v6 = vadd.f32 %v4051_v11, %v5284_v51  ;;  %v4060_v11 = vld [vmem:[%s5604_s3 + $0x110] sm:$0xff] }
 0x607   :  { %v2696_v30 = vmul.f32 -1.442695, %v1870_v61 }
 0x608   :  { %3356 = vmatpush3.bf16.msra.mxu1 %v2246_v63  ;;  %v2694_v63 = vmul.f32 -1.442695, %v1862_v55  ;;  %v2697_v12 = vmul.f32 -1.442695, %v1873_v6  ;;  %v1982_v6 = vadd.f32 %v4060_v11, %v5400_v21  ;;  %v4062_v21 = vld [vmem:[%s5604_s3 + $0x100] sm:$0xff] }
 0x609   :  { %3357 = vmatprep.subr.bf16.mxu1 %v2245_v14  ;;  %3817 = vpow2.f32 %v2696_v30 }
 0x60a   :  { %3819 = vpow2.f32 %v2694_v63 }
 0x60b   :  { %3821 = vpow2.f32 %v2697_v12 }
 0x60c   :  { %3358 = vmatpush3.bf16.msra.mxu1 %v2245_v14 }
 0x60d   :  { %3359 = vmatprep.subr.bf16.mxu1 %v2244_v23  ;;  %v3810_v14 = vpop.eup %3809 }
 0x60e   :  { %v3812_v51 = vpop.eup %3811 }
 0x60f   :  { %v2084_v36 = vadd.f32 1.0, %v3812_v51 }
 0x610   :  { %3360 = vmatpush3.bf16.msra.mxu1 %v2244_v23  ;;  %v1886_v23 = vadd.f32 %v4053_v54, %v5288_v39 }
 0x612   :  { %v3814_v57 = vpop.eup %3813 }
 0x613   :  { %3362 = vmatmul.mubr.bf16.vlgmr.msra.gmra.mxu1 %v4038_v20  ;;  %v5438_v20 = vpop.f32.mrf.mxu0  ;;  %v3816_v42 = vpop.eup %3815  ;;  %v2087_v31 = vadd.f32 1.0, %v3814_v57 }
 0x614   :  { %3365 = vmatprep.mubr.bf16.mxu1 %v4039_v52  ;;  %v2695_v52 = vmul.f32 -1.442695, %v1865_v15  ;;  %v2085_v8 = vadd.f32 1.0, %v3816_v42  ;;  %v4061_v15 = vld [vmem:[%s5604_s3 + $0x68] sm:$0xff] }
 0x615   :  { %v5448_v1 = vpop.f32.mrf.mxu0  ;;  %v4064_v42 = vld [vmem:[%s5604_s3 + $0x108] sm:$0xff] }
 0x616   :  { %3823 = vpow2.f32 %v2695_v52  ;;  %v3818_v46 = vpop.eup %3817 }
 0x617   :  { %v5458_v44 = vpop.f32.mrf.mxu0  ;;  %v3820_v58 = vpop.eup %3819  ;;  %v2090_v13 = vadd.f32 1.0, %v3818_v46 }
 0x618   :  { %v2088_v63 = vadd.f32 1.0, %v3820_v58  ;;  %v3822_v54 = vpop.eup %3821 }
 0x619   :  { %v5472_v62 = vpop.f32.mrf.mxu0 }
 0x61b   :  { %3366 = vmatmul.mubr.bf16.gmra.mxu1 %v4040_v22  ;;  %v4054_v22 = vld [vmem:[%s5604_s3 + $0x40] sm:$0xff]  ;;  %v5482_v52 = vpop.f32.mrf.mxu0 }
 0x61c   :  { %3369 = vmatprep.mubr.bf16.mxu1 %v4041_v38  ;;  %v1878_v38 = vadd.f32 %v4054_v22, %v5290_v59  ;;  %v4056_v59 = vld [vmem:[%s5604_s3 + $0x48] sm:$0xff] }
 0x61d   :  { %v1881_v35 = vadd.f32 %v4056_v59, %v5294_v10  ;;  %v4058_v10 = vld [vmem:[%s5604_s3 + $0x60] sm:$0xff] }
 0x61e   :  { %v2698_v49 = vmul.f32 -1.442695, %v1878_v38  ;;  %v1894_v19 = vadd.f32 %v4058_v10, %v5298_v53 }
 0x61f   :  { %v2699_v61 = vmul.f32 -1.442695, %v1881_v35  ;;  %v4065_v35 = vld [vmem:[%s5604_s3 + $0x130] sm:$0xff] }
 0x620   :  { %v2702_v53 = vmul.f32 -1.442695, %v1894_v19 }
 0x623   :  { %3370 = vmatmul.mubr.bf16.gmra.mxu1 %v4042_v29  ;;  %v2086_v29 = vadd.f32 1.0, %v3810_v14  ;;  %v1897_v14 = vadd.f32 %v4061_v15, %v5302_v0  ;;  %v4063_v0 = vld [vmem:[%s5604_s3 + $0x118] sm:$0xff] }
 0x624   :  { %3373 = vmatprep.mubr.bf16.mxu1 %v4043_v48  ;;  %v2700_v48 = vmul.f32 -1.442695, %v1886_v23  ;;  %v1974_v23 = vadd.f32 %v4062_v21, %v5410_v32  ;;  %v1985_v57 = vadd.f32 %v4063_v0, %v5420_v16  ;;  %v1998_v16 = vadd.f32 %v4065_v35, %v5428_v28  ;;  %v4066_v28 = vld [vmem:[%s5604_s3 + $0x120] sm:$0xff]  ;;  %v4068_v21 = vld [vmem:[%s5604_s3 + $0x128] sm:$0xff] }
 0x625   :  { %3825 = vrcp.f32 %v2086_v29  ;;  %v2703_v22 = vmul.f32 -1.442695, %v1897_v14  ;;  %v3824_v29 = vpop.eup %3823  ;;  %v1990_v19 = vadd.f32 %v4066_v28, %v5438_v20 }
 0x626   :  { %3827 = vpow2.f32 %v2700_v48 }
 0x627   :  { %3829 = vrcp.f32 %v2084_v36 }
 0x628   :  { %3831 = vpow2.f32 %v2698_v49  ;;  %v1977_v49 = vadd.f32 %v4064_v42, %v5422_v25 }
 0x629   :  { %3833 = vrcp.f32 %v2087_v31  ;;  %v5498_v31 = vpop.f32.mrf.mxu0 }
 0x62b   :  { %3374 = vmatmul.mubr.bf16.gmra.mxu1 %v4044_v3  ;;  %v4055_v3 = vld [vmem:[%s5604_s3 + $0x58] sm:$0xff] }
 0x62c   :  { %v1889_v39 = vadd.f32 %v4055_v3, %v5292_v37  ;;  %v4057_v37 = vld [vmem:[%s5604_s3 + $0x70] sm:$0xff] }
 0x62d   :  { %v1902_v7 = vadd.f32 %v4057_v37, %v5296_v18  ;;  %v4059_v18 = vld [vmem:[%s5604_s3 + $0x78] sm:$0xff] }
 0x62e   :  { %v2701_v34 = vmul.f32 -1.442695, %v1889_v39  ;;  %v1905_v30 = vadd.f32 %v4059_v18, %v5300_v41  ;;  %v2091_v39 = vadd.f32 1.0, %v3822_v54 }
 0x62f   :  { %v2704_v55 = vmul.f32 -1.442695, %v1902_v7 }
 0x630   :  { %3835 = vpow2.f32 %v2701_v34  ;;  %v2705_v41 = vmul.f32 -1.442695, %v1905_v30  ;;  %v2089_v34 = vadd.f32 1.0, %v3824_v29 }
 0x631   :  { %3837 = vrcp.f32 %v2085_v8 }
 0x632   :  { %3839 = vpow2.f32 %v2699_v61  ;;  %v5488_v3 = vpop.eup %3825 }
 0x633   :  { %3841 = vrcp.f32 %v2090_v13  ;;  %v3828_v36 = vpop.eup %3827  ;;  %v2383_v20 = vsub.f32 1.0, %v5488_v3 }
 0x634   :  { %3843 = vpow2.f32 %v2704_v55  ;;  %v5500_v46 = vpop.eup %3829  ;;  %v2094_v25 = vadd.f32 1.0, %v3828_v36  ;;  %v2008_v55 = vpop.f32.mrf.mxu0 }
 0x635   :  { %3845 = vrcp.f32 %v2088_v63  ;;  %v3832_v7 = vpop.eup %3831  ;;  %v2381_v0 = vsub.f32 1.0, %v5500_v46  ;;  %v2399_v35 = vmul.f32 %v2383_v20, %v5091_v47 }
 0x636   :  { %3847 = vpow2.f32 %v2702_v53  ;;  %v5502_v58 = vpop.eup %3833  ;;  %v2092_v30 = vadd.f32 1.0, %v3832_v7 }
 0x63d   :  { %v3836_v10 = vpop.eup %3835 }
 0x63e   :  { %v5508_v18 = vpop.eup %3837 }
 0x63f   :  { %v3840_v11 = vpop.eup %3839  ;;  %v2382_v42 = vsub.f32 1.0, %v5508_v18 }
 0x640   :  { %v5514_v14 = vpop.eup %3841 }
 0x641   :  { %v3844_v54 = vpop.eup %3843  ;;  %v2387_v47 = vsub.f32 1.0, %v5514_v14 }
 0x642   :  { %v5525_v29 = vpop.eup %3845 }
 0x6d3   :  { %v3363_v12 = vpop.f32.mrf.mxu1 }
 0x6d4   :  { %v2351_v51 = vadd.f32 %v3363_v12, %v1982_v6  ;;  %v4067_v6 = vld [vmem:[%s5604_s3 + $0x138] sm:$0xff] }
 0x6d5   :  { %v2286_v38 = vpop.f32.mrf.mxu1  ;;  %v2001_v53 = vadd.f32 %v4067_v6, %v5448_v1  ;;  %v4069_v1 = vld [vmem:[%s5604_s3 + $0x150] sm:$0xff] }
 0x6d6   :  { %3849 = vtanh.f32 %v2351_v51  ;;  %v2349_v48 = vadd.f32 %v2286_v38, %v1974_v23  ;;  %v1993_v23 = vadd.f32 %v4068_v21, %v5458_v44  ;;  %v3343_v38 = vpop.f32.mrf.mxu0 }
 0x6d7   :  { %3851 = vpow2.f32 %v2705_v41  ;;  %v3364_v32 = vpop.f32.mrf.mxu1  ;;  %v2095_v41 = vadd.f32 1.0, %v3836_v10 }
 0x6d8   :  { %3853 = vtanh.f32 %v2349_v48  ;;  %v2352_v59 = vadd.f32 %v3364_v32, %v1985_v57  ;;  %v2384_v57 = vsub.f32 1.0, %v5502_v58  ;;  %v2093_v48 = vadd.f32 1.0, %v3840_v11  ;;  %v3848_v32 = vpop.eup %3847  ;;  %v2021_v7 = vpop.f32.mrf.mxu0 }
 0x6d9   :  { %3855 = vpow2.f32 %v2703_v22  ;;  %v2289_v37 = vpop.f32.mrf.mxu1  ;;  %v2014_v22 = vadd.f32 %v4069_v1, %v5472_v62 }
 0x6da   :  { %3857 = vtanh.f32 %v2352_v59  ;;  %v2350_v8 = vadd.f32 %v2289_v37, %v1977_v49  ;;  %v2098_v49 = vadd.f32 1.0, %v3844_v54  ;;  %v2400_v10 = vmul.f32 %v2384_v57, %v5094_v60  ;;  %v4072_v60 = vld [vmem:[%s5604_s3 + $0x148] sm:$0xff] }
 0x6db   :  { %3859 = vrcp.f32 %v2091_v39  ;;  %v3367_v61 = vpop.f32.mrf.mxu1  ;;  %v2096_v54 = vadd.f32 1.0, %v3848_v32  ;;  %v2385_v57 = vsub.f32 1.0, %v5525_v29 }
 0x6dc   :  { %3861 = vtanh.f32 %v2350_v8  ;;  %v2355_v13 = vadd.f32 %v3367_v61, %v1998_v16  ;;  %v4070_v16 = vld [vmem:[%s5604_s3 + $0x140] sm:$0xff]  ;;  %v2397_v61 = vmul.f32 %v2381_v0, %v5108_v4  ;;  %v2009_v4 = vadd.f32 %v4072_v60, %v2008_v55 }
 0x6dd   :  { %3863 = vrcp.f32 %v2089_v34  ;;  %v2302_v63 = vpop.f32.mrf.mxu1  ;;  %v2006_v34 = vadd.f32 %v4070_v16, %v5482_v52 }
 0x6de   :  { %3865 = vtanh.f32 %v2355_v13  ;;  %v2353_v15 = vadd.f32 %v2302_v63, %v1990_v19  ;;  %v4071_v13 = vld [vmem:[%s5604_s3 + $0x158] sm:$0xff] }
 0x6df   :  { %3867 = vrcp.f32 %v2094_v25  ;;  %v3368_v12 = vpop.f32.mrf.mxu1  ;;  %v2017_v52 = vadd.f32 %v4071_v13, %v5498_v31  ;;  %v3344_v31 = vpop.f32.mrf.mxu0 }
 0x6e0   :  { %3869 = vtanh.f32 %v2353_v15  ;;  %v2356_v51 = vadd.f32 %v3368_v12, %v2001_v53 }
 0x6e1   :  { %3871 = vrcp.f32 %v2092_v30  ;;  %v2305_v39 = vpop.f32.mrf.mxu1 }
 0x6e2   :  { %3873 = vtanh.f32 %v2356_v51  ;;  %v2354_v44 = vadd.f32 %v2305_v39, %v1993_v23  ;;  %v4074_v39 = vld [vmem:[%s5604_s3 + $0x160] sm:$0xff] }
 0x6e3   :  { %v3850_v36 = vpop.eup %3849  ;;  %3875 = vrcp.f32 %v2095_v41  ;;  %v3371_v59 = vpop.f32.mrf.mxu1  ;;  %v2022_v32 = vadd.f32 %v4074_v39, %v2021_v7 }
 0x6e4   :  { %v3852_v62 = vpop.eup %3851  ;;  %3877 = vtanh.f32 %v2354_v44  ;;  %v2359_v37 = vadd.f32 %v3371_v59, %v2014_v22  ;;  %v2415_v25 = vmul.f32 %v3850_v36, %v5488_v3  ;;  %v2398_v3 = vmul.f32 %v2382_v42, %v5110_v2  ;;  %v4073_v2 = vld [vmem:[%s5604_s3 + $0x170] sm:$0xff]  ;;  %v2024_v59 = vpop.f32.mrf.mxu0 }
 0x6e5   :  { %v3854_v8 = vpop.eup %3853  ;;  %3879 = vrcp.f32 %v2093_v48  ;;  %v2318_v28 = vpop.f32.mrf.mxu1  ;;  %v2099_v11 = vadd.f32 1.0, %v3852_v62  ;;  %v2030_v51 = vadd.f32 %v4073_v2, %v3343_v38 }
 0x6e6   :  { %v3856_v19 = vpop.eup %3855  ;;  %3881 = vtanh.f32 %v2359_v37  ;;  %v2357_v30 = vadd.f32 %v2318_v28, %v2006_v34  ;;  %v2413_v15 = vmul.f32 %v3854_v8, %v5500_v46  ;;  %v2431_v23 = vadd.f32 %v2415_v25, %v2399_v35  ;;  %v4075_v8 = vld [vmem:[%s5604_s3 + $0x178] sm:$0xff] }
 0x6e7   :  { %v3858_v63 = vpop.eup %3857  ;;  %3883 = vrcp.f32 %v2098_v49  ;;  %v3372_v6 = vpop.f32.mrf.mxu1  ;;  %v2097_v21 = vadd.f32 1.0, %v3856_v19  ;;  %v2033_v25 = vadd.f32 %v4075_v8, %v3344_v31  ;;  %v2403_v28 = vmul.f32 %v2387_v47, %v5130_v43  ;;  %v4076_v19 = vld [vmem:[%s5604_s3 + $0x168] sm:$0xff] }
 0x6e8   :  { %v3860_v53 = vpop.eup %3859  ;;  %v2416_v20 = vmul.f32 %v3858_v63, %v5502_v58  ;;  %3885 = vtanh.f32 %v2357_v30  ;;  %v2360_v41 = vadd.f32 %v3372_v6, %v2017_v52  ;;  %v2429_v38 = vadd.f32 %v2413_v15, %v2397_v61 }
 0x6e9   :  { %v3862_v12 = vpop.eup %3861  ;;  %v2321_v1 = vpop.f32.mrf.mxu1  ;;  %v2388_v48 = vsub.f32 1.0, %v3860_v53  ;;  %v2025_v13 = vadd.f32 %v4076_v19, %v2024_v59 }
 0x6ea   :  { %v3864_v55 = vpop.eup %3863  ;;  %v2432_v22 = vadd.f32 %v2416_v20, %v2400_v10  ;;  %v2414_v0 = vmul.f32 %v3862_v12, %v5508_v18  ;;  %3887 = vtanh.f32 %v2360_v41  ;;  %v2358_v46 = vadd.f32 %v2321_v1, %v2009_v4 }
 0x6eb   :  { %v3866_v58 = vpop.eup %3865  ;;  %3889 = vrcp.f32 %v2099_v11  ;;  %v3375_v44 = vpop.f32.mrf.mxu1  ;;  %v2386_v62 = vsub.f32 1.0, %v3864_v55 }
 0x6ec   :  { %v3868_v36 = vpop.eup %3867  ;;  %v2890_v42 = vpack.c.bf16 %v2432_v22, %v2431_v23  ;;  %v2430_v49 = vadd.f32 %v2414_v0, %v2398_v3  ;;  %3891 = vtanh.f32 %v2358_v46  ;;  %v2419_v35 = vmul.f32 %v3866_v58, %v5514_v14 }
 0x6ed   :  { %v3870_v18 = vpop.eup %3869  ;;  %3893 = vrcp.f32 %v2096_v54  ;;  %v2363_v16 = vadd.f32 %v3375_v44, %v2030_v51  ;;  %v2334_v34 = vpop.f32.mrf.mxu1  ;;  %v2404_v14 = vmul.f32 %v2388_v48, %v5138_v50  ;;  %v2401_v50 = vmul.f32 %v2385_v57, %v5143_v33 }
 0x6ee   :  { %v3872_v37 = vpop.eup %3871  ;;  %3895 = vrcp.f32 %v2097_v21  ;;  %2938 = vst [vmem:[%s5605_s4 + $0x88] sm:$0xff] %v2890_v42   ;;  %v2885_v7 = vpack.c.bf16 %v2430_v49, %v2429_v38  ;;  %v2361_v61 = vadd.f32 %v2334_v34, %v2022_v32  ;;  %v2417_v63 = vmul.f32 %v3870_v18, %v5525_v29 }
 0x6ef   :  { %v3874_v10 = vpop.eup %3873  ;;  %3897 = vtanh.f32 %v2363_v16  ;;  %v3376_v52 = vpop.f32.mrf.mxu1  ;;  %v2435_v47 = vadd.f32 %v2419_v35, %v2403_v28  ;;  %v2402_v60 = vmul.f32 %v2386_v62, %v5145_v40  ;;  %v2391_v12 = vsub.f32 1.0, %v3868_v36 }
 0x6f0   :  { %v3876_v30 = vpop.eup %3875  ;;  %2937 = vst [vmem:[%s5605_s4 + $0x80] sm:$0xff] %v2885_v7   ;;  %v2420_v11 = vmul.f32 %v3874_v10, %v3860_v53  ;;  %3899 = vtanh.f32 %v2361_v61  ;;  %v2364_v3 = vadd.f32 %v3376_v52, %v2033_v25  ;;  %v2433_v29 = vadd.f32 %v2417_v63, %v2401_v50 }
 0x6f1   :  { %v3878_v43 = vpop.eup %3877  ;;  %v2337_v4 = vpop.f32.mrf.mxu1  ;;  %v2392_v54 = vsub.f32 1.0, %v3876_v30  ;;  %v2389_v51 = vsub.f32 1.0, %v3872_v37  ;;  %v2407_v0 = vmul.f32 %v2391_v12, %v5158_v27 }
 0x6f2   :  { %v3880_v6 = vpop.eup %3879  ;;  %v2436_v15 = vadd.f32 %v2420_v11, %v2404_v14  ;;  %v2418_v20 = vmul.f32 %v3878_v43, %v3864_v55  ;;  %3901 = vtanh.f32 %v2364_v3  ;;  %v2362_v41 = vadd.f32 %v2337_v4, %v2025_v13 }
 0x6f3   :  { %v3882_v31 = vpop.eup %3881  ;;  %v2390_v1 = vsub.f32 1.0, %v3880_v6  ;;  %v2408_v58 = vmul.f32 %v2392_v54, %v5160_v26  ;;  %v2405_v39 = vmul.f32 %v2389_v51, %v5165_v45 }
 0x6f4   :  { %v3884_v21 = vpop.eup %3883  ;;  %v2900_v53 = vpack.c.bf16 %v2436_v15, %v2435_v47  ;;  %v2434_v23 = vadd.f32 %v2418_v20, %v2402_v60  ;;  %3903 = vtanh.f32 %v2362_v41  ;;  %v2423_v40 = vmul.f32 %v3882_v31, %v3868_v36 }
 0x6f5   :  { %v3886_v2 = vpop.eup %3885  ;;  %v2406_v36 = vmul.f32 %v2390_v1, %v5167_v5  ;;  %v2395_v59 = vsub.f32 1.0, %v3884_v21 }
 0x6f6   :  { %2940 = vst [vmem:[%s5605_s4 + $0x98] sm:$0xff] %v2900_v53   ;;  %v2895_v33 = vpack.c.bf16 %v2434_v23, %v2433_v29  ;;  %v2421_v46 = vmul.f32 %v3886_v2, %v3872_v37  ;;  %v2439_v44 = vadd.f32 %v2423_v40, %v2407_v0 }
 0x6f7   :  { %v3888_v55 = vpop.eup %3887  ;;  %v2411_v5 = vmul.f32 %v2395_v59, %v5180_v24 }
 0x6f8   :  { %v3890_v22 = vpop.eup %3889  ;;  %2939 = vst [vmem:[%s5605_s4 + $0x90] sm:$0xff] %v2895_v33   ;;  %v2424_v57 = vmul.f32 %v3888_v55, %v3876_v30  ;;  %v2437_v35 = vadd.f32 %v2421_v46, %v2405_v39 }
 0x6f9   :  { %v3892_v48 = vpop.eup %3891  ;;  %v2396_v62 = vsub.f32 1.0, %v3890_v22 }
 0x6fa   :  { %v3894_v32 = vpop.eup %3893  ;;  %v2440_v38 = vadd.f32 %v2424_v57, %v2408_v58  ;;  %v2422_v42 = vmul.f32 %v3892_v48, %v3880_v6 }
 0x6fb   :  { %v3896_v49 = vpop.eup %3895  ;;  %v2393_v37 = vsub.f32 1.0, %v3894_v32  ;;  %v2412_v61 = vmul.f32 %v2396_v62, %v5182_v9 }
 0x6fc   :  { %v3898_v18 = vpop.eup %3897  ;;  %v2910_v16 = vpack.c.bf16 %v2440_v38, %v2439_v44  ;;  %v2438_v27 = vadd.f32 %v2422_v42, %v2406_v36  ;;  %v2394_v26 = vsub.f32 1.0, %v3896_v49 }
 0x6fd   :  { %v3900_v34 = vpop.eup %3899  ;;  %v2427_v7 = vmul.f32 %v3898_v18, %v3884_v21  ;;  %v2409_v14 = vmul.f32 %v2393_v37, %v5187_v17 }
 0x6fe   :  { %2942 = vst [vmem:[%s5605_s4 + $0xa8] sm:$0xff] %v2910_v16   ;;  %v2905_v45 = vpack.c.bf16 %v2438_v27, %v2437_v35  ;;  %v2425_v25 = vmul.f32 %v3900_v34, %v3894_v32  ;;  %v2410_v52 = vmul.f32 %v2394_v26, %v5189_v56 }
 0x6ff   :  { %v3902_v8 = vpop.eup %3901  ;;  %v2443_v19 = vadd.f32 %v2427_v7, %v2411_v5 }
 0x700   :  { %2941 = vst [vmem:[%s5605_s4 + $0xa0] sm:$0xff] %v2905_v45   ;;  %v2428_v10 = vmul.f32 %v3902_v8, %v3890_v22  ;;  %v2441_v63 = vadd.f32 %v2425_v25, %v2409_v14 }
 0x701   :  { %v3904_v28 = vpop.eup %3903 }
 0x702   :  { %v2444_v13 = vadd.f32 %v2428_v10, %v2412_v61  ;;  %v2426_v30 = vmul.f32 %v3904_v28, %v3896_v49 }
 0x704   :  { %v2920_v11 = vpack.c.bf16 %v2444_v13, %v2443_v19  ;;  %v2442_v3 = vadd.f32 %v2426_v30, %v2410_v52 }
 0x706   :  { %2944 = vst [vmem:[%s5605_s4 + $0xb8] sm:$0xff] %v2920_v11   ;;  %v2915_v24 = vpack.c.bf16 %v2442_v3, %v2441_v63 }
 0x708   :  { %2943 = vst [vmem:[%s5605_s4 + $0xb0] sm:$0xff] %v2915_v24  }

</bundles_post_ra>
